<compile_context>
chip_gen: v5e
topology: v5e:2x2
jax: 0.10.0
libtpu: 0.0.40
codegen_flags: <defaults>
</compile_context>

<pallas_src>
import functools

import jax
import jax.numpy as jnp
from jax.experimental import pallas as pl
from jax.experimental.pallas import tpu as pltpu

# bitsandbytes NF4 codebook (16 levels)
NF4_CODEBOOK = (
    -1.0, -0.6961928009986877, -0.5250730514526367, -0.39491748809814453,
    -0.28444138169288635, -0.18477343022823334, -0.09105003625154495, 0.0,
    0.07958029955625534, 0.16093020141124725, 0.24611230194568634,
    0.33791524171829224, 0.44070982933044434, 0.5626170039176941,
    0.7229568362236023, 1.0,
)


def _nf4_select(codes):
    """NF4 code (int32 in [0,15]) -> f32 value.

    Binary-tree select: 4 bit tests + 15 selects (vs 16 cmps + 16 selects for
    the naive where-chain).
    """
    c = NF4_CODEBOOK
    b0 = (codes & 1) != 0
    b1 = (codes & 2) != 0
    b2 = (codes & 4) != 0
    b3 = (codes & 8) != 0
    l0 = [jnp.where(b0, jnp.float32(c[2 * i + 1]), jnp.float32(c[2 * i]))
          for i in range(8)]
    l1 = [jnp.where(b1, l0[2 * i + 1], l0[2 * i]) for i in range(4)]
    l2 = [jnp.where(b2, l1[2 * i + 1], l1[2 * i]) for i in range(2)]
    return jnp.where(b3, l2[1], l2[0])


def _qlora_kernel(x_ref, codes_ref, absmax_ref, bias_ref, xa_ref, b_ref,
                  o_ref, *, scaling, block_k):
    """One (m, n, k) grid step of the QLoRA forward.

    x_ref      : (bm, bk)      bf16  activation tile (cast once in the wrapper)
    codes_ref  : (bk//2, bn)   uint8 packed NF4 codes, (K, N) layout, K-folded
    absmax_ref : (1, bn)       f32   per-output-feature scale
    bias_ref   : (1, bn)       f32
    xa_ref     : (bm, r)       f32   precomputed x @ lora_A tile (k-invariant)
    b_ref      : (r, bn)       f32   lora_B tile
    o_ref      : (bm, bn)      f32   output tile, K-resident accumulator
    """
    k = pl.program_id(2)
    nk = pl.num_programs(2)
    half = block_k // 2

    @pl.when(k == 0)
    def _init():
        o_ref[...] = jnp.zeros_like(o_ref)

    x = x_ref[...]                                            # (bm, bk) bf16

    # Unpack 2 NF4 codes per byte (low nibble = first half of the K tile,
    # high nibble = second half) and dequantize (unscaled code values).
    packed = codes_ref[...].astype(jnp.int32)                 # (bk//2, bn)
    w_lo = _nf4_select(packed & 0xF).astype(jnp.bfloat16)     # (bk//2, bn)
    w_hi = _nf4_select(packed >> 4).astype(jnp.bfloat16)      # values already <16

    # Base path: two bf16 MXU matmuls accumulated straight into the resident
    # f32 output block.  absmax is applied after the reduction (lane-dense).
    o_ref[...] += jnp.dot(x[:, :half], w_lo,
                          preferred_element_type=jnp.float32)
    o_ref[...] += jnp.dot(x[:, half:], w_hi,
                          preferred_element_type=jnp.float32)

    @pl.when(k == nk - 1)
    def _finalize():
        base = o_ref[...] * absmax_ref[...] + bias_ref[...]
        lora = jnp.dot(xa_ref[...].astype(jnp.bfloat16),
                       b_ref[...].astype(jnp.bfloat16),
                       preferred_element_type=jnp.float32)
        o_ref[...] = base + lora * jnp.float32(scaling)


def qlora_linear(x, packed_codes, absmax, bias, lora_a, lora_b, *,
                 scaling, pack_block_k, block_m=256, block_n=512, block_k=512,
                 vmem_limit_bytes=48 * 1024 * 1024):
    """QLoRA forward.

    x:(M,K) f32, packed_codes:(K//2,N) uint8 (K-folded per pack_block_k),
    absmax/bias:(1,N) f32, lora_a:(K,r), lora_b:(r,N).
    Returns (M, N) f32.

    Tuning notes: on v7x keep N//bn >= 2 when M//bm == 1 so both TensorCores
    get work; on v5e prefer larger bm/bn (dequant amortization, x re-read).
    If the packed-code DMA is exposed at tiny bm, add
    pipeline_mode=pl.Buffered(3) on the codes BlockSpec.
    """
    M, K = x.shape
    r = lora_a.shape[1]
    N = lora_b.shape[1]
    bm = min(block_m, M)
    bn = min(block_n, N)
    bk = min(block_k, K)
    # The K fold inside packed_codes is tied to the pack-time block size; a
    # mismatched block_k would silently pair the wrong x columns with the
    # wrong nibbles, so fail loudly instead.
    assert bk == pack_block_k, (
        f"block_k ({bk}) must equal the pack-time fold size ({pack_block_k})")
    assert M % bm == 0 and N % bn == 0 and K % bk == 0 and bk % 2 == 0
    assert packed_codes.shape == (K // 2, N)
    assert absmax.shape == (1, N) and bias.shape == (1, N)
    assert lora_a.shape == (K, r) and lora_b.shape == (r, N)

    # Stream x as bf16 (halves its HBM traffic / VMEM tile) and hoist the
    # rank-r first LoRA matmul out of the grid entirely.
    x_bf = x.astype(jnp.bfloat16)
    xa = jnp.dot(x_bf, lora_a.astype(jnp.bfloat16),
                 preferred_element_type=jnp.float32)           # (M, r) f32

    kernel = functools.partial(_qlora_kernel, scaling=float(scaling),
                               block_k=bk)

    return pl.pallas_call(
        kernel,
        out_shape=jax.ShapeDtypeStruct((M, N), jnp.float32),
        grid_spec=pltpu.PrefetchScalarGridSpec(
            num_scalar_prefetch=0,
            grid=(M // bm, N // bn, K // bk),
            in_specs=[
                pl.BlockSpec((bm, bk), lambda i, j, k: (i, k)),        # x (bf16)
                pl.BlockSpec((bk // 2, bn), lambda i, j, k: (k, j)),   # packed NF4
                pl.BlockSpec((1, bn), lambda i, j, k: (0, j)),         # absmax
                pl.BlockSpec((1, bn), lambda i, j, k: (0, j)),         # bias
                pl.BlockSpec((bm, r), lambda i, j, k: (i, 0)),         # x @ lora_A
                pl.BlockSpec((r, bn), lambda i, j, k: (0, j)),         # lora_B
            ],
            out_specs=pl.BlockSpec((bm, bn), lambda i, j, k: (i, j)),
        ),
        compiler_params=pltpu.CompilerParams(
            dimension_semantics=("parallel", "parallel", "arbitrary"),
            vmem_limit_bytes=vmem_limit_bytes),
    )(x_bf, packed_codes, absmax, bias, xa, lora_b)


def quantize_nf4_pack(w, block_k):
    """Synthetic stand-in for bnb Linear4bit quantization (blocksize = in_features).

    w: (out_features, in_features) = (N, K)
    Returns:
      packed       : (K//2, N) uint8  — (K, N) layout, per-K-tile fold:
                     byte[t*bk/2 + j, n] = code[k = t*bk + j]            (low nibble)
                                         | code[k = t*bk + bk/2 + j] << 4 (high nibble)
      absmax       : (1, N) f32  per-output-feature scale
      codes        : (N, K) int32 unpacked codes (only used by the reference check)
      pack_block_k : the fold size (must match the kernel's block_k)
    """
    # TODO(synk): real bitsandbytes uses 64-element quant blocks + double
    # quantization of absmax; this emulates the simpler
    # "blocksize = in_features" variant of Linear4bit.
    N, K = w.shape
    assert K % block_k == 0 and block_k % 2 == 0
    codebook = jnp.asarray(NF4_CODEBOOK, jnp.float32)
    absmax = jnp.max(jnp.abs(w), axis=1, keepdims=True)                 # (N, 1)
    normalized = w / jnp.maximum(absmax, 1e-12)
    codes = jnp.argmin(
        jnp.abs(normalized[..., None] - codebook[None, None, :]), axis=-1
    ).astype(jnp.int32)                                                 # (N, K)
    codes_kn = codes.T                                                  # (K, N)
    half = block_k // 2
    folded = codes_kn.reshape(K // block_k, 2, half, N)
    packed = (folded[:, 0] | (folded[:, 1] << 4)).reshape(K // 2, N)
    return packed.astype(jnp.uint8), absmax.T, codes, block_k


if __name__ == "__main__":
    # Small demo shapes that still exercise all three grid axes: 1 x 2 x 2 tiles.
    in_features, out_features, rank, alpha = 1024, 512, 4, 8
    M = 16
    scaling = alpha / rank
    block_k, block_n = 512, 256

    key = jax.random.PRNGKey(0)
    kx, kw, kb, ka, kbb = jax.random.split(key, 5)

    x = jax.random.normal(kx, (M, in_features), jnp.float32)
    w_base = jax.random.normal(kw, (out_features, in_features), jnp.float32) * 0.05
    bias = jax.random.normal(kb, (1, out_features), jnp.float32) * 0.01
    lora_a = 0.02 * jax.random.normal(ka, (in_features, rank), jnp.float32)
    # Module init has lora_B = 0; use small non-zero values here so the LoRA
    # path is actually exercised numerically.
    lora_b = 0.02 * jax.random.normal(kbb, (rank, out_features), jnp.float32)

    packed, absmax, codes, pack_bk = quantize_nf4_pack(w_base, block_k=block_k)

    out = qlora_linear(x, packed, absmax, bias, lora_a, lora_b,
                       scaling=scaling, pack_block_k=pack_bk,
                       block_m=256, block_n=block_n, block_k=block_k)
    out = jax.block_until_ready(out)

    # Pure-JAX reference (mirrors the kernel's bf16-input / f32-accumulate math).
    codebook = jnp.asarray(NF4_CODEBOOK, jnp.float32)
    wvals = codebook[codes]                                   # (N, K) unscaled
    xb = x.astype(jnp.bfloat16)
    wb = wvals.astype(jnp.bfloat16)
    base = jnp.dot(xb, wb.T, preferred_element_type=jnp.float32) * absmax + bias
    xa = jnp.dot(xb, lora_a.astype(jnp.bfloat16),
                 preferred_element_type=jnp.float32)
    lora = jnp.dot(xa.astype(jnp.bfloat16), lora_b.astype(jnp.bfloat16),
                   preferred_element_type=jnp.float32)
    ref = base + lora * scaling

    assert out.shape == (M, out_features)
    assert jnp.allclose(out, ref, atol=2e-3, rtol=2e-3), "mismatch vs reference"
    print("KERNEL_OK")
</pallas_src>

<mosaic_0001>
module attributes {stable_mosaic.version = 11 : i64} {
  func.func @_qlora_kernel(%arg0: i32, %arg1: i32, %arg2: i32, %arg3: memref<16x512xbf16, #tpu.memory_space<vmem>>, %arg4: memref<256x256xi8, #tpu.memory_space<vmem>>, %arg5: memref<1x256xf32, #tpu.memory_space<vmem>>, %arg6: memref<1x256xf32, #tpu.memory_space<vmem>>, %arg7: memref<16x4xf32, #tpu.memory_space<vmem>>, %arg8: memref<4x256xf32, #tpu.memory_space<vmem>>, %arg9: memref<16x256xf32, #tpu.memory_space<vmem>>) attributes {dimension_semantics = [#tpu.dimension_semantics<parallel>, #tpu.dimension_semantics<parallel>, #tpu.dimension_semantics<arbitrary>], iteration_bounds = array<i64: 1, 2, 2>, scalar_prefetch = 0 : i64, scratch_operands = 0 : i64, tpu.core_type = #tpu.core_type<tc>, window_params = [{transform_indices = @transform_0, window_bounds = array<i64: 16, 512>}, {transform_indices = @transform_1, window_bounds = array<i64: 256, 256>}, {transform_indices = @transform_2, window_bounds = array<i64: 1, 256>}, {transform_indices = @transform_3, window_bounds = array<i64: 1, 256>}, {transform_indices = @transform_4, window_bounds = array<i64: 16, 4>}, {transform_indices = @transform_5, window_bounds = array<i64: 4, 256>}, {transform_indices = @transform_6, window_bounds = array<i64: 16, 256>}]} {
    %c0_i32 = arith.constant 0 : i32
    %0 = arith.cmpi eq, %arg2, %c0_i32 : i32
    %1 = arith.extui %0 : i1 to i32
    %c0_i32_0 = arith.constant 0 : i32
    %2 = arith.cmpi ne, %1, %c0_i32_0 : i32
    scf.if %2 {
      %cst_60 = arith.constant 0.000000e+00 : f32
      %119 = vector.broadcast %cst_60 : f32 to vector<16x256xf32>
      %c0_61 = arith.constant 0 : index
      %c0_62 = arith.constant 0 : index
      %120 = vector.load %arg9[%c0_61, %c0_62] : memref<16x256xf32, #tpu.memory_space<vmem>>, vector<16x256xf32>
      tpu.vector_store %arg9[%c0_61, %c0_62], %119 {strides = array<i32>} : memref<16x256xf32, #tpu.memory_space<vmem>>, vector<16x256xf32>,
    } else {
    }
    %c0 = arith.constant 0 : index
    %c0_1 = arith.constant 0 : index
    %3 = vector.load %arg3[%c0, %c0_1] : memref<16x512xbf16, #tpu.memory_space<vmem>>, vector<16x512xbf16>
    %c0_2 = arith.constant 0 : index
    %c0_3 = arith.constant 0 : index
    %4 = vector.load %arg4[%c0_2, %c0_3] : memref<256x256xi8, #tpu.memory_space<vmem>>, vector<256x256xi8>
    %5 = arith.extui %4 : vector<256x256xi8> to vector<256x256xi32>
    %c15_i32 = arith.constant 15 : i32
    %6 = vector.broadcast %c15_i32 : i32 to vector<256x256xi32>
    %7 = arith.andi %5, %6 : vector<256x256xi32>
    %c1_i32 = arith.constant 1 : i32
    %8 = vector.broadcast %c1_i32 : i32 to vector<256x256xi32>
    %9 = arith.andi %7, %8 : vector<256x256xi32>
    %c0_i32_4 = arith.constant 0 : i32
    %10 = vector.broadcast %c0_i32_4 : i32 to vector<256x256xi32>
    %11 = arith.cmpi ne, %9, %10 : vector<256x256xi32>
    %c2_i32 = arith.constant 2 : i32
    %12 = vector.broadcast %c2_i32 : i32 to vector<256x256xi32>
    %13 = arith.andi %7, %12 : vector<256x256xi32>
    %c0_i32_5 = arith.constant 0 : i32
    %14 = vector.broadcast %c0_i32_5 : i32 to vector<256x256xi32>
    %15 = arith.cmpi ne, %13, %14 : vector<256x256xi32>
    %c4_i32 = arith.constant 4 : i32
    %16 = vector.broadcast %c4_i32 : i32 to vector<256x256xi32>
    %17 = arith.andi %7, %16 : vector<256x256xi32>
    %c0_i32_6 = arith.constant 0 : i32
    %18 = vector.broadcast %c0_i32_6 : i32 to vector<256x256xi32>
    %19 = arith.cmpi ne, %17, %18 : vector<256x256xi32>
    %c8_i32 = arith.constant 8 : i32
    %20 = vector.broadcast %c8_i32 : i32 to vector<256x256xi32>
    %21 = arith.andi %7, %20 : vector<256x256xi32>
    %c0_i32_7 = arith.constant 0 : i32
    %22 = vector.broadcast %c0_i32_7 : i32 to vector<256x256xi32>
    %23 = arith.cmpi ne, %21, %22 : vector<256x256xi32>
    %cst = arith.constant -0.6961928 : f32
    %cst_8 = arith.constant -1.000000e+00 : f32
    %24 = vector.broadcast %cst : f32 to vector<256x256xf32>
    %25 = vector.broadcast %cst_8 : f32 to vector<256x256xf32>
    %26 = arith.select %11, %24, %25 : vector<256x256xi1>, vector<256x256xf32>
    %cst_9 = arith.constant -0.394917488 : f32
    %cst_10 = arith.constant -0.525073051 : f32
    %27 = vector.broadcast %cst_9 : f32 to vector<256x256xf32>
    %28 = vector.broadcast %cst_10 : f32 to vector<256x256xf32>
    %29 = arith.select %11, %27, %28 : vector<256x256xi1>, vector<256x256xf32>
    %cst_11 = arith.constant -0.18477343 : f32
    %cst_12 = arith.constant -0.284441382 : f32
    %30 = vector.broadcast %cst_11 : f32 to vector<256x256xf32>
    %31 = vector.broadcast %cst_12 : f32 to vector<256x256xf32>
    %32 = arith.select %11, %30, %31 : vector<256x256xi1>, vector<256x256xf32>
    %cst_13 = arith.constant 0.000000e+00 : f32
    %cst_14 = arith.constant -0.0910500362 : f32
    %33 = vector.broadcast %cst_13 : f32 to vector<256x256xf32>
    %34 = vector.broadcast %cst_14 : f32 to vector<256x256xf32>
    %35 = arith.select %11, %33, %34 : vector<256x256xi1>, vector<256x256xf32>
    %cst_15 = arith.constant 0.160930201 : f32
    %cst_16 = arith.constant 0.0795802995 : f32
    %36 = vector.broadcast %cst_15 : f32 to vector<256x256xf32>
    %37 = vector.broadcast %cst_16 : f32 to vector<256x256xf32>
    %38 = arith.select %11, %36, %37 : vector<256x256xi1>, vector<256x256xf32>
    %cst_17 = arith.constant 0.337915242 : f32
    %cst_18 = arith.constant 0.246112302 : f32
    %39 = vector.broadcast %cst_17 : f32 to vector<256x256xf32>
    %40 = vector.broadcast %cst_18 : f32 to vector<256x256xf32>
    %41 = arith.select %11, %39, %40 : vector<256x256xi1>, vector<256x256xf32>
    %cst_19 = arith.constant 5.626170e-01 : f32
    %cst_20 = arith.constant 0.440709829 : f32
    %42 = vector.broadcast %cst_19 : f32 to vector<256x256xf32>
    %43 = vector.broadcast %cst_20 : f32 to vector<256x256xf32>
    %44 = arith.select %11, %42, %43 : vector<256x256xi1>, vector<256x256xf32>
    %cst_21 = arith.constant 1.000000e+00 : f32
    %cst_22 = arith.constant 0.722956836 : f32
    %45 = vector.broadcast %cst_21 : f32 to vector<256x256xf32>
    %46 = vector.broadcast %cst_22 : f32 to vector<256x256xf32>
    %47 = arith.select %11, %45, %46 : vector<256x256xi1>, vector<256x256xf32>
    %48 = arith.select %15, %29, %26 : vector<256x256xi1>, vector<256x256xf32>
    %49 = arith.select %15, %35, %32 : vector<256x256xi1>, vector<256x256xf32>
    %50 = arith.select %15, %41, %38 : vector<256x256xi1>, vector<256x256xf32>
    %51 = arith.select %15, %47, %44 : vector<256x256xi1>, vector<256x256xf32>
    %52 = arith.select %19, %49, %48 : vector<256x256xi1>, vector<256x256xf32>
    %53 = arith.select %19, %51, %50 : vector<256x256xi1>, vector<256x256xf32>
    %54 = arith.select %23, %53, %52 : vector<256x256xi1>, vector<256x256xf32>
    %55 = arith.truncf %54 : vector<256x256xf32> to vector<256x256xbf16>
    %c4_i32_23 = arith.constant 4 : i32
    %56 = vector.broadcast %c4_i32_23 : i32 to vector<256x256xi32>
    %57 = arith.shrsi %5, %56 : vector<256x256xi32>
    %c1_i32_24 = arith.constant 1 : i32
    %58 = vector.broadcast %c1_i32_24 : i32 to vector<256x256xi32>
    %59 = arith.andi %57, %58 : vector<256x256xi32>
    %c0_i32_25 = arith.constant 0 : i32
    %60 = vector.broadcast %c0_i32_25 : i32 to vector<256x256xi32>
    %61 = arith.cmpi ne, %59, %60 : vector<256x256xi32>
    %c2_i32_26 = arith.constant 2 : i32
    %62 = vector.broadcast %c2_i32_26 : i32 to vector<256x256xi32>
    %63 = arith.andi %57, %62 : vector<256x256xi32>
    %c0_i32_27 = arith.constant 0 : i32
    %64 = vector.broadcast %c0_i32_27 : i32 to vector<256x256xi32>
    %65 = arith.cmpi ne, %63, %64 : vector<256x256xi32>
    %c4_i32_28 = arith.constant 4 : i32
    %66 = vector.broadcast %c4_i32_28 : i32 to vector<256x256xi32>
    %67 = arith.andi %57, %66 : vector<256x256xi32>
    %c0_i32_29 = arith.constant 0 : i32
    %68 = vector.broadcast %c0_i32_29 : i32 to vector<256x256xi32>
    %69 = arith.cmpi ne, %67, %68 : vector<256x256xi32>
    %c8_i32_30 = arith.constant 8 : i32
    %70 = vector.broadcast %c8_i32_30 : i32 to vector<256x256xi32>
    %71 = arith.andi %57, %70 : vector<256x256xi32>
    %c0_i32_31 = arith.constant 0 : i32
    %72 = vector.broadcast %c0_i32_31 : i32 to vector<256x256xi32>
    %73 = arith.cmpi ne, %71, %72 : vector<256x256xi32>
    %cst_32 = arith.constant -0.6961928 : f32
    %cst_33 = arith.constant -1.000000e+00 : f32
    %74 = vector.broadcast %cst_32 : f32 to vector<256x256xf32>
    %75 = vector.broadcast %cst_33 : f32 to vector<256x256xf32>
    %76 = arith.select %61, %74, %75 : vector<256x256xi1>, vector<256x256xf32>
    %cst_34 = arith.constant -0.394917488 : f32
    %cst_35 = arith.constant -0.525073051 : f32
    %77 = vector.broadcast %cst_34 : f32 to vector<256x256xf32>
    %78 = vector.broadcast %cst_35 : f32 to vector<256x256xf32>
    %79 = arith.select %61, %77, %78 : vector<256x256xi1>, vector<256x256xf32>
    %cst_36 = arith.constant -0.18477343 : f32
    %cst_37 = arith.constant -0.284441382 : f32
    %80 = vector.broadcast %cst_36 : f32 to vector<256x256xf32>
    %81 = vector.broadcast %cst_37 : f32 to vector<256x256xf32>
    %82 = arith.select %61, %80, %81 : vector<256x256xi1>, vector<256x256xf32>
    %cst_38 = arith.constant 0.000000e+00 : f32
    %cst_39 = arith.constant -0.0910500362 : f32
    %83 = vector.broadcast %cst_38 : f32 to vector<256x256xf32>
    %84 = vector.broadcast %cst_39 : f32 to vector<256x256xf32>
    %85 = arith.select %61, %83, %84 : vector<256x256xi1>, vector<256x256xf32>
    %cst_40 = arith.constant 0.160930201 : f32
    %cst_41 = arith.constant 0.0795802995 : f32
    %86 = vector.broadcast %cst_40 : f32 to vector<256x256xf32>
    %87 = vector.broadcast %cst_41 : f32 to vector<256x256xf32>
    %88 = arith.select %61, %86, %87 : vector<256x256xi1>, vector<256x256xf32>
    %cst_42 = arith.constant 0.337915242 : f32
    %cst_43 = arith.constant 0.246112302 : f32
    %89 = vector.broadcast %cst_42 : f32 to vector<256x256xf32>
    %90 = vector.broadcast %cst_43 : f32 to vector<256x256xf32>
    %91 = arith.select %61, %89, %90 : vector<256x256xi1>, vector<256x256xf32>
    %cst_44 = arith.constant 5.626170e-01 : f32
    %cst_45 = arith.constant 0.440709829 : f32
    %92 = vector.broadcast %cst_44 : f32 to vector<256x256xf32>
    %93 = vector.broadcast %cst_45 : f32 to vector<256x256xf32>
    %94 = arith.select %61, %92, %93 : vector<256x256xi1>, vector<256x256xf32>
    %cst_46 = arith.constant 1.000000e+00 : f32
    %cst_47 = arith.constant 0.722956836 : f32
    %95 = vector.broadcast %cst_46 : f32 to vector<256x256xf32>
    %96 = vector.broadcast %cst_47 : f32 to vector<256x256xf32>
    %97 = arith.select %61, %95, %96 : vector<256x256xi1>, vector<256x256xf32>
    %98 = arith.select %65, %79, %76 : vector<256x256xi1>, vector<256x256xf32>
    %99 = arith.select %65, %85, %82 : vector<256x256xi1>, vector<256x256xf32>
    %100 = arith.select %65, %91, %88 : vector<256x256xi1>, vector<256x256xf32>
    %101 = arith.select %65, %97, %94 : vector<256x256xi1>, vector<256x256xf32>
    %102 = arith.select %69, %99, %98 : vector<256x256xi1>, vector<256x256xf32>
    %103 = arith.select %69, %101, %100 : vector<256x256xi1>, vector<256x256xf32>
    %104 = arith.select %73, %103, %102 : vector<256x256xi1>, vector<256x256xf32>
    %105 = arith.truncf %104 : vector<256x256xf32> to vector<256x256xbf16>
    %c0_48 = arith.constant 0 : index
    %c0_49 = arith.constant 0 : index
    %106 = vector.load %arg9[%c0_48, %c0_49] : memref<16x256xf32, #tpu.memory_space<vmem>>, vector<16x256xf32>
    %107 = vector.extract_strided_slice %3 {offsets = [0, 0], sizes = [16, 256], strides = [1, 1]} : vector<16x512xbf16> to vector<16x256xbf16>
    %cst_50 = arith.constant dense<0.000000e+00> : vector<16x256xf32>
    %108 = tpu.matmul %107, %55, %cst_50 {dimension_numbers = #tpu.dot_dimension_numbers<[1], [0], [0], [1], [0, 0, 1, 1], [], []>} : vector<16x256xbf16>, vector<256x256xbf16>, vector<16x256xf32> -> vector<16x256xf32>
    %109 = arith.addf %106, %108 : vector<16x256xf32>
    %c0_51 = arith.constant 0 : index
    %c0_52 = arith.constant 0 : index
    %110 = vector.load %arg9[%c0_51, %c0_52] : memref<16x256xf32, #tpu.memory_space<vmem>>, vector<16x256xf32>
    tpu.vector_store %arg9[%c0_51, %c0_52], %109 {strides = array<i32>} : memref<16x256xf32, #tpu.memory_space<vmem>>, vector<16x256xf32>,
    %c0_53 = arith.constant 0 : index
    %c0_54 = arith.constant 0 : index
    %111 = vector.load %arg9[%c0_53, %c0_54] : memref<16x256xf32, #tpu.memory_space<vmem>>, vector<16x256xf32>
    %112 = vector.extract_strided_slice %3 {offsets = [0, 256], sizes = [16, 256], strides = [1, 1]} : vector<16x512xbf16> to vector<16x256xbf16>
    %cst_55 = arith.constant dense<0.000000e+00> : vector<16x256xf32>
    %113 = tpu.matmul %112, %105, %cst_55 {dimension_numbers = #tpu.dot_dimension_numbers<[1], [0], [0], [1], [0, 0, 1, 1], [], []>} : vector<16x256xbf16>, vector<256x256xbf16>, vector<16x256xf32> -> vector<16x256xf32>
    %114 = arith.addf %111, %113 : vector<16x256xf32>
    %c0_56 = arith.constant 0 : index
    %c0_57 = arith.constant 0 : index
    %115 = vector.load %arg9[%c0_56, %c0_57] : memref<16x256xf32, #tpu.memory_space<vmem>>, vector<16x256xf32>
    tpu.vector_store %arg9[%c0_56, %c0_57], %114 {strides = array<i32>} : memref<16x256xf32, #tpu.memory_space<vmem>>, vector<16x256xf32>,
    %c1_i32_58 = arith.constant 1 : i32
    %116 = arith.cmpi eq, %arg2, %c1_i32_58 : i32
    %117 = arith.extui %116 : i1 to i32
    %c0_i32_59 = arith.constant 0 : i32
    %118 = arith.cmpi ne, %117, %c0_i32_59 : i32
    scf.if %118 {
      %c0_60 = arith.constant 0 : index
      %c0_61 = arith.constant 0 : index
      %119 = vector.load %arg9[%c0_60, %c0_61] : memref<16x256xf32, #tpu.memory_space<vmem>>, vector<16x256xf32>
      %c0_62 = arith.constant 0 : index
      %c0_63 = arith.constant 0 : index
      %120 = vector.load %arg5[%c0_62, %c0_63] : memref<1x256xf32, #tpu.memory_space<vmem>>, vector<1x256xf32>
      %121 = vector.broadcast %120 : vector<1x256xf32> to vector<16x256xf32>
      %122 = arith.mulf %119, %121 : vector<16x256xf32>
      %c0_64 = arith.constant 0 : index
      %c0_65 = arith.constant 0 : index
      %123 = vector.load %arg6[%c0_64, %c0_65] : memref<1x256xf32, #tpu.memory_space<vmem>>, vector<1x256xf32>
      %124 = vector.broadcast %123 : vector<1x256xf32> to vector<16x256xf32>
      %125 = arith.addf %122, %124 : vector<16x256xf32>
      %c0_66 = arith.constant 0 : index
      %c0_67 = arith.constant 0 : index
      %126 = vector.load %arg7[%c0_66, %c0_67] : memref<16x4xf32, #tpu.memory_space<vmem>>, vector<16x4xf32>
      %127 = arith.truncf %126 : vector<16x4xf32> to vector<16x4xbf16>
      %c0_68 = arith.constant 0 : index
      %c0_69 = arith.constant 0 : index
      %128 = vector.load %arg8[%c0_68, %c0_69] : memref<4x256xf32, #tpu.memory_space<vmem>>, vector<4x256xf32>
      %129 = arith.truncf %128 : vector<4x256xf32> to vector<4x256xbf16>
      %cst_70 = arith.constant dense<0.000000e+00> : vector<16x256xf32>
      %130 = tpu.matmul %127, %129, %cst_70 {dimension_numbers = #tpu.dot_dimension_numbers<[1], [0], [0], [1], [0, 0, 1, 1], [], []>} : vector<16x4xbf16>, vector<4x256xbf16>, vector<16x256xf32> -> vector<16x256xf32>
      %cst_71 = arith.constant 2.000000e+00 : f32
      %131 = vector.broadcast %cst_71 : f32 to vector<16x256xf32>
      %132 = arith.mulf %130, %131 : vector<16x256xf32>
      %133 = arith.addf %125, %132 : vector<16x256xf32>
      %c0_72 = arith.constant 0 : index
      %c0_73 = arith.constant 0 : index
      %134 = vector.load %arg9[%c0_72, %c0_73] : memref<16x256xf32, #tpu.memory_space<vmem>>, vector<16x256xf32>
      tpu.vector_store %arg9[%c0_72, %c0_73], %133 {strides = array<i32>} : memref<16x256xf32, #tpu.memory_space<vmem>>, vector<16x256xf32>,
    } else {
    }
    return
  }
  func.func @transform_0(%arg0: i32, %arg1: i32, %arg2: i32) -> (i32, i32) {
    %c0_i32 = arith.constant 0 : i32
    return %arg0, %arg2 : i32, i32
  }
  func.func @transform_1(%arg0: i32, %arg1: i32, %arg2: i32) -> (i32, i32) {
    %c0_i32 = arith.constant 0 : i32
    return %arg2, %arg1 : i32, i32
  }
  func.func @transform_2(%arg0: i32, %arg1: i32, %arg2: i32) -> (i32, i32) {
    %c0_i32 = arith.constant 0 : i32
    %c0_i32_0 = arith.constant 0 : i32
    return %c0_i32, %arg1 : i32, i32
  }
  func.func @transform_3(%arg0: i32, %arg1: i32, %arg2: i32) -> (i32, i32) {
    %c0_i32 = arith.constant 0 : i32
    %c0_i32_0 = arith.constant 0 : i32
    return %c0_i32, %arg1 : i32, i32
  }
  func.func @transform_4(%arg0: i32, %arg1: i32, %arg2: i32) -> (i32, i32) {
    %c0_i32 = arith.constant 0 : i32
    %c0_i32_0 = arith.constant 0 : i32
    return %arg0, %c0_i32 : i32, i32
  }
  func.func @transform_5(%arg0: i32, %arg1: i32, %arg2: i32) -> (i32, i32) {
    %c0_i32 = arith.constant 0 : i32
    %c0_i32_0 = arith.constant 0 : i32
    return %c0_i32, %arg1 : i32, i32
  }
  func.func @transform_6(%arg0: i32, %arg1: i32, %arg2: i32) -> (i32, i32) {
    %c0_i32 = arith.constant 0 : i32
    return %arg0, %arg1 : i32, i32
  }
}

</mosaic_0001>

<bundles_post_ra>
// kernel: tpu_custom_call.1
= control target key start
LH: loop header
LB: loop body
LE: loop exit
PB: predicated region body
PF: predicated region fallthrough
CT: control target
= control target key end

     0   :  { %s12577_s0 = inlined_call_operand.hbm [shape: bf16[16,1024], index: 0, kind: input, shape index: {}]   ;;  %s12578_s1 = inlined_call_operand.hbm [shape: u8[512,512], index: 1, kind: input, shape index: {}]   ;;  %s12579_s2 = inlined_call_operand.vmem [shape: f32[1,512], index: 2, kind: input, shape index: {}]   ;;  %s12580_s3 = inlined_call_operand.vmem [shape: f32[1,512], index: 3, kind: input, shape index: {}]   ;;  %s12581_s4 = inlined_call_operand.vmem [shape: f32[16,4], index: 4, kind: input, shape index: {}]   ;;  %s12582_s5 = inlined_call_operand.vmem [shape: f32[4,512], index: 5, kind: input, shape index: {}]   ;;  %s12583_s6 = inlined_call_operand.hbm [shape: f32[16,512], index: 6, kind: output, shape index: {}]  }
   0x1   :  { %12651 = sst [smem:[#allocation59_spill]] %s12577_s0 }
   0x2   :  { %12652 = sst [smem:[#allocation60_spill]] %s12580_s3 }
   0x3   :  { %12653 = sst [smem:[#allocation61_spill]] %s12581_s4 }
   0x4   :  { %12654 = sst [smem:[#allocation62_spill]] %s12582_s5 }
   0x5   :  { %12655 = sst [smem:[#allocation63_spill]] %s12583_s6 }
   0x6   :  { %11 = vsyncpa [#allocation3], 0 }
   0x7   :  { %13 = vsyncpa [#allocation3 + $0x1], 0 }
   0x8   :  { %14 = vsyncpa [#allocation6], 0 }
   0x9   :  { %16 = vsyncpa [#allocation6 + $0x1], 0 }
   0xa   :  { %17 = vsyncpa [#allocation4], 0 }
   0xb   :  { %19 = vsyncpa [#allocation4 + $0x1], 0  ;;  %s4617_s21 = smov 0   ;;  %s4619_s22 = smov 0  }
   0xc   :  { %s4621_s23 = smov 0   ;;  %s4623_s24 = smov 0  }
   0xd   :  { %s4625_s25 = smov 0   ;;  %s4627_s26 = smov 0  }
   0xe   :  { %s4629_s27 = smov 0   ;;  %s4631_s28 = smov 0  }
   0xf   :  { %s4633_s29 = smov 0   ;;  %s4635_s30 = smov 0  }
  0x10   :  { %s4637_s7 = smov 0   ;;  %s4639_s8 = smov 0  }
  0x11   :  { %s4641_s9 = smov 0   ;;  %s4643_s10 = smov 0  }
  0x12 LB: > { %12656 = sst [smem:[#allocation11_spill]] %s4521_s23  ;;  %s37_s11 = sadd.s32 1, %s4557_s8  ;;  %s4565_s10 = sphi %s4643_s10, %s25_s10   ;;  %s4561_s9 = sphi %s4641_s9, %s13829_s9   ;;  %s4557_s8 = sphi %s4639_s8, %s13828_s8   ;;  %s4553_s7 = sphi %s4637_s7, %s13827_s7   ;;  %s4549_s30 = sphi %s4635_s30, %s13826_s30   ;;  %s4545_s29 = sphi %s4633_s29, %s13817_s29   ;;  %s4541_s28 = sphi %s4631_s28, %s13825_s28   ;;  %s4537_s27 = sphi %s4629_s27, %s13824_s27   ;;  %s4533_s26 = sphi %s4627_s26, %s13815_s26   ;;  %s4529_s25 = sphi %s4625_s25, %s13823_s25   ;;  %s4525_s24 = sphi %s4623_s24, %s13822_s24   ;;  %s4521_s23 = sphi %s4621_s23, %s13813_s23   ;;  %s4517_s22 = sphi %s4619_s22, %s13821_s22   ;;  %s4513_s21 = sphi %s4617_s21, %s13820_s21  }
  0x13   : > { %12657 = sst [smem:[#allocation12_spill]] %s4533_s26  ;;  %s12584_s12 = sadd.s32 4294967295, %s4565_s10  }
  0x14   : > { %12658 = sst [smem:[#allocation13_spill]] %s4545_s29  ;;  %p4687_p0 = scmp.ge.s32.totalorder %s37_s11, 2 }
  0x15   : > { %12659 = sst [smem:[#allocation14_spill]] %s4549_s30  ;;  %p60_p1 = scmp.ne.s32.totalorder %s4545_s29, %s4541_s28 }
  0x16   : > { %p61_p2 = scmp.eq.s32.totalorder %s4565_s10, 0  ;;  %s13831_s11 = smov (%p4687_p0, %s37_s11), 0 }
  0x17   : > { %12661 = sst [smem:[#allocation15_spill]] %s13831_s11  ;;  %s53_s14 = sadd.s32 1, %s4545_s29 }
  0x18   : > { %p66_p3 = scmp.ne.s32.totalorder %s4541_s28, %s4537_s27  ;;  %s4702_s15 = ssub.s32 %s4557_s8, %s13831_s11 }
  0x19   : > { %p4706_p4 = scmp.eq.s32.totalorder %s12584_s12, 0  ;;  %p51_p5 = scmp.eq.s32.totalorder %s4702_s15, 0 }
  0x1a   : > { %p4713_p6 = por %p61_p2, %p60_p1  ;;  %p12588_p8 = scmp.lt.s32.totalorder %s4565_s10, 4 }
  0x1b   : > { %p4719_p7 = por %p4706_p4, %p66_p3  ;;  %s259_s20 = sand.u32 1, %s4545_s29  }
  0x1c   : > { %s4724_s19 = scalar_select %p51_p5, %s4545_s29, %s53_s14  }
  0x1d   : > { %s4161_s27 = sshll.u32 %s259_s20, 5  ;;  %s4202_s12 = sshll.u32 %s4557_s8, 4 }
  0x1e   : > { %12665 = sst [smem:[#allocation16_spill]] %s4724_s19  ;;  %s263_s30 = scalar_lea.vmem [#allocation2], %s4161_s27 }
  0x1f   : > { %s12666_s0 = sld [smem:[#allocation59_spill]]  ;;  %s274_s5 = sshll.u32 %s263_s30, 4  ;;  %s275_s5 = int_to_ptr.vmem [resolvable:$true] %s274_s5 }
  0x20   : > { %p4216_p9 = pnand %p12588_p8, %p4713_p6  ;;  %s260_s14 = scalar_lea.sflag [#allocation3], %s259_s20 }
  0x21   : > { %s12589_s6 = smov 512   ;;  %s12590_s11 = smov 256  }
  0x22   : > { %p4169_p10 = scmp.ge.s32.totalorder %s4565_s10, 1  ;;  %p332_p11 = scmp.lt.s32.totalorder %s4565_s10, 5 }
  0x23   : > { %s4157_s20 = sadd.s32 4294967294, %s4565_s10   ;;  %s40_s27 = sadd.s32 1, %s4561_s9 }
  0x24   : > { %p4747_p13 = pnand %p4169_p10, %p332_p11  ;;  %s13833_s27 = smov (!%p4687_p0, %s40_s27), %s4561_s9 }
  0x25   : > { %s271_s4 = scalar_lea.hbm %s12666_s0, %s4202_s12  ;;  %s12591_s12 = smov 16  }
  0x26   : > { %s272_s3 = sshll.u32 %s271_s4, 4  ;;  %s12667_s4 = sadd.s32 4294967295, %s4565_s10   ;;  %s273_s3 = int_to_ptr.hbm [resolvable:$true] %s272_s3 }
  0x27   : > { %4218 = dma.hbm_to_vmem [thread:$0]  (!%p4216_p9), %s273_s3, 512, %s275_s5, %s260_s14, %s12589_s6, %s12590_s11, %s12591_s12  }
  0x28   : > { %p4743_p12 = scmp.eq.s32.totalorder %s12667_s4, 3  ;;  %s81_s3 = sadd.s32 1, %s4533_s26 }
  0x29   : > { %p94_p1 = scmp.ne.s32.totalorder %s4529_s25, %s4525_s24  ;;  %p42_p3 = scmp.ge.s32.totalorder %s13833_s27, 2 }
  0x2a   : > { %s213_s14 = sadd.s32 1, %s4521_s23  ;;  %p223_p0 = scmp.ne.s32.totalorder %s4521_s23, %s4517_s22 }
  0x2b   : > { %p4763_p6 = por %p94_p1, %p4706_p4  ;;  %s13835_s27 = smov (%p42_p3, %s13833_s27), 0 }
  0x2c   : > { %12671 = sst [smem:[#allocation17_spill]] %s13835_s27  ;;  %p229_p9 = scmp.ne.s32.totalorder %s4517_s22, %s4513_s21 }
  0x2d   : > { %s77_s24 = ssub.s32 %s4561_s9, %s13835_s27  ;;  %p230_p10 = scmp.eq.s32.totalorder %s4157_s20, 3 }
  0x2e   : > { %s78_s13 = sor.u32 %s77_s24, %s4702_s15  ;;  %p211_p11 = scmp.eq.s32.totalorder %s77_s24, 0 }
  0x2f   : > { %p79_p8 = scmp.eq.s32.totalorder %s78_s13, 0  ;;  %p4779_p5 = por %p4743_p12, %p223_p0 }
  0x30   : > { %s4784_s4 = scalar_select %p211_p11, %s4521_s23, %s213_s14  }
  0x31   : > { %s4787_s6 = scalar_select %p79_p8, %s4533_s26, %s81_s3  }
  0x32   : > { %12673 = sst [smem:[#allocation18_spill]] %s4784_s4  ;;  %p4789_p4 = por %p230_p10, %p229_p9 }
  0x33   : > { %12674 = sst [smem:[#allocation19_spill]] %s4787_s6  ;;  %s284_s12 = sand.u32 1, %s4533_s26  }
  0x34   : > { %p12676_p1 = scmp.ne.s32.totalorder %s4533_s26, %s4529_s25  ;;  %s4164_s15 = sshll.u32 %s284_s12, 7 }
  0x35   : > { %s4166_s20 = sshll.u32 %s4561_s9, 1  ;;  %s4203_s24 = sshll.u32 %s4557_s8, 5 }
  0x36   : > { %p90_p3 = por %p12676_p1, %p61_p2  ;;  %s288_s30 = scalar_lea.vmem [#allocation5], %s4164_s15 }
  0x37   : > { %s299_s13 = sshll.u32 %s288_s30, 4  ;;  %s294_s0 = sadd.s32 %s4203_s24, %s4166_s20  ;;  %s300_s13 = int_to_ptr.vmem [resolvable:$true] %s299_s13 }
  0x38   : > { %s4168_s27 = sshll.u32 %s294_s0, 3  ;;  %p12677_p12 = scmp.lt.s32.totalorder %s4565_s10, 4 }
  0x39   : > { %s296_s19 = scalar_lea.hbm %s12578_s1, %s4168_s27  ;;  %s285_s6 = scalar_lea.sflag [#allocation6], %s284_s12 }
  0x3a   : > { %p4219_p0 = pnand %p12677_p12, %p90_p3  ;;  %s297_s29 = sshll.u32 %s296_s19, 4  ;;  %s298_s29 = int_to_ptr.hbm [resolvable:$true] %s297_s29 }
  0x3b   : > { %s12678_s4 = smov 16   ;;  %s12679_s26 = smov 256  }
  0x3c   : > { %s12680_s23 = smov 512   ;;  %336 = sbr.rel (%p4747_p13) target bundleno = 1253 (0x4e5), region = 44 }
  0x3d   : > { %4221 = dma.hbm_to_vmem [thread:$0]  (!%p4219_p0), %s298_s29, 2048, %s300_s13, %s285_s6, %s12680_s23, %s12679_s26, %s12678_s4  }
  0x41   : > { %s338_s0 = sand.u32 1, %s4541_s28  }
  0x42   : > { %s4170_s15 = sshll.u32 %s338_s0, 5  ;;  %s339_s20 = scalar_lea.sflag [#allocation3], %s338_s0 }
  0x43   : > { %s4812_s24 = scalar_lea.vmem [#allocation2], %s4170_s15 }
  0x44   : > { %4500 = dma.done.wait (%p4719_p7), %s339_s20, 512  }
  0x45   : > { %4502 = vsyncadd (%p4719_p7), %s339_s20, 4294966784  ;;  %s348_s19 = sand.u32 1, %s4529_s25  }
  0x46   : > { %s4171_s12 = sshll.u32 %s348_s19, 7  ;;  %s349_s23 = scalar_lea.sflag [#allocation6], %s348_s19 }
  0x47   : > { %s4819_s26 = scalar_lea.vmem [#allocation5], %s4171_s12 }
  0x48   : > { %4504 = dma.done.wait (%p4763_p6), %s349_s23, 2048  }
  0x49   : > { %4506 = vsyncadd (%p4763_p6), %s349_s23, 4294965248  ;;  %s402_s29 = sand.u32 1, %s4517_s22   ;;  %s4173_s6 = sshll.u32 %s4553_s7, 1 }
  0x4a   : > { %s4172_s18 = sshll.u32 %s402_s29, 5  ;;  %p410_p2 = scmp.lt.s32.totalorder %s4173_s6, 3 }
  0x4b   : > { %s12681_s13 = sld [smem:[#allocation60_spill]]  ;;  %s4845_s12 = scalar_lea.vmem [#allocation7], %s4172_s18 }
  0x4c   : > { %s13837_s6 = smov (!%p410_p2, %s4173_s6), 3  ;;  %s12682_s20 = sld [smem:[#allocation62_spill]] }
  0x4d   : > { %s412_s4 = scalar_lea.vmem %s12579_s2, %s13837_s6  ;;  %s4176_s3 = sshll.u32 %s13837_s6, 2 }
  0x4e   : > { %s12683_s23 = sld [smem:[#allocation14_spill]] }
  0x51   : > { %s417_s14 = scalar_lea.vmem %s12681_s13, %s13837_s6 }
  0x52   : > { %s4843_s19 = scalar_lea.vmem %s12682_s20, %s4176_s3 }
  0x54   : > { %p4177_p7 = scmp.ne.s32.totalorder %s12683_s23, 0 }
  0x56   : > { %437 = sbr.rel (%p4177_p7) target bundleno = 96 (0x60), region = 56 }
  0x5b   : > { %v4570_v0 = vmov 0.0  }
  0x5c   : > { %438 = vst [vmem:[%s4845_s12] sm:$0xff] %v4570_v0 }
  0x5d   : > { %439 = vst [vmem:[%s4845_s12 + $0x8] sm:$0xff] %v4570_v0 }
  0x5e   : > { %440 = vst [vmem:[%s4845_s12 + $0x10] sm:$0xff] %v4570_v0 }
  0x5f   : > { %441 = vst [vmem:[%s4845_s12 + $0x18] sm:$0xff] %v4570_v0 }
  0x60 PF: > { %v4853_v1 = vld [vmem:[%s4819_s26 + $0x30] sm:$0xff]  ;;  %v4861_v5 = vld [vmem:[%s4819_s26 + $0x38] sm:$0xff]  ;;  %v12608_v40 = vmov -1.0   ;;  %v12606_v43 = vmov -0.52507305  }
  0x61   : > { %v490_v2 = vunpack.c.2.s8 %v4853_v1  ;;  %v492_v3 = vunpack.c.3.s8 %v4853_v1  ;;  %v4858_v4 = vld [vmem:[%s4819_s26 + $0x70] sm:$0xff]  ;;  %v491_v10 = vunpack.c.2.s8 %v4861_v5  ;;  %v4871_v11 = vld [vmem:[%s4819_s26 + $0x78] sm:$0xff]  ;;  %v493_v13 = vunpack.c.3.s8 %v4861_v5 }
  0x62   : > { %v522_v6 = vunpack.c.2.s8 %v4858_v4  ;;  %v524_v9 = vunpack.c.3.s8 %v4858_v4  ;;  %v523_v14 = vunpack.c.2.s8 %v4871_v11  ;;  %v525_v15 = vunpack.c.3.s8 %v4871_v11 }
  0x63   : > { %v4864_v7 = vand.u32 255, %v490_v2  ;;  %v4866_v8 = vand.u32 255, %v492_v3  ;;  %v4882_v19 = vand.u32 255, %v491_v10  ;;  %v4887_v21 = vand.u32 255, %v493_v13 }
  0x64   : > { %v4873_v12 = vand.u32 255, %v522_v6  ;;  %v4880_v18 = vand.u32 255, %v524_v9  ;;  %v4889_v22 = vand.u32 255, %v523_v14  ;;  %v4891_v23 = vand.u32 255, %v525_v15 }
  0x65   : > { %v618_v16 = vand.u32 15, %v4864_v7  ;;  %v620_v17 = vand.u32 15, %v4866_v8  ;;  %v12602_v46 = vmov -0.28444138   ;;  %v12604_v50 = vmov -0.091050036  }
  0x66   : > { %v4885_v20 = vand.u32 15, %v4873_v12  ;;  %v12598_v53 = vmov 0.0795803   ;;  %v12596_v56 = vmov 0.2461123   ;;  %v5120_v34 = vand.u32 15, %v4891_v23 }
  0x67   : > { %v682_v24 = vand.u32 1, %v618_v16  ;;  %v684_v25 = vand.u32 1, %v620_v17  ;;  %v810_v26 = vand.u32 2, %v618_v16  ;;  %v812_v27 = vand.u32 2, %v620_v17 }
  0x68   : > { %v938_v28 = vand.u32 4, %v618_v16  ;;  %v940_v29 = vand.u32 4, %v620_v17  ;;  %v1066_v30 = vand.u32 8, %v618_v16  ;;  %v1068_v31 = vand.u32 8, %v620_v17 }
  0x69   : > { %vm4893_vm0 = vcmp.ne.s32.totalorder %v682_v24, 0  ;;  %vm4897_vm1 = vcmp.ne.s32.totalorder %v684_v25, 0  ;;  %vm4901_vm2 = vcmp.ne.s32.totalorder %v810_v26, 0  ;;  %vm4905_vm3 = vcmp.ne.s32.totalorder %v812_v27, 0 }
  0x6a   : > { %vm4909_vm4 = vcmp.ne.s32.totalorder %v938_v28, 0  ;;  %vm4913_vm5 = vcmp.ne.s32.totalorder %v940_v29, 0  ;;  %vm4917_vm6 = vcmp.ne.s32.totalorder %v1066_v30, 0  ;;  %vm4921_vm7 = vcmp.ne.s32.totalorder %v1068_v31, 0 }
  0x6b   : > { %v1194_v41 = vsel %vm4893_vm0, -0.6961928, %v12608_v40  ;;  %v1196_v42 = vsel %vm4897_vm1, -0.6961928, %v12608_v40  ;;  %v1258_v44 = vsel %vm4893_vm0, -0.3949175, %v12606_v43 }
  0x6c   : > { %v1260_v45 = vsel %vm4897_vm1, -0.3949175, %v12606_v43  ;;  %v1322_v47 = vsel %vm4893_vm0, -0.18477343, %v12602_v46  ;;  %v1324_v48 = vsel %vm4897_vm1, -0.18477343, %v12602_v46  ;;  %v1706_v49 = vsel %vm4901_vm2, %v1258_v44, %v1194_v41 }
  0x6d   : > { %v1386_v51 = vsel %vm4893_vm0, 0.0, %v12604_v50  ;;  %v1388_v52 = vsel %vm4897_vm1, 0.0, %v12604_v50  ;;  %v1450_v54 = vsel %vm4893_vm0, 0.1609302, %v12598_v53  ;;  %v1452_v55 = vsel %vm4897_vm1, 0.1609302, %v12598_v53 }
  0x6e   : > { %v1514_v57 = vsel %vm4893_vm0, 0.33791524, %v12596_v56  ;;  %v1516_v58 = vsel %vm4897_vm1, 0.33791524, %v12596_v56  ;;  %v12600_v59 = vmov 0.44070983   ;;  %v1708_v61 = vsel %vm4905_vm3, %v1260_v45, %v1196_v42 }
  0x6f   : > { %v1578_v60 = vsel %vm4893_vm0, 0.562617, %v12600_v59  ;;  %v1580_v62 = vsel %vm4897_vm1, 0.562617, %v12600_v59  ;;  %v12615_v63 = vmov 0.72295684   ;;  %v1770_v3 = vsel %vm4901_vm2, %v1386_v51, %v1322_v47 }
  0x70   : > { %v1642_v0 = vsel %vm4893_vm0, 1.0, %v12615_v63  ;;  %v1644_v2 = vsel %vm4897_vm1, 1.0, %v12615_v63  ;;  %v1772_v6 = vsel %vm4905_vm3, %v1388_v52, %v1324_v48  ;;  %v1834_v9 = vsel %vm4901_vm2, %v1514_v57, %v1450_v54 }
  0x71   : > { %v1836_v10 = vsel %vm4905_vm3, %v1516_v58, %v1452_v55  ;;  %v1898_v13 = vsel %vm4901_vm2, %v1642_v0, %v1578_v60  ;;  %v1900_v14 = vsel %vm4905_vm3, %v1644_v2, %v1580_v62  ;;  %v1962_v15 = vsel %vm4909_vm4, %v1770_v3, %v1706_v49 }
  0x72   : > { %v1964_v16 = vsel %vm4913_vm5, %v1772_v6, %v1708_v61  ;;  %v2026_v17 = vsel %vm4909_vm4, %v1898_v13, %v1834_v9  ;;  %v2028_v24 = vsel %vm4913_vm5, %v1900_v14, %v1836_v10  ;;  %v652_v26 = vand.u32 15, %v4880_v18 }
  0x73   : > { %v2090_v25 = vsel %vm4917_vm6, %v2026_v17, %v1962_v15  ;;  %v714_v27 = vand.u32 1, %v4885_v20  ;;  %v2092_v28 = vsel %vm4921_vm7, %v2028_v24, %v1964_v16  ;;  %v842_v29 = vand.u32 2, %v4885_v20 }
  0x74   : > { %v970_v30 = vand.u32 4, %v4885_v20  ;;  %v1098_v31 = vand.u32 8, %v4885_v20  ;;  %v2140_v32 = vpack.c.bf16 %v2092_v28, %v2090_v25  ;;  %v716_v33 = vand.u32 1, %v652_v26 }
  0x75   : > { %vm5006_vm8 = vcmp.ne.s32.totalorder %v714_v27, 0  ;;  %v844_v35 = vand.u32 2, %v652_v26  ;;  %vm5010_vm9 = vcmp.ne.s32.totalorder %v842_v29, 0  ;;  %v972_v37 = vand.u32 4, %v652_v26 }
  0x76   : > { %vm5014_vm10 = vcmp.ne.s32.totalorder %v970_v30, 0  ;;  %v1100_v39 = vand.u32 8, %v652_v26  ;;  %3740 = vmatpush.bf16.msra.mxu0 %v2140_v32  ;;  %vm5018_vm11 = vcmp.ne.s32.totalorder %v716_v33, 0  ;;  %vm5026_vm13 = vcmp.ne.s32.totalorder %v1098_v31, 0 }
  0x77   : > { %vm5022_vm12 = vcmp.ne.s32.totalorder %v844_v35, 0  ;;  %v1226_v44 = vsel %vm5006_vm8, -0.6961928, %v12608_v40  ;;  %vm5033_vm14 = vcmp.ne.s32.totalorder %v972_v37, 0  ;;  %v1228_v48 = vsel %vm5018_vm11, -0.6961928, %v12608_v40 }
  0x78   : > { %vm5037_vm15 = vcmp.ne.s32.totalorder %v1100_v39, 0  ;;  %v1290_v49 = vsel %vm5006_vm8, -0.3949175, %v12606_v43  ;;  %v1292_v51 = vsel %vm5018_vm11, -0.3949175, %v12606_v43  ;;  %v1418_v57 = vsel %vm5006_vm8, 0.0, %v12604_v50 }
  0x79   : > { %v1354_v52 = vsel %vm5006_vm8, -0.18477343, %v12602_v46  ;;  %v1356_v54 = vsel %vm5018_vm11, -0.18477343, %v12602_v46  ;;  %v1738_v55 = vsel %vm5010_vm9, %v1290_v49, %v1226_v44  ;;  %v1420_v58 = vsel %vm5018_vm11, 0.0, %v12604_v50 }
  0x7a   : > { %v1482_v60 = vsel %vm5006_vm8, 0.1609302, %v12598_v53  ;;  %v1484_v61 = vsel %vm5018_vm11, 0.1609302, %v12598_v53  ;;  %v1546_v62 = vsel %vm5006_vm8, 0.33791524, %v12596_v56  ;;  %v1740_v3 = vsel %vm5022_vm12, %v1292_v51, %v1228_v48 }
  0x7b   : > { %v1548_v0 = vsel %vm5018_vm11, 0.33791524, %v12596_v56  ;;  %v1610_v2 = vsel %vm5006_vm8, 0.562617, %v12600_v59  ;;  %v1612_v6 = vsel %vm5018_vm11, 0.562617, %v12600_v59  ;;  %v1802_v13 = vsel %vm5010_vm9, %v1418_v57, %v1354_v52 }
  0x7c   : > { %v1674_v9 = vsel %vm5006_vm8, 1.0, %v12615_v63  ;;  %v1676_v10 = vsel %vm5018_vm11, 1.0, %v12615_v63  ;;  %v1804_v14 = vsel %vm5022_vm12, %v1420_v58, %v1356_v54  ;;  %v1866_v15 = vsel %vm5010_vm9, %v1546_v62, %v1482_v60 }
  0x7d   : > { %v1868_v16 = vsel %vm5022_vm12, %v1548_v0, %v1484_v61  ;;  %v1930_v17 = vsel %vm5010_vm9, %v1674_v9, %v1610_v2  ;;  %v1932_v24 = vsel %vm5022_vm12, %v1676_v10, %v1612_v6  ;;  %v1994_v25 = vsel %vm5014_vm10, %v1802_v13, %v1738_v55 }
  0x7e   : > { %v1996_v26 = vsel %vm5033_vm14, %v1804_v14, %v1740_v3  ;;  %v2058_v27 = vsel %vm5014_vm10, %v1930_v17, %v1866_v15  ;;  %v2060_v28 = vsel %vm5033_vm14, %v1932_v24, %v1868_v16  ;;  %v619_v30 = vand.u32 15, %v4882_v19 }
  0x7f   : > { %v2122_v29 = vsel %vm5026_vm13, %v2058_v27, %v1994_v25  ;;  %v621_v31 = vand.u32 15, %v4887_v21  ;;  %v2124_v32 = vsel %vm5037_vm15, %v2060_v28, %v1996_v26  ;;  %v5117_v33 = vand.u32 15, %v4889_v22 }
  0x80   : > { %v486_v35 = vunpack.c.0.s8 %v4853_v1  ;;  %v2156_v36 = vpack.c.bf16 %v2124_v32, %v2122_v29  ;;  %v683_v37 = vand.u32 1, %v619_v30  ;;  %v811_v39 = vand.u32 2, %v619_v30 }
  0x81   : > { %v685_v38 = vand.u32 1, %v621_v31  ;;  %v813_v20 = vand.u32 2, %v621_v31  ;;  %v939_v41 = vand.u32 4, %v619_v30  ;;  %v941_v42 = vand.u32 4, %v621_v31 }
  0x82   : > { %v1067_v44 = vand.u32 8, %v619_v30  ;;  %3754 = vmatpush.bf16.msra.mxu1 %v2156_v36  ;;  %vm5123_vm0 = vcmp.ne.s32.totalorder %v683_v37, 0  ;;  %vm5131_vm2 = vcmp.ne.s32.totalorder %v811_v39, 0  ;;  %v1069_v49 = vand.u32 8, %v621_v31 }
  0x83   : > { %vm5127_vm1 = vcmp.ne.s32.totalorder %v685_v38, 0  ;;  %vm5135_vm3 = vcmp.ne.s32.totalorder %v813_v20, 0  ;;  %vm5139_vm4 = vcmp.ne.s32.totalorder %v939_v41, 0  ;;  %vm5143_vm5 = vcmp.ne.s32.totalorder %v941_v42, 0 }
  0x84   : > { %vm5147_vm6 = vcmp.ne.s32.totalorder %v1067_v44, 0  ;;  %vm5151_vm7 = vcmp.ne.s32.totalorder %v1069_v49, 0  ;;  %v1195_v58 = vsel %vm5123_vm0, -0.6961928, %v12608_v40  ;;  %v1197_v60 = vsel %vm5127_vm1, -0.6961928, %v12608_v40 }
  0x85   : > { %v1387_v61 = vsel %vm5123_vm0, 0.0, %v12604_v50  ;;  %v1259_v62 = vsel %vm5123_vm0, -0.3949175, %v12606_v43  ;;  %v1261_v0 = vsel %vm5127_vm1, -0.3949175, %v12606_v43  ;;  %v488_v3 = vunpack.c.1.s8 %v4853_v1 }
  0x86   : > { %v1323_v2 = vsel %vm5123_vm0, -0.18477343, %v12602_v46  ;;  %v1325_v6 = vsel %vm5127_vm1, -0.18477343, %v12602_v46  ;;  %v1389_v9 = vsel %vm5127_vm1, 0.0, %v12604_v50  ;;  %v1643_v13 = vsel %vm5123_vm0, 1.0, %v12615_v63 }
  0x87   : > { %v1451_v10 = vsel %vm5123_vm0, 0.1609302, %v12598_v53  ;;  %v1453_v14 = vsel %vm5127_vm1, 0.1609302, %v12598_v53  ;;  %v1515_v15 = vsel %vm5123_vm0, 0.33791524, %v12596_v56  ;;  %v1707_v17 = vsel %vm5131_vm2, %v1259_v62, %v1195_v58 }
  0x88   : > { %v1517_v16 = vsel %vm5127_vm1, 0.33791524, %v12596_v56  ;;  %v1579_v24 = vsel %vm5123_vm0, 0.562617, %v12600_v59  ;;  %v1581_v25 = vsel %vm5127_vm1, 0.562617, %v12600_v59  ;;  %v1709_v27 = vsel %vm5135_vm3, %v1261_v0, %v1197_v60 }
  0x89   : > { %v1645_v26 = vsel %vm5127_vm1, 1.0, %v12615_v63  ;;  %v1771_v28 = vsel %vm5131_vm2, %v1387_v61, %v1323_v2  ;;  %v1773_v29 = vsel %vm5135_vm3, %v1389_v9, %v1325_v6  ;;  %v1835_v30 = vsel %vm5131_vm2, %v1515_v15, %v1451_v10 }
  0x8a   : > { %v1837_v31 = vsel %vm5135_vm3, %v1517_v16, %v1453_v14  ;;  %v1899_v32 = vsel %vm5131_vm2, %v1643_v13, %v1579_v24  ;;  %v1901_v36 = vsel %vm5135_vm3, %v1645_v26, %v1581_v25  ;;  %v1963_v37 = vsel %vm5139_vm4, %v1771_v28, %v1707_v17 }
  0x8b   : > { %v1965_v38 = vsel %vm5143_vm5, %v1773_v29, %v1709_v27  ;;  %v2027_v39 = vsel %vm5139_vm4, %v1899_v32, %v1835_v30  ;;  %v2029_v20 = vsel %vm5143_vm5, %v1901_v36, %v1837_v31  ;;  %v715_v41 = vand.u32 1, %v5117_v33 }
  0x8c   : > { %v717_v42 = vand.u32 1, %v5120_v34  ;;  %v2091_v44 = vsel %vm5147_vm6, %v2027_v39, %v1963_v37  ;;  %v2093_v45 = vsel %vm5151_vm7, %v2029_v20, %v1965_v38  ;;  %v843_v47 = vand.u32 2, %v5117_v33 }
  0x8d   : > { %v845_v48 = vand.u32 2, %v5120_v34  ;;  %v2141_v49 = vpack.c.bf16 %v2093_v45, %v2091_v44  ;;  %vm5236_vm8 = vcmp.ne.s32.totalorder %v715_v41, 0  ;;  %v971_v54 = vand.u32 4, %v5117_v33 }
  0x8e   : > { %vm5240_vm9 = vcmp.ne.s32.totalorder %v717_v42, 0  ;;  %vm5245_vm10 = vcmp.ne.s32.totalorder %v843_v47, 0  ;;  %v973_v58 = vand.u32 4, %v5120_v34  ;;  %v1099_v60 = vand.u32 8, %v5117_v33 }
  0x8f   : > { %vm5249_vm11 = vcmp.ne.s32.totalorder %v845_v48, 0  ;;  %3768 = vmatpush.bf16.msra.mxu2 %v2141_v49  ;;  %vm5255_vm12 = vcmp.ne.s32.totalorder %v971_v54, 0  ;;  %v1101_v62 = vand.u32 8, %v5120_v34  ;;  %v1227_v0 = vsel %vm5236_vm8, -0.6961928, %v12608_v40 }
  0x90   : > { %v1229_v2 = vsel %vm5240_vm9, -0.6961928, %v12608_v40  ;;  %vm5266_vm13 = vcmp.ne.s32.totalorder %v973_v58, 0  ;;  %vm5270_vm14 = vcmp.ne.s32.totalorder %v1099_v60, 0  ;;  %v1291_v34 = vsel %vm5236_vm8, -0.3949175, %v12606_v43 }
  0x91   : > { %v1293_v9 = vsel %vm5240_vm9, -0.3949175, %v12606_v43  ;;  %vm5280_vm15 = vcmp.ne.s32.totalorder %v1101_v62, 0  ;;  %v1355_v13 = vsel %vm5236_vm8, -0.18477343, %v12602_v46  ;;  %v1419_v15 = vsel %vm5236_vm8, 0.0, %v12604_v50 }
  0x92   : > { %v1357_v14 = vsel %vm5240_vm9, -0.18477343, %v12602_v46  ;;  %v1421_v16 = vsel %vm5240_vm9, 0.0, %v12604_v50  ;;  %v1483_v17 = vsel %vm5236_vm8, 0.1609302, %v12598_v53  ;;  %v1675_v25 = vsel %vm5236_vm8, 1.0, %v12615_v63 }
  0x93   : > { %v1485_v24 = vsel %vm5240_vm9, 0.1609302, %v12598_v53  ;;  %v1547_v26 = vsel %vm5236_vm8, 0.33791524, %v12596_v56  ;;  %v1549_v27 = vsel %vm5240_vm9, 0.33791524, %v12596_v56  ;;  %v1739_v29 = vsel %vm5245_vm10, %v1291_v34, %v1227_v0 }
  0x94   : > { %v1611_v28 = vsel %vm5236_vm8, 0.562617, %v12600_v59  ;;  %v1613_v30 = vsel %vm5240_vm9, 0.562617, %v12600_v59  ;;  %v1677_v31 = vsel %vm5240_vm9, 1.0, %v12615_v63  ;;  %v1741_v32 = vsel %vm5249_vm11, %v1293_v9, %v1229_v2 }
  0x95   : > { %v1803_v36 = vsel %vm5245_vm10, %v1419_v15, %v1355_v13  ;;  %v1805_v37 = vsel %vm5249_vm11, %v1421_v16, %v1357_v14  ;;  %v1867_v38 = vsel %vm5245_vm10, %v1547_v26, %v1483_v17  ;;  %v1869_v39 = vsel %vm5249_vm11, %v1549_v27, %v1485_v24 }
  0x96   : > { %v1931_v20 = vsel %vm5245_vm10, %v1675_v25, %v1611_v28  ;;  %v1933_v41 = vsel %vm5249_vm11, %v1677_v31, %v1613_v30  ;;  %v1995_v42 = vsel %vm5255_vm12, %v1803_v36, %v1739_v29  ;;  %v1997_v44 = vsel %vm5266_vm13, %v1805_v37, %v1741_v32 }
  0x97   : > { %v2059_v45 = vsel %vm5255_vm12, %v1931_v20, %v1867_v38  ;;  %v2061_v47 = vsel %vm5266_vm13, %v1933_v41, %v1869_v39  ;;  %v5348_v49 = vand.u32 255, %v486_v35  ;;  %v5352_v51 = vand.u32 255, %v488_v3 }
  0x98   : > { %v2123_v48 = vsel %vm5270_vm14, %v2059_v45, %v1995_v42  ;;  %v2125_v52 = vsel %vm5280_vm15, %v2061_v47, %v1997_v44  ;;  %v518_v54 = vunpack.c.0.s8 %v4858_v4  ;;  %v520_v55 = vunpack.c.1.s8 %v4858_v4 }
  0x99   : > { %v487_v57 = vunpack.c.0.s8 %v4861_v5  ;;  %v2157_v58 = vpack.c.bf16 %v2125_v52, %v2123_v48  ;;  %v614_v60 = vand.u32 15, %v5348_v49  ;;  %v616_v61 = vand.u32 15, %v5352_v51 }
  0x9a   : > { %v489_v35 = vunpack.c.1.s8 %v4861_v5  ;;  %v5362_v62 = vand.u32 255, %v518_v54  ;;  %v5364_v1 = vand.u32 255, %v520_v55  ;;  %v519_v0 = vunpack.c.0.s8 %v4871_v11 }
  0x9b   : > { %v5366_v3 = vand.u32 255, %v487_v57  ;;  %3782 = vmatpush.bf16.msra.mxu3 %v2157_v58  ;;  %v678_v2 = vand.u32 1, %v614_v60  ;;  %v680_v4 = vand.u32 1, %v616_v61  ;;  %v806_v6 = vand.u32 2, %v614_v60 }
  0x9c   : > { %v808_v33 = vand.u32 2, %v616_v61  ;;  %v934_v34 = vand.u32 4, %v614_v60  ;;  %v936_v9 = vand.u32 4, %v616_v61  ;;  %v1062_v10 = vand.u32 8, %v614_v60 }
  0x9d   : > { %v1064_v13 = vand.u32 8, %v616_v61  ;;  %vm5369_vm0 = vcmp.ne.s32.totalorder %v678_v2, 0  ;;  %vm5373_vm1 = vcmp.ne.s32.totalorder %v680_v4, 0  ;;  %vm5377_vm2 = vcmp.ne.s32.totalorder %v806_v6, 0 }
  0x9e   : > { %vm5381_vm3 = vcmp.ne.s32.totalorder %v808_v33, 0  ;;  %vm5385_vm4 = vcmp.ne.s32.totalorder %v934_v34, 0  ;;  %vm5389_vm5 = vcmp.ne.s32.totalorder %v936_v9, 0  ;;  %vm5393_vm6 = vcmp.ne.s32.totalorder %v1062_v10, 0 }
  0x9f   : > { %vm5397_vm7 = vcmp.ne.s32.totalorder %v1064_v13, 0  ;;  %v1190_v27 = vsel %vm5369_vm0, -0.6961928, %v12608_v40  ;;  %v1192_v28 = vsel %vm5373_vm1, -0.6961928, %v12608_v40  ;;  %v521_v30 = vunpack.c.1.s8 %v4871_v11 }
  0xa0   : > { %v1254_v29 = vsel %vm5369_vm0, -0.3949175, %v12606_v43  ;;  %v1256_v31 = vsel %vm5373_vm1, -0.3949175, %v12606_v43  ;;  %v1318_v32 = vsel %vm5369_vm0, -0.18477343, %v12602_v46 }
  0xa1   : > { %v1320_v36 = vsel %vm5373_vm1, -0.18477343, %v12602_v46  ;;  %v1702_v37 = vsel %vm5377_vm2, %v1254_v29, %v1190_v27  ;;  %v1382_v38 = vsel %vm5369_vm0, 0.0, %v12604_v50  ;;  %v1384_v39 = vsel %vm5373_vm1, 0.0, %v12604_v50 }
  0xa2   : > { %v1446_v20 = vsel %vm5369_vm0, 0.1609302, %v12598_v53  ;;  %v1448_v41 = vsel %vm5373_vm1, 0.1609302, %v12598_v53  ;;  %v1510_v42 = vsel %vm5369_vm0, 0.33791524, %v12596_v56  ;;  %v1704_v47 = vsel %vm5381_vm3, %v1256_v31, %v1192_v28 }
  0xa3   : > { %v1512_v44 = vsel %vm5373_vm1, 0.33791524, %v12596_v56  ;;  %v1574_v45 = vsel %vm5369_vm0, 0.562617, %v12600_v59  ;;  %v1576_v48 = vsel %vm5373_vm1, 0.562617, %v12600_v59  ;;  %v1766_v55 = vsel %vm5377_vm2, %v1382_v38, %v1318_v32 }
  0xa4   : > { %v1638_v52 = vsel %vm5369_vm0, 1.0, %v12615_v63  ;;  %v1640_v54 = vsel %vm5373_vm1, 1.0, %v12615_v63  ;;  %v1768_v57 = vsel %vm5381_vm3, %v1384_v39, %v1320_v36  ;;  %v1830_v58 = vsel %vm5377_vm2, %v1510_v42, %v1446_v20 }
  0xa5   : > { %v1832_v60 = vsel %vm5381_vm3, %v1512_v44, %v1448_v41  ;;  %v1894_v61 = vsel %vm5377_vm2, %v1638_v52, %v1574_v45  ;;  %v1896_v2 = vsel %vm5381_vm3, %v1640_v54, %v1576_v48  ;;  %v1958_v4 = vsel %vm5385_vm4, %v1766_v55, %v1702_v37  ;;  %v5500_v37 = vld [vmem:[%s4819_s26 + $0x20] sm:$0xff] }
  0xa6   : > { %v1960_v6 = vsel %vm5389_vm5, %v1768_v57, %v1704_v47  ;;  %v2022_v33 = vsel %vm5385_vm4, %v1894_v61, %v1830_v58  ;;  %v2024_v34 = vsel %vm5389_vm5, %v1896_v2, %v1832_v60  ;;  %v646_v10 = vand.u32 15, %v5362_v62 }
  0xa7   : > { %v2086_v9 = vsel %vm5393_vm6, %v2022_v33, %v1958_v4  ;;  %v648_v13 = vand.u32 15, %v5364_v1  ;;  %v2088_v14 = vsel %vm5397_vm7, %v2024_v34, %v1960_v6  ;;  %v5480_v5 = vand.u32 255, %v489_v35 }
  0xa8   : > { %v5483_v15 = vand.u32 15, %v5366_v3  ;;  %v5485_v16 = vand.u32 255, %v519_v0  ;;  %v2138_v17 = vpack.c.bf16 %v2088_v14, %v2086_v9  ;;  %v710_v24 = vand.u32 1, %v646_v10 }
  0xa9   : > { %v712_v27 = vand.u32 1, %v648_v13  ;;  %v838_v25 = vand.u32 2, %v646_v10  ;;  %v840_v28 = vand.u32 2, %v648_v13  ;;  %v966_v29 = vand.u32 4, %v646_v10 }
  0xaa   : > { %v968_v31 = vand.u32 4, %v648_v13  ;;  %v1094_v32 = vand.u32 8, %v646_v10  ;;  %3741 = vmatpush.bf16.msra.mxu0 %v2138_v17  ;;  %vm5487_vm8 = vcmp.ne.s32.totalorder %v710_v24, 0  ;;  %v1096_v36 = vand.u32 8, %v648_v13 }
  0xab   : > { %vm5491_vm9 = vcmp.ne.s32.totalorder %v712_v27, 0  ;;  %vm5495_vm10 = vcmp.ne.s32.totalorder %v838_v25, 0  ;;  %vm5502_vm11 = vcmp.ne.s32.totalorder %v840_v28, 0  ;;  %vm5506_vm12 = vcmp.ne.s32.totalorder %v966_v29, 0 }
  0xac   : > { %vm5510_vm13 = vcmp.ne.s32.totalorder %v968_v31, 0  ;;  %vm5514_vm14 = vcmp.ne.s32.totalorder %v1094_v32, 0  ;;  %vm5518_vm15 = vcmp.ne.s32.totalorder %v1096_v36, 0  ;;  %v1222_v44 = vsel %vm5487_vm8, -0.6961928, %v12608_v40 }
  0xad   : > { %v1224_v45 = vsel %vm5491_vm9, -0.6961928, %v12608_v40  ;;  %v1414_v47 = vsel %vm5487_vm8, 0.0, %v12604_v50  ;;  %v1286_v48 = vsel %vm5487_vm8, -0.3949175, %v12606_v43  ;;  %v482_v55 = vunpack.c.2.s8 %v5500_v37 }
  0xae   : > { %v1288_v52 = vsel %vm5491_vm9, -0.3949175, %v12606_v43  ;;  %v1350_v54 = vsel %vm5487_vm8, -0.18477343, %v12602_v46  ;;  %v1352_v57 = vsel %vm5491_vm9, -0.18477343, %v12602_v46  ;;  %v1734_v33 = vsel %vm5495_vm10, %v1286_v48, %v1222_v44 }
  0xaf   : > { %v1416_v58 = vsel %vm5491_vm9, 0.0, %v12604_v50  ;;  %v1478_v60 = vsel %vm5487_vm8, 0.1609302, %v12598_v53  ;;  %v1670_v61 = vsel %vm5487_vm8, 1.0, %v12615_v63  ;;  %v1480_v2 = vsel %vm5491_vm9, 0.1609302, %v12598_v53 }
  0xb0   : > { %v1542_v4 = vsel %vm5487_vm8, 0.33791524, %v12596_v56  ;;  %v1544_v6 = vsel %vm5491_vm9, 0.33791524, %v12596_v56  ;;  %v1606_v34 = vsel %vm5487_vm8, 0.562617, %v12600_v59  ;;  %v1736_v13 = vsel %vm5502_vm11, %v1288_v52, %v1224_v45 }
  0xb1   : > { %v1608_v9 = vsel %vm5491_vm9, 0.562617, %v12600_v59  ;;  %v1672_v10 = vsel %vm5491_vm9, 1.0, %v12615_v63  ;;  %v1798_v14 = vsel %vm5495_vm10, %v1414_v47, %v1350_v54  ;;  %v1800_v17 = vsel %vm5502_vm11, %v1416_v58, %v1352_v57 }
  0xb2   : > { %v1862_v24 = vsel %vm5495_vm10, %v1542_v4, %v1478_v60  ;;  %v1864_v27 = vsel %vm5502_vm11, %v1544_v6, %v1480_v2  ;;  %v1926_v25 = vsel %vm5495_vm10, %v1670_v61, %v1606_v34  ;;  %v1928_v28 = vsel %vm5502_vm11, %v1672_v10, %v1608_v9 }
  0xb3   : > { %v1990_v29 = vsel %vm5506_vm12, %v1798_v14, %v1734_v33  ;;  %v1992_v31 = vsel %vm5510_vm13, %v1800_v17, %v1736_v13  ;;  %v2054_v32 = vsel %vm5506_vm12, %v1926_v25, %v1862_v24  ;;  %v2056_v26 = vsel %vm5510_vm13, %v1928_v28, %v1864_v27 }
  0xb4   : > { %v617_v35 = vand.u32 15, %v5480_v5  ;;  %v679_v0 = vand.u32 1, %v5483_v15  ;;  %v2118_v36 = vsel %vm5514_vm14, %v2054_v32, %v1990_v29  ;;  %v2120_v38 = vsel %vm5518_vm15, %v2056_v26, %v1992_v31 }
  0xb5   : > { %v807_v44 = vand.u32 2, %v5483_v15  ;;  %v935_v45 = vand.u32 4, %v5483_v15  ;;  %v2154_v47 = vpack.c.bf16 %v2120_v38, %v2118_v36  ;;  %v1063_v42 = vand.u32 8, %v5483_v15 }
  0xb6   : > { %v681_v39 = vand.u32 1, %v617_v35  ;;  %vm5603_vm0 = vcmp.ne.s32.totalorder %v679_v0, 0  ;;  %v809_v20 = vand.u32 2, %v617_v35  ;;  %v937_v41 = vand.u32 4, %v617_v35 }
  0xb7   : > { %vm5607_vm1 = vcmp.ne.s32.totalorder %v807_v44, 0  ;;  %vm5611_vm2 = vcmp.ne.s32.totalorder %v935_v45, 0  ;;  %3755 = vmatpush.bf16.msra.mxu1 %v2154_v47  ;;  %v1065_v60 = vand.u32 8, %v617_v35  ;;  %v1191_v61 = vsel %vm5603_vm0, -0.6961928, %v12608_v40 }
  0xb8   : > { %vm5616_vm3 = vcmp.ne.s32.totalorder %v681_v39, 0  ;;  %vm5620_vm4 = vcmp.ne.s32.totalorder %v809_v20, 0  ;;  %vm5627_vm5 = vcmp.ne.s32.totalorder %v937_v41, 0  ;;  %vm5631_vm6 = vcmp.ne.s32.totalorder %v1063_v42, 0 }
  0xb9   : > { %v1193_v4 = vsel %vm5616_vm3, -0.6961928, %v12608_v40  ;;  %v1255_v6 = vsel %vm5603_vm0, -0.3949175, %v12606_v43  ;;  %vm5641_vm7 = vcmp.ne.s32.totalorder %v1065_v60, 0  ;;  %v1383_v10 = vsel %vm5603_vm0, 0.0, %v12604_v50 }
  0xba   : > { %v1257_v34 = vsel %vm5616_vm3, -0.3949175, %v12606_v43  ;;  %v1319_v9 = vsel %vm5603_vm0, -0.18477343, %v12602_v46  ;;  %v1321_v13 = vsel %vm5616_vm3, -0.18477343, %v12602_v46  ;;  %v1703_v29 = vsel %vm5607_vm1, %v1255_v6, %v1191_v61 }
  0xbb   : > { %v1385_v14 = vsel %vm5616_vm3, 0.0, %v12604_v50  ;;  %v1447_v17 = vsel %vm5603_vm0, 0.1609302, %v12598_v53  ;;  %v1639_v24 = vsel %vm5603_vm0, 1.0, %v12615_v63  ;;  %v1449_v27 = vsel %vm5616_vm3, 0.1609302, %v12598_v53 }
  0xbc   : > { %v1511_v25 = vsel %vm5603_vm0, 0.33791524, %v12596_v56  ;;  %v1513_v28 = vsel %vm5616_vm3, 0.33791524, %v12596_v56  ;;  %v1575_v31 = vsel %vm5603_vm0, 0.562617, %v12600_v59  ;;  %v1705_v35 = vsel %vm5620_vm4, %v1257_v34, %v1193_v4 }
  0xbd   : > { %v1577_v32 = vsel %vm5616_vm3, 0.562617, %v12600_v59  ;;  %v1641_v26 = vsel %vm5616_vm3, 1.0, %v12615_v63  ;;  %v1767_v0 = vsel %vm5607_vm1, %v1383_v10, %v1319_v9  ;;  %v1769_v36 = vsel %vm5620_vm4, %v1385_v14, %v1321_v13  ;;  %v5938_v14 = vld [vmem:[%s4819_s26 + $0x68] sm:$0xff] }
  0xbe   : > { %v1831_v38 = vsel %vm5607_vm1, %v1511_v25, %v1447_v17  ;;  %v1833_v44 = vsel %vm5620_vm4, %v1513_v28, %v1449_v27  ;;  %v1895_v45 = vsel %vm5607_vm1, %v1639_v24, %v1575_v31  ;;  %v1897_v47 = vsel %vm5620_vm4, %v1641_v26, %v1577_v32 }
  0xbf   : > { %v1959_v39 = vsel %vm5611_vm2, %v1767_v0, %v1703_v29  ;;  %v1961_v48 = vsel %vm5627_vm5, %v1769_v36, %v1705_v35  ;;  %v2023_v20 = vsel %vm5611_vm2, %v1895_v45, %v1831_v38  ;;  %v2025_v41 = vsel %vm5627_vm5, %v1897_v47, %v1833_v44 }
  0xc0   : > { %v5710_v42 = vand.u32 255, %v521_v30  ;;  %v647_v52 = vand.u32 15, %v5485_v16  ;;  %v2087_v57 = vsel %vm5631_vm6, %v2023_v20, %v1959_v39  ;;  %v2089_v58 = vsel %vm5641_vm7, %v2025_v41, %v1961_v48 }
  0xc1   : > { %v484_v60 = vunpack.c.3.s8 %v5500_v37  ;;  %v5720_v54 = vand.u32 255, %v482_v55  ;;  %v2139_v61 = vpack.c.bf16 %v2089_v58, %v2087_v57  ;;  %v515_v32 = vunpack.c.2.s8 %v5938_v14 }
  0xc2   : > { %v649_v2 = vand.u32 15, %v5710_v42  ;;  %v711_v11 = vand.u32 1, %v647_v52  ;;  %v839_v30 = vand.u32 2, %v647_v52  ;;  %v967_v4 = vand.u32 4, %v647_v52 }
  0xc3   : > { %v1095_v6 = vand.u32 8, %v647_v52  ;;  %v5723_v34 = vand.u32 255, %v484_v60  ;;  %v610_v15 = vand.u32 15, %v5720_v54  ;;  %3769 = vmatpush.bf16.msra.mxu2 %v2139_v61 }
  0xc4   : > { %v713_v33 = vand.u32 1, %v649_v2  ;;  %vm5726_vm8 = vcmp.ne.s32.totalorder %v711_v11, 0  ;;  %v841_v10 = vand.u32 2, %v649_v2  ;;  %vm5730_vm9 = vcmp.ne.s32.totalorder %v839_v30, 0 }
  0xc5   : > { %v969_v13 = vand.u32 4, %v649_v2  ;;  %vm5734_vm10 = vcmp.ne.s32.totalorder %v967_v4, 0  ;;  %v1097_v17 = vand.u32 8, %v649_v2  ;;  %vm5738_vm11 = vcmp.ne.s32.totalorder %v1095_v6, 0 }
  0xc6   : > { %vm5742_vm12 = vcmp.ne.s32.totalorder %v713_v33, 0  ;;  %vm5746_vm13 = vcmp.ne.s32.totalorder %v841_v10, 0  ;;  %v1223_v28 = vsel %vm5726_vm8, -0.6961928, %v12608_v40  ;;  %v1287_v29 = vsel %vm5726_vm8, -0.3949175, %v12606_v43 }
  0xc7   : > { %vm5756_vm14 = vcmp.ne.s32.totalorder %v969_v13, 0  ;;  %vm5760_vm15 = vcmp.ne.s32.totalorder %v1097_v17, 0  ;;  %v1225_v26 = vsel %vm5742_vm12, -0.6961928, %v12608_v40  ;;  %v1289_v35 = vsel %vm5742_vm12, -0.3949175, %v12606_v43 }
  0xc8   : > { %v1351_v0 = vsel %vm5726_vm8, -0.18477343, %v12602_v46  ;;  %v1353_v36 = vsel %vm5742_vm12, -0.18477343, %v12602_v46  ;;  %v1415_v38 = vsel %vm5726_vm8, 0.0, %v12604_v50  ;;  %v1417_v44 = vsel %vm5742_vm12, 0.0, %v12604_v50 }
  0xc9   : > { %v1479_v45 = vsel %vm5726_vm8, 0.1609302, %v12598_v53  ;;  %v1481_v47 = vsel %vm5742_vm12, 0.1609302, %v12598_v53  ;;  %v1543_v39 = vsel %vm5726_vm8, 0.33791524, %v12596_v56  ;;  %v1735_v48 = vsel %vm5730_vm9, %v1287_v29, %v1223_v28 }
  0xca   : > { %v1545_v20 = vsel %vm5742_vm12, 0.33791524, %v12596_v56  ;;  %v1607_v41 = vsel %vm5726_vm8, 0.562617, %v12600_v59  ;;  %v1609_v52 = vsel %vm5742_vm12, 0.562617, %v12600_v59  ;;  %v1737_v57 = vsel %vm5746_vm13, %v1289_v35, %v1225_v26 }
  0xcb   : > { %v1671_v58 = vsel %vm5726_vm8, 1.0, %v12615_v63  ;;  %v1673_v60 = vsel %vm5742_vm12, 1.0, %v12615_v63  ;;  %v1799_v61 = vsel %vm5730_vm9, %v1415_v38, %v1351_v0  ;;  %v1801_v2 = vsel %vm5746_vm13, %v1417_v44, %v1353_v36 }
  0xcc   : > { %v1863_v11 = vsel %vm5730_vm9, %v1543_v39, %v1479_v45  ;;  %v1865_v30 = vsel %vm5746_vm13, %v1545_v20, %v1481_v47  ;;  %v1927_v4 = vsel %vm5730_vm9, %v1671_v58, %v1607_v41  ;;  %v1929_v6 = vsel %vm5746_vm13, %v1673_v60, %v1609_v52 }
  0xcd   : > { %v1991_v33 = vsel %vm5734_vm10, %v1799_v61, %v1735_v48  ;;  %v1993_v9 = vsel %vm5756_vm14, %v1801_v2, %v1737_v57  ;;  %v2055_v10 = vsel %vm5734_vm10, %v1927_v4, %v1863_v11  ;;  %v2057_v13 = vsel %vm5756_vm14, %v1929_v6, %v1865_v30 }
  0xce   : > { %v2119_v17 = vsel %vm5738_vm11, %v2055_v10, %v1991_v33  ;;  %v2121_v55 = vsel %vm5760_vm15, %v2057_v13, %v1993_v9  ;;  %v612_v27 = vand.u32 15, %v5723_v34  ;;  %v674_v25 = vand.u32 1, %v610_v15 }
  0xcf   : > { %v2155_v28 = vpack.c.bf16 %v2121_v55, %v2119_v17  ;;  %v802_v29 = vand.u32 2, %v610_v15  ;;  %v930_v26 = vand.u32 4, %v610_v15  ;;  %v1058_v35 = vand.u32 8, %v610_v15 }
  0xd0   : > { %v676_v0 = vand.u32 1, %v612_v27  ;;  %vm5835_vm0 = vcmp.ne.s32.totalorder %v674_v25, 0  ;;  %v804_v31 = vand.u32 2, %v612_v27  ;;  %v932_v36 = vand.u32 4, %v612_v27  ;;  %v5924_v25 = vld [vmem:[%s4819_s26 + $0x60] sm:$0xff] }
  0xd1   : > { %3783 = vmatpush.bf16.msra.mxu3 %v2155_v28  ;;  %vm5839_vm1 = vcmp.ne.s32.totalorder %v802_v29, 0  ;;  %vm5843_vm2 = vcmp.ne.s32.totalorder %v930_v26, 0  ;;  %v1060_v38 = vand.u32 8, %v612_v27  ;;  %vm5847_vm3 = vcmp.ne.s32.totalorder %v1058_v35, 0 }
  0xd2   : > { %vm5851_vm4 = vcmp.ne.s32.totalorder %v676_v0, 0  ;;  %vm5855_vm5 = vcmp.ne.s32.totalorder %v804_v31, 0  ;;  %vm5859_vm6 = vcmp.ne.s32.totalorder %v932_v36, 0  ;;  %v1186_v39 = vsel %vm5835_vm0, -0.6961928, %v12608_v40  ;;  %v5935_v0 = vld [vmem:[%s4819_s26 + $0x28] sm:$0xff] }
  0xd3   : > { %vm5866_vm7 = vcmp.ne.s32.totalorder %v1060_v38, 0  ;;  %v1188_v20 = vsel %vm5851_vm4, -0.6961928, %v12608_v40  ;;  %v1250_v41 = vsel %vm5835_vm0, -0.3949175, %v12606_v43  ;;  %v1378_v52 = vsel %vm5835_vm0, 0.0, %v12604_v50 }
  0xd4   : > { %v1252_v57 = vsel %vm5851_vm4, -0.3949175, %v12606_v43  ;;  %v1314_v58 = vsel %vm5835_vm0, -0.18477343, %v12602_v46  ;;  %v1316_v60 = vsel %vm5851_vm4, -0.18477343, %v12602_v46  ;;  %v1698_v61 = vsel %vm5839_vm1, %v1250_v41, %v1186_v39 }
  0xd5   : > { %v1380_v2 = vsel %vm5851_vm4, 0.0, %v12604_v50  ;;  %v1442_v11 = vsel %vm5835_vm0, 0.1609302, %v12598_v53  ;;  %v1444_v30 = vsel %vm5851_vm4, 0.1609302, %v12598_v53  ;;  %v1634_v4 = vsel %vm5835_vm0, 1.0, %v12615_v63 }
  0xd6   : > { %v1506_v6 = vsel %vm5835_vm0, 0.33791524, %v12596_v56  ;;  %v1508_v33 = vsel %vm5851_vm4, 0.33791524, %v12596_v56  ;;  %v1570_v9 = vsel %vm5835_vm0, 0.562617, %v12600_v59  ;;  %v1700_v10 = vsel %vm5855_vm5, %v1252_v57, %v1188_v20 }
  0xd7   : > { %v1572_v13 = vsel %vm5851_vm4, 0.562617, %v12600_v59  ;;  %v1636_v17 = vsel %vm5851_vm4, 1.0, %v12615_v63  ;;  %v1762_v55 = vsel %vm5839_vm1, %v1378_v52, %v1314_v58  ;;  %v1764_v27 = vsel %vm5855_vm5, %v1380_v2, %v1316_v60 }
  0xd8   : > { %v1826_v28 = vsel %vm5839_vm1, %v1506_v6, %v1442_v11  ;;  %v1828_v29 = vsel %vm5855_vm5, %v1508_v33, %v1444_v30  ;;  %v1890_v26 = vsel %vm5839_vm1, %v1634_v4, %v1570_v9  ;;  %v1892_v35 = vsel %vm5855_vm5, %v1636_v17, %v1572_v13 }
  0xd9   : > { %v1954_v31 = vsel %vm5843_vm2, %v1762_v55, %v1698_v61  ;;  %v1956_v36 = vsel %vm5859_vm6, %v1764_v27, %v1700_v10  ;;  %v2018_v38 = vsel %vm5843_vm2, %v1890_v26, %v1826_v28  ;;  %v2020_v24 = vsel %vm5859_vm6, %v1892_v35, %v1828_v29 }
  0xda   : > { %v2082_v15 = vsel %vm5847_vm3, %v2018_v38, %v1954_v31  ;;  %v2084_v45 = vsel %vm5866_vm7, %v2020_v24, %v1956_v36  ;;  %v514_v39 = vunpack.c.2.s8 %v5924_v25  ;;  %v516_v20 = vunpack.c.3.s8 %v5924_v25 }
  0xdb   : > { %v2136_v41 = vpack.c.bf16 %v2084_v45, %v2082_v15  ;;  %v483_v52 = vunpack.c.2.s8 %v5935_v0  ;;  %v485_v57 = vunpack.c.3.s8 %v5935_v0  ;;  %v517_v44 = vunpack.c.3.s8 %v5938_v14 }
  0xdc   : > { %v5957_v58 = vand.u32 255, %v514_v39  ;;  %v5959_v47 = vand.u32 255, %v516_v20  ;;  %v478_v48 = vunpack.c.0.s8 %v5500_v37  ;;  %v5967_v2 = vand.u32 255, %v515_v32 }
  0xdd   : > { %3742 = vmatpush.bf16.msra.mxu0 %v2136_v41  ;;  %v5963_v60 = vand.u32 255, %v483_v52  ;;  %v5965_v61 = vand.u32 255, %v485_v57  ;;  %v480_v11 = vunpack.c.1.s8 %v5500_v37  ;;  %v5972_v6 = vand.u32 255, %v517_v44 }
  0xde   : > { %12830 = vst [vmem:[#allocation22_spill] sm:$0xff] %v5967_v2  ;;  %v642_v30 = vand.u32 15, %v5957_v58  ;;  %v644_v4 = vand.u32 15, %v5959_v47  ;;  %v5974_v33 = vand.u32 255, %v478_v48  ;;  %v5983_v13 = vand.u32 15, %v5967_v2 }
  0xdf   : > { %12828 = vst [vmem:[#allocation20_spill] sm:$0xff] %v5963_v60  ;;  %v5977_v9 = vand.u32 15, %v5963_v60  ;;  %v5980_v10 = vand.u32 15, %v5965_v61  ;;  %v5985_v17 = vand.u32 255, %v480_v11 }
  0xe0   : > { %12829 = vst [vmem:[#allocation21_spill] sm:$0xff] %v5965_v61  ;;  %v706_v37 = vand.u32 1, %v642_v30  ;;  %v708_v55 = vand.u32 1, %v644_v4  ;;  %v834_v27 = vand.u32 2, %v642_v30  ;;  %v836_v28 = vand.u32 2, %v644_v4 }
  0xe1   : > { %12831 = vst [vmem:[#allocation23_spill] sm:$0xff] %v5972_v6  ;;  %v962_v29 = vand.u32 4, %v642_v30  ;;  %v964_v26 = vand.u32 4, %v644_v4  ;;  %v1090_v35 = vand.u32 8, %v642_v30  ;;  %v1092_v31 = vand.u32 8, %v644_v4 }
  0xe2   : > { %12832 = vst [vmem:[#allocation24_spill] sm:$0xff] %v5974_v33  ;;  %vm5987_vm8 = vcmp.ne.s32.totalorder %v706_v37, 0  ;;  %vm5991_vm9 = vcmp.ne.s32.totalorder %v708_v55, 0  ;;  %vm5995_vm10 = vcmp.ne.s32.totalorder %v834_v27, 0  ;;  %vm5999_vm11 = vcmp.ne.s32.totalorder %v836_v28, 0 }
  0xe3   : > { %12833 = vst [vmem:[#allocation25_spill] sm:$0xff] %v5985_v17  ;;  %vm6003_vm12 = vcmp.ne.s32.totalorder %v962_v29, 0  ;;  %vm6007_vm13 = vcmp.ne.s32.totalorder %v964_v26, 0  ;;  %vm6011_vm14 = vcmp.ne.s32.totalorder %v1090_v35, 0  ;;  %vm6015_vm15 = vcmp.ne.s32.totalorder %v1092_v31, 0 }
  0xe4   : > { %v1218_v52 = vsel %vm5987_vm8, -0.6961928, %v12608_v40  ;;  %v1220_v57 = vsel %vm5991_vm9, -0.6961928, %v12608_v40  ;;  %v1282_v32 = vsel %vm5987_vm8, -0.3949175, %v12606_v43 }
  0xe5   : > { %v1284_v44 = vsel %vm5991_vm9, -0.3949175, %v12606_v43  ;;  %v1346_v48 = vsel %vm5987_vm8, -0.18477343, %v12602_v46  ;;  %v1348_v11 = vsel %vm5991_vm9, -0.18477343, %v12602_v46  ;;  %v1730_v30 = vsel %vm5995_vm10, %v1282_v32, %v1218_v52 }
  0xe6   : > { %v1410_v4 = vsel %vm5987_vm8, 0.0, %v12604_v50  ;;  %v1412_v37 = vsel %vm5991_vm9, 0.0, %v12604_v50  ;;  %v1474_v55 = vsel %vm5987_vm8, 0.1609302, %v12598_v53  ;;  %v1476_v27 = vsel %vm5991_vm9, 0.1609302, %v12598_v53 }
  0xe7   : > { %v1538_v28 = vsel %vm5987_vm8, 0.33791524, %v12596_v56  ;;  %v1540_v29 = vsel %vm5991_vm9, 0.33791524, %v12596_v56  ;;  %v1602_v26 = vsel %vm5987_vm8, 0.562617, %v12600_v59  ;;  %v1732_v35 = vsel %vm5999_vm11, %v1284_v44, %v1220_v57 }
  0xe8   : > { %v1604_v31 = vsel %vm5991_vm9, 0.562617, %v12600_v59  ;;  %v1666_v52 = vsel %vm5987_vm8, 1.0, %v12615_v63  ;;  %v1668_v32 = vsel %vm5991_vm9, 1.0, %v12615_v63  ;;  %v1794_v56 = vsel %vm5995_vm10, %v1410_v4, %v1346_v48 }
  0xe9   : > { %v1796_v53 = vsel %vm5999_vm11, %v1412_v37, %v1348_v11  ;;  %v1858_v57 = vsel %vm5995_vm10, %v1538_v28, %v1474_v55  ;;  %v1860_v44 = vsel %vm5999_vm11, %v1540_v29, %v1476_v27  ;;  %v1922_v36 = vsel %vm5995_vm10, %v1666_v52, %v1602_v26 }
  0xea   : > { %v1924_v59 = vsel %vm5999_vm11, %v1668_v32, %v1604_v31  ;;  %v1986_v38 = vsel %vm6003_vm12, %v1794_v56, %v1730_v30  ;;  %v1988_v48 = vsel %vm6007_vm13, %v1796_v53, %v1732_v35  ;;  %v2050_v11 = vsel %vm6003_vm12, %v1922_v36, %v1858_v57 }
  0xeb   : > { %v2052_v4 = vsel %vm6007_vm13, %v1924_v59, %v1860_v44  ;;  %v2114_v37 = vsel %vm6011_vm14, %v2050_v11, %v1986_v38  ;;  %v675_v24 = vand.u32 1, %v5977_v9  ;;  %v677_v15 = vand.u32 1, %v5980_v10 }
  0xec   : > { %v2116_v55 = vsel %vm6015_vm15, %v2052_v4, %v1988_v48  ;;  %v803_v56 = vand.u32 2, %v5977_v9  ;;  %v805_v53 = vand.u32 2, %v5980_v10  ;;  %v931_v45 = vand.u32 4, %v5977_v9 }
  0xed   : > { %v2152_v30 = vpack.c.bf16 %v2116_v55, %v2114_v37  ;;  %vm6100_vm0 = vcmp.ne.s32.totalorder %v675_v24, 0  ;;  %vm6104_vm1 = vcmp.ne.s32.totalorder %v677_v15, 0  ;;  %v933_v20 = vand.u32 4, %v5980_v10 }
  0xee   : > { %vm6109_vm2 = vcmp.ne.s32.totalorder %v803_v56, 0  ;;  %vm6113_vm3 = vcmp.ne.s32.totalorder %v805_v53, 0  ;;  %vm6117_vm4 = vcmp.ne.s32.totalorder %v931_v45, 0  ;;  %v1059_v29 = vand.u32 8, %v5977_v9 }
  0xef   : > { %3756 = vmatpush.bf16.msra.mxu1 %v2152_v30  ;;  %vm6122_vm5 = vcmp.ne.s32.totalorder %v933_v20, 0  ;;  %v1061_v35 = vand.u32 8, %v5980_v10  ;;  %v1187_v31 = vsel %vm6100_vm0, -0.6961928, %v12608_v40  ;;  %v1189_v52 = vsel %vm6104_vm1, -0.6961928, %v12608_v40 }
  0xf0   : > { %vm6133_vm6 = vcmp.ne.s32.totalorder %v1059_v29, 0  ;;  %v1251_v9 = vsel %vm6100_vm0, -0.3949175, %v12606_v43  ;;  %v1253_v10 = vsel %vm6104_vm1, -0.3949175, %v12606_v43  ;;  %v1379_v57 = vsel %vm6100_vm0, 0.0, %v12604_v50 }
  0xf1   : > { %vm6146_vm7 = vcmp.ne.s32.totalorder %v1061_v35, 0  ;;  %v1315_v36 = vsel %vm6100_vm0, -0.18477343, %v12602_v46  ;;  %v1317_v38 = vsel %vm6104_vm1, -0.18477343, %v12602_v46  ;;  %v1381_v48 = vsel %vm6104_vm1, 0.0, %v12604_v50 }
  0xf2   : > { %v12866_v11 = vmov 0.0795803   ;;  %v12867_v24 = vmov 0.2461123   ;;  %v1699_v55 = vsel %vm6109_vm2, %v1251_v9, %v1187_v31  ;;  %v12868_v53 = vmov 0.44070983  }
  0xf3   : > { %v1443_v4 = vsel %vm6100_vm0, 0.1609302, %v12866_v11  ;;  %v1445_v37 = vsel %vm6104_vm1, 0.1609302, %v12866_v11  ;;  %v1507_v15 = vsel %vm6100_vm0, 0.33791524, %v12867_v24  ;;  %v1701_v20 = vsel %vm6113_vm3, %v1253_v10, %v1189_v52 }
  0xf4   : > { %v1509_v56 = vsel %vm6104_vm1, 0.33791524, %v12867_v24  ;;  %v1571_v45 = vsel %vm6100_vm0, 0.562617, %v12868_v53  ;;  %v1573_v30 = vsel %vm6104_vm1, 0.562617, %v12868_v53  ;;  %v1763_v31 = vsel %vm6109_vm2, %v1379_v57, %v1315_v36 }
  0xf5   : > { %v1635_v29 = vsel %vm6100_vm0, 1.0, %v12615_v63  ;;  %v1637_v35 = vsel %vm6104_vm1, 1.0, %v12615_v63  ;;  %v1765_v9 = vsel %vm6113_vm3, %v1381_v48, %v1317_v38  ;;  %v1827_v46 = vsel %vm6109_vm2, %v1507_v15, %v1443_v4 }
  0xf6   : > { %v1829_v52 = vsel %vm6113_vm3, %v1509_v56, %v1445_v37  ;;  %v1891_v39 = vsel %vm6109_vm2, %v1635_v29, %v1571_v45  ;;  %v1893_v10 = vsel %vm6113_vm3, %v1637_v35, %v1573_v30  ;;  %v1955_v59 = vsel %vm6117_vm4, %v1763_v31, %v1699_v55 }
  0xf7   : > { %v1957_v57 = vsel %vm6122_vm5, %v1765_v9, %v1701_v20  ;;  %v2019_v36 = vsel %vm6117_vm4, %v1891_v39, %v1827_v46  ;;  %v2021_v38 = vsel %vm6122_vm5, %v1893_v10, %v1829_v52  ;;  %v645_v27 = vand.u32 15, %v5972_v6 }
  0xf8   : > { %v2083_v48 = vsel %vm6133_vm6, %v2019_v36, %v1955_v59  ;;  %v2085_v41 = vsel %vm6146_vm7, %v2021_v38, %v1957_v57  ;;  %v707_v4 = vand.u32 1, %v5983_v13  ;;  %v835_v15 = vand.u32 2, %v5983_v13 }
  0xf9   : > { %v2137_v37 = vpack.c.bf16 %v2085_v41, %v2083_v48  ;;  %v963_v55 = vand.u32 4, %v5983_v13  ;;  %v1091_v46 = vand.u32 8, %v5983_v13  ;;  %v709_v28 = vand.u32 1, %v645_v27 }
  0xfa   : > { %vm6216_vm8 = vcmp.ne.s32.totalorder %v707_v4, 0  ;;  %v837_v32 = vand.u32 2, %v645_v27  ;;  %v965_v56 = vand.u32 4, %v645_v27  ;;  %vm6220_vm9 = vcmp.ne.s32.totalorder %v835_v15, 0 }
  0xfb   : > { %3770 = vmatpush.bf16.msra.mxu2 %v2137_v37  ;;  %vm6224_vm10 = vcmp.ne.s32.totalorder %v963_v55, 0  ;;  %v1093_v30 = vand.u32 8, %v645_v27  ;;  %vm6228_vm11 = vcmp.ne.s32.totalorder %v1091_v46, 0  ;;  %vm6232_vm12 = vcmp.ne.s32.totalorder %v709_v28, 0 }
  0xfc   : > { %vm6236_vm13 = vcmp.ne.s32.totalorder %v837_v32, 0  ;;  %vm6240_vm14 = vcmp.ne.s32.totalorder %v965_v56, 0  ;;  %v1219_v31 = vsel %vm6216_vm8, -0.6961928, %v12608_v40  ;;  %v1221_v52 = vsel %vm6232_vm12, -0.6961928, %v12608_v40 }
  0xfd   : > { %vm6247_vm15 = vcmp.ne.s32.totalorder %v1093_v30, 0  ;;  %v1283_v39 = vsel %vm6216_vm8, -0.3949175, %v12606_v43  ;;  %v1411_v10 = vsel %vm6216_vm8, 0.0, %v12604_v50  ;;  %v1285_v59 = vsel %vm6232_vm12, -0.3949175, %v12606_v43 }
  0xfe   : > { %v12885_v57 = vmov -0.28444138   ;;  %v1731_v48 = vsel %vm6220_vm9, %v1283_v39, %v1219_v31  ;;  %v1413_v41 = vsel %vm6232_vm12, 0.0, %v12604_v50  ;;  %v1475_v27 = vsel %vm6216_vm8, 0.1609302, %v12866_v11 }
  0xff   : > { %v1347_v36 = vsel %vm6216_vm8, -0.18477343, %v12885_v57  ;;  %v1349_v38 = vsel %vm6232_vm12, -0.18477343, %v12885_v57  ;;  %v1477_v4 = vsel %vm6232_vm12, 0.1609302, %v12866_v11  ;;  %v1733_v28 = vsel %vm6236_vm13, %v1285_v59, %v1221_v52 }
 0x100   : > { %v1667_v37 = vsel %vm6216_vm8, 1.0, %v12615_v63  ;;  %v1539_v15 = vsel %vm6216_vm8, 0.33791524, %v12867_v24  ;;  %v1541_v55 = vsel %vm6232_vm12, 0.33791524, %v12867_v24  ;;  %v1669_v56 = vsel %vm6232_vm12, 1.0, %v12615_v63 }
 0x101   : > { %v1603_v46 = vsel %vm6216_vm8, 0.562617, %v12868_v53  ;;  %v1605_v32 = vsel %vm6232_vm12, 0.562617, %v12868_v53  ;;  %v1795_v30 = vsel %vm6220_vm9, %v1411_v10, %v1347_v36  ;;  %v1797_v31 = vsel %vm6236_vm13, %v1413_v41, %v1349_v38 }
 0x102   : > { %v1859_v26 = vsel %vm6220_vm9, %v1539_v15, %v1475_v27  ;;  %v1861_v52 = vsel %vm6236_vm13, %v1541_v55, %v1477_v4  ;;  %v1923_v39 = vsel %vm6220_vm9, %v1667_v37, %v1603_v46  ;;  %v1925_v59 = vsel %vm6236_vm13, %v1669_v56, %v1605_v32 }
 0x103   : > { %v1987_v13 = vsel %vm6224_vm10, %v1795_v30, %v1731_v48  ;;  %v1989_v10 = vsel %vm6240_vm14, %v1797_v31, %v1733_v28  ;;  %v2051_v36 = vsel %vm6224_vm10, %v1923_v39, %v1859_v26  ;;  %v2053_v38 = vsel %vm6240_vm14, %v1925_v59, %v1861_v52  ;;  %v6441_v31 = vld [vmem:[%s4819_s26 + $0x10] sm:$0xff] }
 0x104   : > { %v2115_v41 = vsel %vm6228_vm11, %v2051_v36, %v1987_v13  ;;  %v2117_v44 = vsel %vm6247_vm15, %v2053_v38, %v1989_v10  ;;  %v606_v29 = vand.u32 15, %v5974_v33  ;;  %v608_v27 = vand.u32 15, %v5985_v17 }
 0x105   : > { %v2153_v48 = vpack.c.bf16 %v2117_v44, %v2115_v41  ;;  %v510_v4 = vunpack.c.0.s8 %v5924_v25  ;;  %v512_v37 = vunpack.c.1.s8 %v5924_v25  ;;  %v479_v45 = vunpack.c.0.s8 %v5935_v0 }
 0x106   : > { %v670_v15 = vand.u32 1, %v606_v29  ;;  %v672_v35 = vand.u32 1, %v608_v27  ;;  %v798_v55 = vand.u32 2, %v606_v29  ;;  %v800_v46 = vand.u32 2, %v608_v27 }
 0x107   : > { %3784 = vmatpush.bf16.msra.mxu3 %v2153_v48  ;;  %v926_v20 = vand.u32 4, %v606_v29  ;;  %v928_v28 = vand.u32 4, %v608_v27  ;;  %v1054_v9 = vand.u32 8, %v606_v29  ;;  %v1056_v32 = vand.u32 8, %v608_v27 }
 0x108   : > { %vm6329_vm0 = vcmp.ne.s32.totalorder %v670_v15, 0  ;;  %vm6333_vm1 = vcmp.ne.s32.totalorder %v672_v35, 0  ;;  %vm6337_vm2 = vcmp.ne.s32.totalorder %v798_v55, 0  ;;  %vm6341_vm3 = vcmp.ne.s32.totalorder %v800_v46, 0 }
 0x109   : > { %vm6345_vm4 = vcmp.ne.s32.totalorder %v926_v20, 0  ;;  %vm6349_vm5 = vcmp.ne.s32.totalorder %v928_v28, 0  ;;  %vm6353_vm6 = vcmp.ne.s32.totalorder %v1054_v9, 0  ;;  %vm6357_vm7 = vcmp.ne.s32.totalorder %v1056_v32, 0 }
 0x10a   : > { %v1182_v13 = vsel %vm6329_vm0, -0.6961928, %v12608_v40  ;;  %v1184_v10 = vsel %vm6333_vm1, -0.6961928, %v12608_v40  ;;  %v1246_v36 = vsel %vm6329_vm0, -0.3949175, %v12606_v43  ;;  %v481_v38 = vunpack.c.1.s8 %v5935_v0 }
 0x10b   : > { %v1248_v41 = vsel %vm6333_vm1, -0.3949175, %v12606_v43  ;;  %v1310_v44 = vsel %vm6329_vm0, -0.18477343, %v12885_v57  ;;  %v1312_v29 = vsel %vm6333_vm1, -0.18477343, %v12885_v57  ;;  %v1694_v27 = vsel %vm6337_vm2, %v1246_v36, %v1182_v13 }
 0x10c   : > { %v1374_v48 = vsel %vm6329_vm0, 0.0, %v12604_v50  ;;  %v1376_v0 = vsel %vm6333_vm1, 0.0, %v12604_v50  ;;  %v1438_v15 = vsel %vm6329_vm0, 0.1609302, %v12866_v11  ;;  %v1440_v35 = vsel %vm6333_vm1, 0.1609302, %v12866_v11 }
 0x10d   : > { %v1502_v55 = vsel %vm6329_vm0, 0.33791524, %v12867_v24  ;;  %v1504_v46 = vsel %vm6333_vm1, 0.33791524, %v12867_v24  ;;  %v1566_v20 = vsel %vm6329_vm0, 0.562617, %v12868_v53  ;;  %v1696_v28 = vsel %vm6341_vm3, %v1248_v41, %v1184_v10 }
 0x10e   : > { %v1568_v9 = vsel %vm6333_vm1, 0.562617, %v12868_v53  ;;  %v1630_v32 = vsel %vm6329_vm0, 1.0, %v12615_v63  ;;  %v1632_v13 = vsel %vm6333_vm1, 1.0, %v12615_v63  ;;  %v1758_v36 = vsel %vm6337_vm2, %v1374_v48, %v1310_v44 }
 0x10f   : > { %v1760_v50 = vsel %vm6341_vm3, %v1376_v0, %v1312_v29  ;;  %v1822_v10 = vsel %vm6337_vm2, %v1502_v55, %v1438_v15  ;;  %v1824_v41 = vsel %vm6341_vm3, %v1504_v46, %v1440_v35  ;;  %v1886_v56 = vsel %vm6337_vm2, %v1630_v32, %v1566_v20 }
 0x110   : > { %v1888_v43 = vsel %vm6341_vm3, %v1632_v13, %v1568_v9  ;;  %v1950_v30 = vsel %vm6345_vm4, %v1758_v36, %v1694_v27  ;;  %v1952_v44 = vsel %vm6349_vm5, %v1760_v50, %v1696_v28  ;;  %v2014_v29 = vsel %vm6345_vm4, %v1886_v56, %v1822_v10 }
 0x111   : > { %v2016_v48 = vsel %vm6349_vm5, %v1888_v43, %v1824_v41  ;;  %v2078_v0 = vsel %vm6353_vm6, %v2014_v29, %v1950_v30  ;;  %v6436_v25 = vand.u32 255, %v510_v4  ;;  %v6438_v15 = vand.u32 255, %v512_v37 }
 0x112   : > { %v2080_v27 = vsel %vm6357_vm7, %v2016_v48, %v1952_v44  ;;  %v6445_v35 = vand.u32 255, %v479_v45  ;;  %v6447_v50 = vand.u32 255, %v481_v38  ;;  %v511_v26 = vunpack.c.0.s8 %v5938_v14 }
 0x113   : > { %12902 = vst [vmem:[#allocation26_spill] sm:$0xff] %v6436_v25  ;;  %v2134_v52 = vpack.c.bf16 %v2080_v27, %v2078_v0  ;;  %v638_v43 = vand.u32 15, %v6436_v25  ;;  %v640_v39 = vand.u32 15, %v6438_v15 }
 0x114   : > { %12903 = vst [vmem:[#allocation27_spill] sm:$0xff] %v6438_v15  ;;  %v6454_v37 = vand.u32 15, %v6445_v35  ;;  %v6457_v55 = vand.u32 15, %v6447_v50  ;;  %v6459_v59 = vand.u32 255, %v511_v26 }
 0x115   : > { %12904 = vst [vmem:[#allocation28_spill] sm:$0xff] %v6445_v35  ;;  %3743 = vmatpush.bf16.msra.mxu0 %v2134_v52  ;;  %v702_v38 = vand.u32 1, %v638_v43  ;;  %v704_v46 = vand.u32 1, %v640_v39  ;;  %v830_v20 = vand.u32 2, %v638_v43  ;;  %v832_v28 = vand.u32 2, %v640_v39 }
 0x116   : > { %12905 = vst [vmem:[#allocation29_spill] sm:$0xff] %v6447_v50  ;;  %v958_v9 = vand.u32 4, %v638_v43  ;;  %v960_v32 = vand.u32 4, %v640_v39  ;;  %v1086_v13 = vand.u32 8, %v638_v43  ;;  %v1088_v36 = vand.u32 8, %v640_v39 }
 0x117   : > { %12906 = vst [vmem:[#allocation30_spill] sm:$0xff] %v6459_v59  ;;  %vm6462_vm8 = vcmp.ne.s32.totalorder %v702_v38, 0  ;;  %vm6466_vm9 = vcmp.ne.s32.totalorder %v704_v46, 0  ;;  %vm6470_vm10 = vcmp.ne.s32.totalorder %v830_v20, 0  ;;  %vm6474_vm11 = vcmp.ne.s32.totalorder %v832_v28, 0 }
 0x118   : > { %vm6478_vm12 = vcmp.ne.s32.totalorder %v958_v9, 0  ;;  %vm6482_vm13 = vcmp.ne.s32.totalorder %v960_v32, 0  ;;  %vm6486_vm14 = vcmp.ne.s32.totalorder %v1086_v13, 0  ;;  %vm6490_vm15 = vcmp.ne.s32.totalorder %v1088_v36, 0 }
 0x119   : > { %v1214_v27 = vsel %vm6462_vm8, -0.6961928, %v12608_v40  ;;  %v1216_v26 = vsel %vm6466_vm9, -0.6961928, %v12608_v40  ;;  %v12923_v52 = vmov -0.52507305  }
 0x11a   : > { %v1278_v43 = vsel %vm6462_vm8, -0.3949175, %v12923_v52  ;;  %v1280_v38 = vsel %vm6466_vm9, -0.3949175, %v12923_v52  ;;  %v1342_v46 = vsel %vm6462_vm8, -0.18477343, %v12885_v57 }
 0x11b   : > { %v1344_v20 = vsel %vm6466_vm9, -0.18477343, %v12885_v57  ;;  %v1726_v28 = vsel %vm6470_vm10, %v1278_v43, %v1214_v27  ;;  %v12924_v9 = vmov -0.091050036   ;;  %v1470_v36 = vsel %vm6462_vm8, 0.1609302, %v12866_v11 }
 0x11c   : > { %v1406_v32 = vsel %vm6462_vm8, 0.0, %v12924_v9  ;;  %v1408_v13 = vsel %vm6466_vm9, 0.0, %v12924_v9  ;;  %v1472_v39 = vsel %vm6466_vm9, 0.1609302, %v12866_v11  ;;  %v1534_v27 = vsel %vm6462_vm8, 0.33791524, %v12867_v24 }
 0x11d   : > { %v1536_v43 = vsel %vm6466_vm9, 0.33791524, %v12867_v24  ;;  %v1598_v45 = vsel %vm6462_vm8, 0.562617, %v12868_v53  ;;  %v1728_v4 = vsel %vm6474_vm11, %v1280_v38, %v1216_v26  ;;  %v1600_v40 = vsel %vm6466_vm9, 0.562617, %v12868_v53 }
 0x11e   : > { %v1662_v50 = vsel %vm6462_vm8, 1.0, %v12615_v63  ;;  %v1664_v35 = vsel %vm6466_vm9, 1.0, %v12615_v63  ;;  %v1790_v15 = vsel %vm6470_vm10, %v1406_v32, %v1342_v46  ;;  %v1792_v25 = vsel %vm6474_vm11, %v1408_v13, %v1344_v20 }
 0x11f   : > { %v1854_v26 = vsel %vm6470_vm10, %v1534_v27, %v1470_v36  ;;  %v1856_v38 = vsel %vm6474_vm11, %v1536_v43, %v1472_v39  ;;  %v1918_v10 = vsel %vm6470_vm10, %v1662_v50, %v1598_v45  ;;  %v1920_v17 = vsel %vm6474_vm11, %v1664_v35, %v1600_v40 }
 0x120   : > { %v1982_v41 = vsel %vm6478_vm12, %v1790_v15, %v1726_v28  ;;  %v1984_v46 = vsel %vm6482_vm13, %v1792_v25, %v1728_v4  ;;  %v2046_v20 = vsel %vm6478_vm12, %v1918_v10, %v1854_v26  ;;  %v2048_v32 = vsel %vm6482_vm13, %v1920_v17, %v1856_v38  ;;  %v6676_v17 = vld [vmem:[%s4819_s26 + $0x50] sm:$0xff] }
 0x121   : > { %v2110_v39 = vsel %vm6486_vm14, %v2046_v20, %v1982_v41  ;;  %v671_v50 = vand.u32 1, %v6454_v37  ;;  %v673_v45 = vand.u32 1, %v6457_v55  ;;  %v2112_v40 = vsel %vm6490_vm15, %v2048_v32, %v1984_v46 }
 0x122   : > { %v799_v15 = vand.u32 2, %v6454_v37  ;;  %v801_v25 = vand.u32 2, %v6457_v55  ;;  %v927_v35 = vand.u32 4, %v6454_v37  ;;  %v2150_v4 = vpack.c.bf16 %v2112_v40, %v2110_v39 }
 0x123   : > { %vm6576_vm0 = vcmp.ne.s32.totalorder %v671_v50, 0  ;;  %vm6580_vm1 = vcmp.ne.s32.totalorder %v673_v45, 0  ;;  %v929_v30 = vand.u32 4, %v6457_v55  ;;  %v1055_v0 = vand.u32 8, %v6454_v37 }
 0x124   : > { %vm6585_vm2 = vcmp.ne.s32.totalorder %v799_v15, 0  ;;  %vm6589_vm3 = vcmp.ne.s32.totalorder %v801_v25, 0  ;;  %vm6593_vm4 = vcmp.ne.s32.totalorder %v927_v35, 0  ;;  %3757 = vmatpush.bf16.msra.mxu1 %v2150_v4  ;;  %v1057_v13 = vand.u32 8, %v6457_v55 }
 0x125   : > { %vm6598_vm5 = vcmp.ne.s32.totalorder %v929_v30, 0  ;;  %v12937_v36 = vmov -1.0   ;;  %vm6609_vm6 = vcmp.ne.s32.totalorder %v1055_v0, 0  ;;  %v1247_v37 = vsel %vm6576_vm0, -0.3949175, %v12923_v52 }
 0x126   : > { %v1183_v27 = vsel %vm6576_vm0, -0.6961928, %v12937_v36  ;;  %v1185_v43 = vsel %vm6580_vm1, -0.6961928, %v12937_v36  ;;  %v1249_v55 = vsel %vm6580_vm1, -0.3949175, %v12923_v52  ;;  %v12946_v28 = vunpack.c.3.s8 %v6441_v31 }
 0x127   : > { %v1375_v38 = vsel %vm6576_vm0, 0.0, %v12924_v9  ;;  %vm6622_vm7 = vcmp.ne.s32.totalorder %v1057_v13, 0  ;;  %v1311_v41 = vsel %vm6576_vm0, -0.18477343, %v12885_v57  ;;  %v1313_v46 = vsel %vm6580_vm1, -0.18477343, %v12885_v57 }
 0x128   : > { %v1377_v20 = vsel %vm6580_vm1, 0.0, %v12924_v9  ;;  %v1439_v32 = vsel %vm6576_vm0, 0.1609302, %v12866_v11  ;;  %v1441_v39 = vsel %vm6580_vm1, 0.1609302, %v12866_v11  ;;  %v1695_v45 = vsel %vm6585_vm2, %v1247_v37, %v1183_v27 }
 0x129   : > { %v1503_v50 = vsel %vm6576_vm0, 0.33791524, %v12867_v24  ;;  %v1505_v40 = vsel %vm6580_vm1, 0.33791524, %v12867_v24  ;;  %v1567_v15 = vsel %vm6576_vm0, 0.562617, %v12868_v53  ;;  %v1697_v35 = vsel %vm6589_vm3, %v1249_v55, %v1185_v43 }
 0x12a   : > { %v1569_v25 = vsel %vm6580_vm1, 0.562617, %v12868_v53  ;;  %v1631_v4 = vsel %vm6576_vm0, 1.0, %v12615_v63  ;;  %v1633_v30 = vsel %vm6580_vm1, 1.0, %v12615_v63  ;;  %v1759_v0 = vsel %vm6585_vm2, %v1375_v38, %v1311_v41 }
 0x12b   : > { %v1761_v13 = vsel %vm6589_vm3, %v1377_v20, %v1313_v46  ;;  %v1823_v27 = vsel %vm6585_vm2, %v1503_v50, %v1439_v32  ;;  %v1825_v43 = vsel %vm6589_vm3, %v1505_v40, %v1441_v39  ;;  %v1887_v56 = vsel %vm6585_vm2, %v1631_v4, %v1567_v15 }
 0x12c   : > { %v1889_v37 = vsel %vm6589_vm3, %v1633_v30, %v1569_v25  ;;  %v1951_v55 = vsel %vm6593_vm4, %v1759_v0, %v1695_v45  ;;  %v1953_v38 = vsel %vm6598_vm5, %v1761_v13, %v1697_v35  ;;  %v2015_v41 = vsel %vm6593_vm4, %v1887_v56, %v1823_v27 }
 0x12d   : > { %v2017_v46 = vsel %vm6598_vm5, %v1889_v37, %v1825_v43  ;;  %v2079_v44 = vsel %vm6609_vm6, %v2015_v41, %v1951_v55  ;;  %v12942_v20 = vunpack.c.1.s8 %v5938_v14  ;;  %v639_v39 = vand.u32 15, %v6459_v59 }
 0x12e   : > { %v2081_v29 = vsel %vm6622_vm7, %v2017_v46, %v1953_v38  ;;  %v12944_v45 = vunpack.c.2.s8 %v6441_v31  ;;  %v6701_v40 = vand.u32 255, %v12946_v28 }
 0x12f   : > { %v6692_v32 = vand.u32 255, %v12942_v20  ;;  %v2135_v50 = vpack.c.bf16 %v2081_v29, %v2079_v44  ;;  %v703_v15 = vand.u32 1, %v639_v39  ;;  %v831_v25 = vand.u32 2, %v639_v39 }
 0x130   : > { %v6697_v48 = vand.u32 255, %v12944_v45  ;;  %12947 = vst [vmem:[#allocation33_spill] sm:$0xff] %v6701_v40  ;;  %v959_v14 = vand.u32 4, %v639_v39  ;;  %v1087_v35 = vand.u32 8, %v639_v39  ;;  %v6707_v30 = vand.u32 15, %v6701_v40 }
 0x131   : > { %12943 = vst [vmem:[#allocation31_spill] sm:$0xff] %v6692_v32  ;;  %v641_v10 = vand.u32 15, %v6692_v32  ;;  %3771 = vmatpush.bf16.msra.mxu2 %v2135_v50  ;;  %vm6710_vm8 = vcmp.ne.s32.totalorder %v703_v15, 0  ;;  %vm6714_vm9 = vcmp.ne.s32.totalorder %v831_v25, 0  ;;  %v12964_v40 = vmov 0.72295684  }
 0x132   : > { %12945 = vst [vmem:[#allocation32_spill] sm:$0xff] %v6697_v48  ;;  %v602_v4 = vand.u32 15, %v6697_v48  ;;  %vm6718_vm10 = vcmp.ne.s32.totalorder %v959_v14, 0  ;;  %vm6722_vm11 = vcmp.ne.s32.totalorder %v1087_v35, 0  ;;  %v1215_v29 = vsel %vm6710_vm8, -0.6961928, %v12937_v36 }
 0x133   : > { %v705_v13 = vand.u32 1, %v641_v10  ;;  %v833_v43 = vand.u32 2, %v641_v10  ;;  %v961_v37 = vand.u32 4, %v641_v10  ;;  %v1089_v38 = vand.u32 8, %v641_v10 }
 0x134   : > { %v1279_v20 = vsel %vm6710_vm8, -0.3949175, %v12923_v52  ;;  %v1343_v10 = vsel %vm6710_vm8, -0.18477343, %v12885_v57  ;;  %v1407_v25 = vsel %vm6710_vm8, 0.0, %v12924_v9  ;;  %v1663_v48 = vsel %vm6710_vm8, 1.0, %v12964_v40 }
 0x135   : > { %vm6726_vm12 = vcmp.ne.s32.totalorder %v705_v13, 0  ;;  %vm6730_vm13 = vcmp.ne.s32.totalorder %v833_v43, 0  ;;  %vm6740_vm14 = vcmp.ne.s32.totalorder %v961_v37, 0  ;;  %vm6744_vm15 = vcmp.ne.s32.totalorder %v1089_v38, 0 }
 0x136   : > { %v1217_v45 = vsel %vm6726_vm12, -0.6961928, %v12937_v36  ;;  %v1281_v28 = vsel %vm6726_vm12, -0.3949175, %v12923_v52  ;;  %v1345_v15 = vsel %vm6726_vm12, -0.18477343, %v12885_v57  ;;  %v1727_v37 = vsel %vm6714_vm9, %v1279_v20, %v1215_v29 }
 0x137   : > { %v1409_v14 = vsel %vm6726_vm12, 0.0, %v12924_v9  ;;  %v1471_v35 = vsel %vm6710_vm8, 0.1609302, %v12866_v11  ;;  %v1473_v13 = vsel %vm6726_vm12, 0.1609302, %v12866_v11  ;;  %v1729_v63 = vsel %vm6730_vm13, %v1281_v28, %v1217_v45 }
 0x138   : > { %v1535_v43 = vsel %vm6710_vm8, 0.33791524, %v12867_v24  ;;  %v1537_v38 = vsel %vm6726_vm12, 0.33791524, %v12867_v24  ;;  %v1599_v0 = vsel %vm6710_vm8, 0.562617, %v12868_v53  ;;  %v1791_v20 = vsel %vm6714_vm9, %v1407_v25, %v1343_v10 }
 0x139   : > { %v1601_v26 = vsel %vm6726_vm12, 0.562617, %v12868_v53  ;;  %v1665_v29 = vsel %vm6726_vm12, 1.0, %v12964_v40  ;;  %v1793_v32 = vsel %vm6730_vm13, %v1409_v14, %v1345_v15  ;;  %v1855_v59 = vsel %vm6714_vm9, %v1535_v43, %v1471_v35 }
 0x13a   : > { %v1857_v45 = vsel %vm6730_vm13, %v1537_v38, %v1473_v13  ;;  %v1919_v27 = vsel %vm6714_vm9, %v1663_v48, %v1599_v0  ;;  %v1921_v28 = vsel %vm6730_vm13, %v1665_v29, %v1601_v26  ;;  %v1983_v46 = vsel %vm6718_vm10, %v1791_v20, %v1727_v37 }
 0x13b   : > { %v1985_v10 = vsel %vm6740_vm14, %v1793_v32, %v1729_v63  ;;  %v2047_v15 = vsel %vm6718_vm10, %v1919_v27, %v1855_v59  ;;  %v2049_v25 = vsel %vm6740_vm14, %v1921_v28, %v1857_v45  ;;  %v666_v0 = vand.u32 1, %v602_v4 }
 0x13c   : > { %v2111_v14 = vsel %vm6722_vm11, %v2047_v15, %v1983_v46  ;;  %v2113_v48 = vsel %vm6744_vm15, %v2049_v25, %v1985_v10  ;;  %v668_v26 = vand.u32 1, %v6707_v30  ;;  %v794_v44 = vand.u32 2, %v602_v4 }
 0x13d   : > { %v2151_v56 = vpack.c.bf16 %v2113_v48, %v2111_v14  ;;  %v796_v35 = vand.u32 2, %v6707_v30  ;;  %v922_v63 = vand.u32 4, %v602_v4  ;;  %vm6820_vm0 = vcmp.ne.s32.totalorder %v666_v0, 0 }
 0x13e   : > { %vm6824_vm1 = vcmp.ne.s32.totalorder %v668_v26, 0  ;;  %v924_v55 = vand.u32 4, %v6707_v30  ;;  %v1050_v41 = vand.u32 8, %v602_v4  ;;  %vm6829_vm2 = vcmp.ne.s32.totalorder %v794_v44, 0 }
 0x13f   : > { %3785 = vmatpush.bf16.msra.mxu3 %v2151_v56  ;;  %vm6833_vm3 = vcmp.ne.s32.totalorder %v796_v35, 0  ;;  %vm6837_vm4 = vcmp.ne.s32.totalorder %v922_v63, 0  ;;  %v1052_v43 = vand.u32 8, %v6707_v30  ;;  %v1178_v38 = vsel %vm6820_vm0, -0.6961928, %v12937_v36 }
 0x140   : > { %vm6842_vm5 = vcmp.ne.s32.totalorder %v924_v55, 0  ;;  %vm6846_vm6 = vcmp.ne.s32.totalorder %v1050_v41, 0  ;;  %v1180_v29 = vsel %vm6824_vm1, -0.6961928, %v12937_v36  ;;  %v1242_v30 = vsel %vm6820_vm0, -0.3949175, %v12923_v52 }
 0x141   : > { %vm6856_vm7 = vcmp.ne.s32.totalorder %v1052_v43, 0  ;;  %v1244_v45 = vsel %vm6824_vm1, -0.3949175, %v12923_v52  ;;  %v1370_v27 = vsel %vm6820_vm0, 0.0, %v12924_v9  ;;  %v1306_v28 = vsel %vm6820_vm0, -0.18477343, %v12885_v57 }
 0x142   : > { %v1308_v46 = vsel %vm6824_vm1, -0.18477343, %v12885_v57  ;;  %v1372_v10 = vsel %vm6824_vm1, 0.0, %v12924_v9  ;;  %v1626_v15 = vsel %vm6820_vm0, 1.0, %v12964_v40  ;;  %v1434_v25 = vsel %vm6820_vm0, 0.1609302, %v12866_v11 }
 0x143   : > { %v1436_v14 = vsel %vm6824_vm1, 0.1609302, %v12866_v11  ;;  %v1498_v48 = vsel %vm6820_vm0, 0.33791524, %v12867_v24  ;;  %v1690_v0 = vsel %vm6829_vm2, %v1242_v30, %v1178_v38  ;;  %v1500_v26 = vsel %vm6824_vm1, 0.33791524, %v12867_v24 }
 0x144   : > { %v1562_v56 = vsel %vm6820_vm0, 0.562617, %v12868_v53  ;;  %v1564_v44 = vsel %vm6824_vm1, 0.562617, %v12868_v53  ;;  %v1692_v35 = vsel %vm6833_vm3, %v1244_v45, %v1180_v29  ;;  %v1628_v63 = vsel %vm6824_vm1, 1.0, %v12964_v40  ;;  %v6913_v43 = vld [vmem:[%s4819_s26 + $0x18] sm:$0xff] }
 0x145   : > { %v1754_v55 = vsel %vm6829_vm2, %v1370_v27, %v1306_v28  ;;  %v1756_v41 = vsel %vm6833_vm3, %v1372_v10, %v1308_v46  ;;  %v1818_v32 = vsel %vm6829_vm2, %v1498_v48, %v1434_v25  ;;  %v1820_v38 = vsel %vm6833_vm3, %v1500_v26, %v1436_v14  ;;  %v6924_v45 = vld [vmem:[%s4819_s26 + $0x58] sm:$0xff] }
 0x146   : > { %v1882_v29 = vsel %vm6829_vm2, %v1626_v15, %v1562_v56  ;;  %v1884_v59 = vsel %vm6833_vm3, %v1628_v63, %v1564_v44  ;;  %v1946_v30 = vsel %vm6837_vm4, %v1754_v55, %v1690_v0  ;;  %v1948_v27 = vsel %vm6842_vm5, %v1756_v41, %v1692_v35 }
 0x147   : > { %v2010_v28 = vsel %vm6837_vm4, %v1882_v29, %v1818_v32  ;;  %v2012_v46 = vsel %vm6842_vm5, %v1884_v59, %v1820_v38  ;;  %v12981_v39 = vunpack.c.2.s8 %v6676_v17  ;;  %v12983_v25 = vunpack.c.3.s8 %v6676_v17 }
 0x148   : > { %v2074_v50 = vsel %vm6846_vm6, %v2010_v28, %v1946_v30  ;;  %v2076_v15 = vsel %vm6856_vm7, %v2012_v46, %v1948_v27  ;;  %v475_v13 = vunpack.c.2.s8 %v6913_v43  ;;  %v477_v0 = vunpack.c.3.s8 %v6913_v43 }
 0x149   : > { %v6934_v10 = vand.u32 255, %v12981_v39  ;;  %v6942_v14 = vand.u32 255, %v12983_v25  ;;  %v2132_v48 = vpack.c.bf16 %v2076_v15, %v2074_v50  ;;  %v507_v26 = vunpack.c.2.s8 %v6924_v45 }
 0x14a   : > { %v6949_v4 = vand.u32 255, %v475_v13  ;;  %v509_v20 = vunpack.c.3.s8 %v6924_v45  ;;  %v470_v44 = vunpack.c.0.s8 %v6441_v31  ;;  %v7060_v27 = vand.u32 255, %v477_v0 }
 0x14b   : > { %12982 = vst [vmem:[#allocation34_spill] sm:$0xff] %v6934_v10  ;;  %v634_v37 = vand.u32 15, %v6934_v10  ;;  %v636_v56 = vand.u32 15, %v6942_v14  ;;  %3744 = vmatpush.bf16.msra.mxu0 %v2132_v48 }
 0x14c   : > { %12984 = vst [vmem:[#allocation35_spill] sm:$0xff] %v6942_v14  ;;  %v605_v28 = vand.u32 15, %v7060_v27 }
 0x14d   : > { %12985 = vst [vmem:[#allocation36_spill] sm:$0xff] %v6949_v4  ;;  %v698_v35 = vand.u32 1, %v634_v37  ;;  %v826_v63 = vand.u32 2, %v634_v37  ;;  %v954_v55 = vand.u32 4, %v634_v37  ;;  %v1082_v41 = vand.u32 8, %v634_v37 }
 0x14e   : > { %v700_v32 = vand.u32 1, %v636_v56  ;;  %v828_v38 = vand.u32 2, %v636_v56  ;;  %v956_v29 = vand.u32 4, %v636_v56  ;;  %v1084_v59 = vand.u32 8, %v636_v56  ;;  %13002 = vst [vmem:[#allocation37_spill] sm:$0xff] %v7060_v27 }
 0x14f   : > { %vm6953_vm8 = vcmp.ne.s32.totalorder %v698_v35, 0  ;;  %vm6957_vm9 = vcmp.ne.s32.totalorder %v826_v63, 0  ;;  %vm6961_vm10 = vcmp.ne.s32.totalorder %v954_v55, 0  ;;  %vm6965_vm11 = vcmp.ne.s32.totalorder %v1082_v41, 0 }
 0x150   : > { %vm6969_vm12 = vcmp.ne.s32.totalorder %v700_v32, 0  ;;  %vm6973_vm13 = vcmp.ne.s32.totalorder %v828_v38, 0  ;;  %vm6977_vm14 = vcmp.ne.s32.totalorder %v956_v29, 0  ;;  %vm6981_vm15 = vcmp.ne.s32.totalorder %v1084_v59, 0 }
 0x151   : > { %v1210_v13 = vsel %vm6953_vm8, -0.6961928, %v12937_v36  ;;  %v1212_v48 = vsel %vm6969_vm12, -0.6961928, %v12937_v36  ;;  %v1274_v37 = vsel %vm6953_vm8, -0.3949175, %v12923_v52 }
 0x152   : > { %v1276_v35 = vsel %vm6969_vm12, -0.3949175, %v12923_v52  ;;  %v1338_v63 = vsel %vm6953_vm8, -0.18477343, %v12885_v57  ;;  %v1340_v55 = vsel %vm6969_vm12, -0.18477343, %v12885_v57  ;;  %v1722_v41 = vsel %vm6957_vm9, %v1274_v37, %v1210_v13 }
 0x153   : > { %v1402_v32 = vsel %vm6953_vm8, 0.0, %v12924_v9  ;;  %v1404_v38 = vsel %vm6969_vm12, 0.0, %v12924_v9  ;;  %v1466_v29 = vsel %vm6953_vm8, 0.1609302, %v12866_v11  ;;  %v1468_v59 = vsel %vm6969_vm12, 0.1609302, %v12866_v11 }
 0x154   : > { %v1530_v13 = vsel %vm6953_vm8, 0.33791524, %v12867_v24  ;;  %v1532_v37 = vsel %vm6969_vm12, 0.33791524, %v12867_v24  ;;  %v1594_v56 = vsel %vm6953_vm8, 0.562617, %v12868_v53  ;;  %v1724_v14 = vsel %vm6973_vm13, %v1276_v35, %v1212_v48 }
 0x155   : > { %v1596_v10 = vsel %vm6969_vm12, 0.562617, %v12868_v53  ;;  %v1658_v33 = vsel %vm6953_vm8, 1.0, %v12964_v40  ;;  %v1660_v6 = vsel %vm6969_vm12, 1.0, %v12964_v40  ;;  %v1786_v2 = vsel %vm6957_vm9, %v1402_v32, %v1338_v63 }
 0x156   : > { %v1788_v61 = vsel %vm6973_vm13, %v1404_v38, %v1340_v55  ;;  %v1850_v48 = vsel %vm6957_vm9, %v1530_v13, %v1466_v29  ;;  %v1852_v35 = vsel %vm6973_vm13, %v1532_v37, %v1468_v59  ;;  %v1914_v30 = vsel %vm6957_vm9, %v1658_v33, %v1594_v56 }
 0x157   : > { %v1916_v60 = vsel %vm6973_vm13, %v1660_v6, %v1596_v10  ;;  %v1978_v39 = vsel %vm6961_vm10, %v1786_v2, %v1722_v41  ;;  %v1980_v63 = vsel %vm6977_vm14, %v1788_v61, %v1724_v14  ;;  %v2042_v55 = vsel %vm6961_vm10, %v1914_v30, %v1850_v48 }
 0x158   : > { %v2044_v32 = vsel %vm6977_vm14, %v1916_v60, %v1852_v35  ;;  %v2106_v38 = vsel %vm6965_vm11, %v2042_v55, %v1978_v39  ;;  %v603_v33 = vand.u32 15, %v6949_v4  ;;  %v7065_v2 = vand.u32 255, %v507_v26 }
 0x159   : > { %v2108_v6 = vsel %vm6981_vm15, %v2044_v32, %v1980_v63  ;;  %v7067_v10 = vand.u32 255, %v509_v20  ;;  %v7069_v61 = vand.u32 255, %v470_v44  ;;  %v669_v25 = vand.u32 1, %v605_v28 }
 0x15a   : > { %13003 = vst [vmem:[#allocation38_spill] sm:$0xff] %v7065_v2  ;;  %v2148_v14 = vpack.c.bf16 %v2108_v6, %v2106_v38  ;;  %v667_v60 = vand.u32 1, %v603_v33  ;;  %v795_v50 = vand.u32 2, %v603_v33  ;;  %v923_v46 = vand.u32 4, %v603_v33 }
 0x15b   : > { %13004 = vst [vmem:[#allocation39_spill] sm:$0xff] %v7067_v10  ;;  %v1051_v15 = vand.u32 8, %v603_v33  ;;  %v635_v0 = vand.u32 15, %v7065_v2  ;;  %v7074_v56 = vand.u32 15, %v7067_v10  ;;  %v797_v20 = vand.u32 2, %v605_v28 }
 0x15c   : > { %13005 = vst [vmem:[#allocation40_spill] sm:$0xff] %v7069_v61  ;;  %3758 = vmatpush.bf16.msra.mxu1 %v2148_v14  ;;  %vm7076_vm0 = vcmp.ne.s32.totalorder %v667_v60, 0  ;;  %vm7080_vm1 = vcmp.ne.s32.totalorder %v795_v50, 0  ;;  %v925_v41 = vand.u32 4, %v605_v28  ;;  %vm7084_vm2 = vcmp.ne.s32.totalorder %v923_v46, 0 }
 0x15d   : > { %v1053_v59 = vand.u32 8, %v605_v28  ;;  %vm7088_vm3 = vcmp.ne.s32.totalorder %v1051_v15, 0  ;;  %vm7092_vm4 = vcmp.ne.s32.totalorder %v669_v25, 0  ;;  %vm7096_vm5 = vcmp.ne.s32.totalorder %v797_v20, 0 }
 0x15e   : > { %v1179_v35 = vsel %vm7076_vm0, -0.6961928, %v12937_v36  ;;  %v1243_v30 = vsel %vm7076_vm0, -0.3949175, %v12923_v52  ;;  %vm7106_vm6 = vcmp.ne.s32.totalorder %v925_v41, 0  ;;  %v1371_v6 = vsel %vm7076_vm0, 0.0, %v12924_v9 }
 0x15f   : > { %vm7110_vm7 = vcmp.ne.s32.totalorder %v1053_v59, 0  ;;  %v1181_v55 = vsel %vm7092_vm4, -0.6961928, %v12937_v36  ;;  %v1245_v32 = vsel %vm7092_vm4, -0.3949175, %v12923_v52  ;;  %v1373_v14 = vsel %vm7092_vm4, 0.0, %v12924_v9 }
 0x160   : > { %v1307_v38 = vsel %vm7076_vm0, -0.18477343, %v12885_v57  ;;  %v1309_v33 = vsel %vm7092_vm4, -0.18477343, %v12885_v57  ;;  %v1435_v28 = vsel %vm7076_vm0, 0.1609302, %v12866_v11  ;;  %v1691_v46 = vsel %vm7080_vm1, %v1243_v30, %v1179_v35 }
 0x161   : > { %v1437_v60 = vsel %vm7092_vm4, 0.1609302, %v12866_v11  ;;  %v1499_v50 = vsel %vm7076_vm0, 0.33791524, %v12867_v24  ;;  %v1501_v15 = vsel %vm7092_vm4, 0.33791524, %v12867_v24  ;;  %v1693_v41 = vsel %vm7096_vm5, %v1245_v32, %v1181_v55 }
 0x162   : > { %v1563_v25 = vsel %vm7076_vm0, 0.562617, %v12868_v53  ;;  %v1565_v20 = vsel %vm7092_vm4, 0.562617, %v12868_v53  ;;  %v1627_v59 = vsel %vm7076_vm0, 1.0, %v12964_v40  ;;  %v1629_v35 = vsel %vm7092_vm4, 1.0, %v12964_v40 }
 0x163   : > { %v1755_v30 = vsel %vm7080_vm1, %v1371_v6, %v1307_v38  ;;  %v1757_v10 = vsel %vm7096_vm5, %v1373_v14, %v1309_v33  ;;  %v1819_v2 = vsel %vm7080_vm1, %v1499_v50, %v1435_v28  ;;  %v1821_v55 = vsel %vm7096_vm5, %v1501_v15, %v1437_v60 }
 0x164   : > { %v1883_v26 = vsel %vm7080_vm1, %v1627_v59, %v1563_v25  ;;  %v1885_v32 = vsel %vm7096_vm5, %v1629_v35, %v1565_v20  ;;  %v1947_v37 = vsel %vm7084_vm2, %v1755_v30, %v1691_v46  ;;  %v1949_v38 = vsel %vm7106_vm6, %v1757_v10, %v1693_v41 }
 0x165   : > { %v2011_v33 = vsel %vm7084_vm2, %v1883_v26, %v1819_v2  ;;  %v2013_v6 = vsel %vm7106_vm6, %v1885_v32, %v1821_v55  ;;  %v699_v48 = vand.u32 1, %v635_v0  ;;  %v701_v28 = vand.u32 1, %v7074_v56 }
 0x166   : > { %v2075_v14 = vsel %vm7088_vm3, %v2011_v33, %v1947_v37  ;;  %v2077_v44 = vsel %vm7110_vm7, %v2013_v6, %v1949_v38  ;;  %v827_v50 = vand.u32 2, %v635_v0  ;;  %v829_v46 = vand.u32 2, %v7074_v56 }
 0x167   : > { %v2133_v60 = vpack.c.bf16 %v2077_v44, %v2075_v14  ;;  %v955_v10 = vand.u32 4, %v635_v0  ;;  %vm7186_vm8 = vcmp.ne.s32.totalorder %v699_v48, 0  ;;  %vm7190_vm9 = vcmp.ne.s32.totalorder %v701_v28, 0 }
 0x168   : > { %v957_v13 = vand.u32 4, %v7074_v56  ;;  %v1083_v39 = vand.u32 8, %v635_v0  ;;  %vm7195_vm10 = vcmp.ne.s32.totalorder %v827_v50, 0  ;;  %vm7199_vm11 = vcmp.ne.s32.totalorder %v829_v46, 0 }
 0x169   : > { %3772 = vmatpush.bf16.msra.mxu2 %v2133_v60  ;;  %vm7203_vm12 = vcmp.ne.s32.totalorder %v955_v10, 0  ;;  %v1085_v20 = vand.u32 8, %v7074_v56  ;;  %v1211_v59 = vsel %vm7186_vm8, -0.6961928, %v12937_v36  ;;  %v1213_v35 = vsel %vm7190_vm9, -0.6961928, %v12937_v36 }
 0x16a   : > { %vm7208_vm13 = vcmp.ne.s32.totalorder %v957_v13, 0  ;;  %vm7212_vm14 = vcmp.ne.s32.totalorder %v1083_v39, 0  ;;  %v1275_v56 = vsel %vm7186_vm8, -0.3949175, %v12923_v52  ;;  %v1277_v55 = vsel %vm7190_vm9, -0.3949175, %v12923_v52 }
 0x16b   : > { %vm7222_vm15 = vcmp.ne.s32.totalorder %v1085_v20, 0  ;;  %v1403_v26 = vsel %vm7186_vm8, 0.0, %v12924_v9  ;;  %v1339_v32 = vsel %vm7186_vm8, -0.18477343, %v12885_v57  ;;  %v1341_v37 = vsel %vm7190_vm9, -0.18477343, %v12885_v57 }
 0x16c   : > { %v1405_v38 = vsel %vm7190_vm9, 0.0, %v12924_v9  ;;  %v1659_v33 = vsel %vm7186_vm8, 1.0, %v12964_v40  ;;  %v1467_v6 = vsel %vm7186_vm8, 0.1609302, %v12866_v11  ;;  %v1469_v14 = vsel %vm7190_vm9, 0.1609302, %v12866_v11 }
 0x16d   : > { %v1531_v44 = vsel %vm7186_vm8, 0.33791524, %v12867_v24  ;;  %v1723_v48 = vsel %vm7195_vm10, %v1275_v56, %v1211_v59  ;;  %v1533_v28 = vsel %vm7190_vm9, 0.33791524, %v12867_v24  ;;  %v1595_v60 = vsel %vm7186_vm8, 0.562617, %v12868_v53 }
 0x16e   : > { %v1597_v50 = vsel %vm7190_vm9, 0.562617, %v12868_v53  ;;  %v1725_v46 = vsel %vm7199_vm11, %v1277_v55, %v1213_v35  ;;  %v1661_v10 = vsel %vm7190_vm9, 1.0, %v12964_v40  ;;  %v1787_v13 = vsel %vm7195_vm10, %v1403_v26, %v1339_v32 }
 0x16f   : > { %v1789_v39 = vsel %vm7199_vm11, %v1405_v38, %v1341_v37  ;;  %v1851_v29 = vsel %vm7195_vm10, %v1531_v44, %v1467_v6  ;;  %v1853_v20 = vsel %vm7199_vm11, %v1533_v28, %v1469_v14  ;;  %v1915_v59 = vsel %vm7195_vm10, %v1659_v33, %v1595_v60 }
 0x170   : > { %v1917_v35 = vsel %vm7199_vm11, %v1661_v10, %v1597_v50  ;;  %v1979_v2 = vsel %vm7203_vm12, %v1787_v13, %v1723_v48  ;;  %v1981_v56 = vsel %vm7208_vm13, %v1789_v39, %v1725_v46  ;;  %v2043_v55 = vsel %vm7203_vm12, %v1915_v59, %v1851_v29  ;;  %v7417_v29 = vld [vmem:[%s4819_s26] sm:$0xff] }
 0x171   : > { %v2045_v26 = vsel %vm7208_vm13, %v1917_v35, %v1853_v20  ;;  %v13038_v32 = vunpack.c.1.s8 %v6441_v31  ;;  %v2107_v63 = vsel %vm7212_vm14, %v2043_v55, %v1979_v2  ;;  %v598_v38 = vand.u32 15, %v7069_v61 }
 0x172   : > { %v2109_v15 = vsel %vm7222_vm15, %v2045_v26, %v1981_v56  ;;  %v502_v33 = vunpack.c.0.s8 %v6676_v17  ;;  %v504_v41 = vunpack.c.1.s8 %v6676_v17  ;;  %v471_v14 = vunpack.c.0.s8 %v6913_v43 }
 0x173   : > { %v7294_v37 = vand.u32 255, %v13038_v32  ;;  %v2149_v6 = vpack.c.bf16 %v2109_v15, %v2107_v63  ;;  %v662_v31 = vand.u32 1, %v598_v38  ;;  %v790_v44 = vand.u32 2, %v598_v38 }
 0x174   : > { %v918_v48 = vand.u32 4, %v598_v38  ;;  %v1046_v28 = vand.u32 8, %v598_v38  ;;  %v473_v55 = vunpack.c.1.s8 %v6913_v43  ;;  %v7412_v10 = vand.u32 255, %v502_v33 }
 0x175   : > { %13039 = vst [vmem:[#allocation41_spill] sm:$0xff] %v7294_v37  ;;  %v600_v25 = vand.u32 15, %v7294_v37  ;;  %3786 = vmatpush.bf16.msra.mxu3 %v2149_v6  ;;  %vm7305_vm0 = vcmp.ne.s32.totalorder %v662_v31, 0  ;;  %vm7309_vm1 = vcmp.ne.s32.totalorder %v790_v44, 0  ;;  %v503_v17 = vunpack.c.0.s8 %v6924_v45 }
 0x176   : > { %vm7313_vm2 = vcmp.ne.s32.totalorder %v918_v48, 0  ;;  %vm7317_vm3 = vcmp.ne.s32.totalorder %v1046_v28, 0  ;;  %v1174_v35 = vsel %vm7305_vm0, -0.6961928, %v12937_v36  ;;  %v1238_v56 = vsel %vm7305_vm0, -0.3949175, %v12923_v52 }
 0x177   : > { %v664_v0 = vand.u32 1, %v600_v25  ;;  %v792_v60 = vand.u32 2, %v600_v25  ;;  %v920_v30 = vand.u32 4, %v600_v25  ;;  %v1048_v50 = vand.u32 8, %v600_v25  ;;  %13056 = vst [vmem:[#allocation42_spill] sm:$0xff] %v7412_v10 }
 0x178   : > { %v1302_v32 = vsel %vm7305_vm0, -0.18477343, %v12885_v57  ;;  %v1686_v15 = vsel %vm7309_vm1, %v1238_v56, %v1174_v35  ;;  %v1366_v38 = vsel %vm7305_vm0, 0.0, %v12924_v9  ;;  %v1430_v6 = vsel %vm7305_vm0, 0.1609302, %v12866_v11 }
 0x179   : > { %vm7321_vm4 = vcmp.ne.s32.totalorder %v664_v0, 0  ;;  %vm7325_vm5 = vcmp.ne.s32.totalorder %v792_v60, 0  ;;  %vm7329_vm6 = vcmp.ne.s32.totalorder %v920_v30, 0  ;;  %vm7333_vm7 = vcmp.ne.s32.totalorder %v1048_v50, 0 }
 0x17a   : > { %v1176_v2 = vsel %vm7321_vm4, -0.6961928, %v12937_v36  ;;  %v1240_v26 = vsel %vm7321_vm4, -0.3949175, %v12923_v52  ;;  %v1304_v63 = vsel %vm7321_vm4, -0.18477343, %v12885_v57  ;;  %v1750_v50 = vsel %vm7309_vm1, %v1366_v38, %v1302_v32 }
 0x17b   : > { %v1368_v43 = vsel %vm7321_vm4, 0.0, %v12924_v9  ;;  %v1432_v25 = vsel %vm7321_vm4, 0.1609302, %v12866_v11  ;;  %v1494_v31 = vsel %vm7305_vm0, 0.33791524, %v12867_v24  ;;  %v1688_v28 = vsel %vm7325_vm5, %v1240_v26, %v1176_v2 }
 0x17c   : > { %v1496_v44 = vsel %vm7321_vm4, 0.33791524, %v12867_v24  ;;  %v1558_v48 = vsel %vm7305_vm0, 0.562617, %v12868_v53  ;;  %v1560_v0 = vsel %vm7321_vm4, 0.562617, %v12868_v53  ;;  %v1752_v35 = vsel %vm7325_vm5, %v1368_v43, %v1304_v63 }
 0x17d   : > { %v1622_v60 = vsel %vm7305_vm0, 1.0, %v12964_v40  ;;  %v1624_v30 = vsel %vm7321_vm4, 1.0, %v12964_v40  ;;  %v1814_v2 = vsel %vm7309_vm1, %v1494_v31, %v1430_v6  ;;  %v1816_v56 = vsel %vm7325_vm5, %v1496_v44, %v1432_v25 }
 0x17e   : > { %v1878_v46 = vsel %vm7309_vm1, %v1622_v60, %v1558_v48  ;;  %v1880_v26 = vsel %vm7325_vm5, %v1624_v30, %v1560_v0  ;;  %v1942_v39 = vsel %vm7313_vm2, %v1750_v50, %v1686_v15  ;;  %v1944_v32 = vsel %vm7329_vm6, %v1752_v35, %v1688_v28 }
 0x17f   : > { %v2006_v63 = vsel %vm7313_vm2, %v1878_v46, %v1814_v2  ;;  %v2008_v38 = vsel %vm7329_vm6, %v1880_v26, %v1816_v56  ;;  %v7414_v6 = vand.u32 255, %v504_v41  ;;  %v7421_v25 = vand.u32 255, %v471_v14 }
 0x180   : > { %v2070_v43 = vsel %vm7317_vm3, %v2006_v63, %v1942_v39  ;;  %v2072_v15 = vsel %vm7333_vm7, %v2008_v38, %v1944_v32  ;;  %v7423_v31 = vand.u32 255, %v473_v55  ;;  %v630_v44 = vand.u32 15, %v7412_v10 }
 0x181   : > { %13057 = vst [vmem:[#allocation43_spill] sm:$0xff] %v7414_v6  ;;  %v2130_v20 = vpack.c.bf16 %v2072_v15, %v2070_v43  ;;  %v632_v13 = vand.u32 15, %v7414_v6  ;;  %v7430_v41 = vand.u32 15, %v7421_v25  ;;  %v7435_v59 = vand.u32 255, %v503_v17 }
 0x182   : > { %13058 = vst [vmem:[#allocation44_spill] sm:$0xff] %v7421_v25  ;;  %v7433_v48 = vand.u32 15, %v7423_v31  ;;  %v694_v55 = vand.u32 1, %v630_v44  ;;  %v822_v0 = vand.u32 2, %v630_v44  ;;  %v950_v30 = vand.u32 4, %v630_v44 }
 0x183   : > { %13059 = vst [vmem:[#allocation45_spill] sm:$0xff] %v7423_v31  ;;  %3745 = vmatpush.bf16.msra.mxu0 %v2130_v20  ;;  %v696_v28 = vand.u32 1, %v632_v13  ;;  %v824_v60 = vand.u32 2, %v632_v13  ;;  %v952_v50 = vand.u32 4, %v632_v13  ;;  %v1078_v35 = vand.u32 8, %v630_v44 }
 0x184   : > { %13060 = vst [vmem:[#allocation46_spill] sm:$0xff] %v7435_v59  ;;  %v1080_v2 = vand.u32 8, %v632_v13  ;;  %vm7438_vm8 = vcmp.ne.s32.totalorder %v694_v55, 0  ;;  %vm7446_vm10 = vcmp.ne.s32.totalorder %v822_v0, 0  ;;  %vm7454_vm12 = vcmp.ne.s32.totalorder %v950_v30, 0 }
 0x185   : > { %vm7442_vm9 = vcmp.ne.s32.totalorder %v696_v28, 0  ;;  %vm7450_vm11 = vcmp.ne.s32.totalorder %v824_v60, 0  ;;  %vm7458_vm13 = vcmp.ne.s32.totalorder %v952_v50, 0  ;;  %vm7462_vm14 = vcmp.ne.s32.totalorder %v1078_v35, 0 }
 0x186   : > { %vm7466_vm15 = vcmp.ne.s32.totalorder %v1080_v2, 0  ;;  %v1206_v15 = vsel %vm7438_vm8, -0.6961928, %v12937_v36  ;;  %v1208_v17 = vsel %vm7442_vm9, -0.6961928, %v12937_v36  ;;  %v1398_v60 = vsel %vm7438_vm8, 0.0, %v12924_v9 }
 0x187   : > { %v1270_v20 = vsel %vm7438_vm8, -0.3949175, %v12923_v52  ;;  %v1272_v13 = vsel %vm7442_vm9, -0.3949175, %v12923_v52  ;;  %v1334_v55 = vsel %vm7438_vm8, -0.18477343, %v12885_v57 }
 0x188   : > { %v1336_v28 = vsel %vm7442_vm9, -0.18477343, %v12885_v57  ;;  %v1718_v0 = vsel %vm7446_vm10, %v1270_v20, %v1206_v15  ;;  %v1400_v30 = vsel %vm7442_vm9, 0.0, %v12924_v9  ;;  %v1462_v50 = vsel %vm7438_vm8, 0.1609302, %v12866_v11 }
 0x189   : > { %v1464_v35 = vsel %vm7442_vm9, 0.1609302, %v12866_v11  ;;  %v1526_v2 = vsel %vm7438_vm8, 0.33791524, %v12867_v24  ;;  %v1528_v15 = vsel %vm7442_vm9, 0.33791524, %v12867_v24  ;;  %v1720_v44 = vsel %vm7450_vm11, %v1272_v13, %v1208_v17 }
 0x18a   : > { %v1590_v20 = vsel %vm7438_vm8, 0.562617, %v12868_v53  ;;  %v1592_v14 = vsel %vm7442_vm9, 0.562617, %v12868_v53  ;;  %v1654_v33 = vsel %vm7438_vm8, 1.0, %v12964_v40  ;;  %v1656_v31 = vsel %vm7442_vm9, 1.0, %v12964_v40 }
 0x18b   : > { %v1782_v25 = vsel %vm7446_vm10, %v1398_v60, %v1334_v55  ;;  %v1784_v6 = vsel %vm7450_vm11, %v1400_v30, %v1336_v28  ;;  %v1846_v17 = vsel %vm7446_vm10, %v1526_v2, %v1462_v50  ;;  %v1848_v13 = vsel %vm7450_vm11, %v1528_v15, %v1464_v35 }
 0x18c   : > { %v1910_v56 = vsel %vm7446_vm10, %v1654_v33, %v1590_v20  ;;  %v1912_v10 = vsel %vm7450_vm11, %v1656_v31, %v1592_v14  ;;  %v1974_v46 = vsel %vm7454_vm12, %v1782_v25, %v1718_v0  ;;  %v1976_v55 = vsel %vm7458_vm13, %v1784_v6, %v1720_v44 }
 0x18d   : > { %v2038_v28 = vsel %vm7454_vm12, %v1910_v56, %v1846_v17  ;;  %v2040_v60 = vsel %vm7458_vm13, %v1912_v10, %v1848_v13  ;;  %v663_v33 = vand.u32 1, %v7430_v41  ;;  %v665_v26 = vand.u32 1, %v7433_v48  ;;  %v7652_v10 = vld [vmem:[%s4819_s26 + $0x40] sm:$0xff] }
 0x18e   : > { %v2102_v30 = vsel %vm7462_vm14, %v2038_v28, %v1974_v46  ;;  %v2104_v31 = vsel %vm7466_vm15, %v2040_v60, %v1976_v55  ;;  %v791_v25 = vand.u32 2, %v7430_v41  ;;  %v793_v6 = vand.u32 2, %v7433_v48 }
 0x18f   : > { %v919_v14 = vand.u32 4, %v7430_v41  ;;  %v2146_v39 = vpack.c.bf16 %v2104_v31, %v2102_v30  ;;  %vm7552_vm0 = vcmp.ne.s32.totalorder %v663_v33, 0  ;;  %vm7556_vm1 = vcmp.ne.s32.totalorder %v665_v26, 0 }
 0x190   : > { %v921_v63 = vand.u32 4, %v7433_v48  ;;  %vm7561_vm2 = vcmp.ne.s32.totalorder %v791_v25, 0  ;;  %vm7565_vm3 = vcmp.ne.s32.totalorder %v793_v6, 0  ;;  %v1047_v0 = vand.u32 8, %v7430_v41 }
 0x191   : > { %vm7569_vm4 = vcmp.ne.s32.totalorder %v919_v14, 0  ;;  %3759 = vmatpush.bf16.msra.mxu1 %v2146_v39  ;;  %v1049_v35 = vand.u32 8, %v7433_v48  ;;  %v1175_v2 = vsel %vm7552_vm0, -0.6961928, %v12937_v36  ;;  %v1177_v15 = vsel %vm7556_vm1, -0.6961928, %v12937_v36 }
 0x192   : > { %vm7574_vm5 = vcmp.ne.s32.totalorder %v921_v63, 0  ;;  %vm7585_vm6 = vcmp.ne.s32.totalorder %v1047_v0, 0  ;;  %v1239_v41 = vsel %vm7552_vm0, -0.3949175, %v12923_v52  ;;  %v1241_v48 = vsel %vm7556_vm1, -0.3949175, %v12923_v52 }
 0x193   : > { %v1367_v17 = vsel %vm7552_vm0, 0.0, %v12924_v9  ;;  %vm7598_vm7 = vcmp.ne.s32.totalorder %v1049_v35, 0  ;;  %v1303_v56 = vsel %vm7552_vm0, -0.18477343, %v12885_v57  ;;  %v1305_v46 = vsel %vm7556_vm1, -0.18477343, %v12885_v57 }
 0x194   : > { %v1369_v55 = vsel %vm7556_vm1, 0.0, %v12924_v9  ;;  %v1431_v28 = vsel %vm7552_vm0, 0.1609302, %v12866_v11  ;;  %v1433_v60 = vsel %vm7556_vm1, 0.1609302, %v12866_v11  ;;  %v1687_v33 = vsel %vm7561_vm2, %v1239_v41, %v1175_v2 }
 0x195   : > { %v1495_v30 = vsel %vm7552_vm0, 0.33791524, %v12867_v24  ;;  %v1497_v26 = vsel %vm7556_vm1, 0.33791524, %v12867_v24  ;;  %v1559_v31 = vsel %vm7552_vm0, 0.562617, %v12868_v53  ;;  %v1689_v6 = vsel %vm7565_vm3, %v1241_v48, %v1177_v15 }
 0x196   : > { %v1561_v25 = vsel %vm7556_vm1, 0.562617, %v12868_v53  ;;  %v1623_v14 = vsel %vm7552_vm0, 1.0, %v12964_v40  ;;  %v1625_v39 = vsel %vm7556_vm1, 1.0, %v12964_v40  ;;  %v1751_v63 = vsel %vm7561_vm2, %v1367_v17, %v1303_v56 }
 0x197   : > { %v1753_v0 = vsel %vm7565_vm3, %v1369_v55, %v1305_v46  ;;  %v1815_v35 = vsel %vm7561_vm2, %v1495_v30, %v1431_v28  ;;  %v1817_v2 = vsel %vm7565_vm3, %v1497_v26, %v1433_v60  ;;  %v1879_v32 = vsel %vm7561_vm2, %v1623_v14, %v1559_v31 }
 0x198   : > { %v1881_v15 = vsel %vm7565_vm3, %v1625_v39, %v1561_v25  ;;  %v1943_v41 = vsel %vm7569_vm4, %v1751_v63, %v1687_v33  ;;  %v1945_v48 = vsel %vm7574_vm5, %v1753_v0, %v1689_v6  ;;  %v2007_v17 = vsel %vm7569_vm4, %v1879_v32, %v1815_v35 }
 0x199   : > { %v2009_v56 = vsel %vm7574_vm5, %v1881_v15, %v1817_v2  ;;  %v2071_v38 = vsel %vm7585_vm6, %v2007_v17, %v1943_v41  ;;  %v13093_v46 = vunpack.c.1.s8 %v6924_v45  ;;  %v631_v28 = vand.u32 15, %v7435_v59 }
 0x19a   : > { %v2073_v43 = vsel %vm7598_vm7, %v2009_v56, %v1945_v48  ;;  %v13095_v30 = vunpack.c.2.s8 %v7417_v29  ;;  %v13097_v50 = vunpack.c.3.s8 %v7417_v29 }
 0x19b   : > { %v7668_v55 = vand.u32 255, %v13093_v46  ;;  %v2131_v60 = vpack.c.bf16 %v2073_v43, %v2071_v38  ;;  %v695_v26 = vand.u32 1, %v631_v28  ;;  %v823_v31 = vand.u32 2, %v631_v28 }
 0x19c   : > { %v7673_v44 = vand.u32 255, %v13095_v30  ;;  %v7677_v33 = vand.u32 255, %v13097_v50  ;;  %v951_v45 = vand.u32 4, %v631_v28  ;;  %v1079_v25 = vand.u32 8, %v631_v28 }
 0x19d   : > { %13094 = vst [vmem:[#allocation47_spill] sm:$0xff] %v7668_v55  ;;  %v633_v13 = vand.u32 15, %v7668_v55  ;;  %3773 = vmatpush.bf16.msra.mxu2 %v2131_v60  ;;  %vm7686_vm8 = vcmp.ne.s32.totalorder %v695_v26, 0  ;;  %vm7690_vm9 = vcmp.ne.s32.totalorder %v823_v31, 0  ;;  %v13131_v46 = vunpack.c.2.s8 %v7652_v10 }
 0x19e   : > { %13096 = vst [vmem:[#allocation48_spill] sm:$0xff] %v7673_v44  ;;  %v594_v6 = vand.u32 15, %v7673_v44  ;;  %v7683_v14 = vand.u32 15, %v7677_v33  ;;  %vm7694_vm10 = vcmp.ne.s32.totalorder %v951_v45, 0  ;;  %vm7698_vm11 = vcmp.ne.s32.totalorder %v1079_v25, 0 }
 0x19f   : > { %13098 = vst [vmem:[#allocation49_spill] sm:$0xff] %v7677_v33  ;;  %v697_v63 = vand.u32 1, %v633_v13  ;;  %v825_v35 = vand.u32 2, %v633_v13  ;;  %v953_v32 = vand.u32 4, %v633_v13  ;;  %v1081_v41 = vand.u32 8, %v633_v13 }
 0x1a0   : > { %v1207_v38 = vsel %vm7686_vm8, -0.6961928, %v12937_v36  ;;  %v1271_v43 = vsel %vm7686_vm8, -0.3949175, %v12923_v52  ;;  %v1335_v50 = vsel %vm7686_vm8, -0.18477343, %v12885_v57 }
 0x1a1   : > { %vm7702_vm12 = vcmp.ne.s32.totalorder %v697_v63, 0  ;;  %vm7706_vm13 = vcmp.ne.s32.totalorder %v825_v35, 0  ;;  %vm7716_vm14 = vcmp.ne.s32.totalorder %v953_v32, 0  ;;  %vm7720_vm15 = vcmp.ne.s32.totalorder %v1081_v41, 0 }
 0x1a2   : > { %v1209_v60 = vsel %vm7702_vm12, -0.6961928, %v12937_v36  ;;  %v1273_v30 = vsel %vm7702_vm12, -0.3949175, %v12923_v52  ;;  %v1337_v13 = vsel %vm7702_vm12, -0.18477343, %v12885_v57  ;;  %v1719_v35 = vsel %vm7690_vm9, %v1271_v43, %v1207_v38 }
 0x1a3   : > { %v1399_v26 = vsel %vm7686_vm8, 0.0, %v12924_v9  ;;  %v1401_v31 = vsel %vm7702_vm12, 0.0, %v12924_v9  ;;  %v1463_v45 = vsel %vm7686_vm8, 0.1609302, %v12866_v11  ;;  %v1465_v25 = vsel %vm7702_vm12, 0.1609302, %v12866_v11 }
 0x1a4   : > { %v1527_v63 = vsel %vm7686_vm8, 0.33791524, %v12867_v24  ;;  %v1529_v32 = vsel %vm7702_vm12, 0.33791524, %v12867_v24  ;;  %v1591_v41 = vsel %vm7686_vm8, 0.562617, %v12868_v53  ;;  %v1721_v20 = vsel %vm7706_vm13, %v1273_v30, %v1209_v60 }
 0x1a5   : > { %v1593_v39 = vsel %vm7702_vm12, 0.562617, %v12868_v53  ;;  %v1655_v33 = vsel %vm7686_vm8, 1.0, %v12964_v40  ;;  %v1657_v38 = vsel %vm7702_vm12, 1.0, %v12964_v40  ;;  %v1783_v43 = vsel %vm7690_vm9, %v1399_v26, %v1335_v50 }
 0x1a6   : > { %v1785_v44 = vsel %vm7706_vm13, %v1401_v31, %v1337_v13  ;;  %v1847_v55 = vsel %vm7690_vm9, %v1527_v63, %v1463_v45  ;;  %v1849_v60 = vsel %vm7706_vm13, %v1529_v32, %v1465_v25  ;;  %v1911_v0 = vsel %vm7690_vm9, %v1655_v33, %v1591_v41 }
 0x1a7   : > { %v1913_v30 = vsel %vm7706_vm13, %v1657_v38, %v1593_v39  ;;  %v1975_v17 = vsel %vm7694_vm10, %v1783_v43, %v1719_v35  ;;  %v1977_v50 = vsel %vm7716_vm14, %v1785_v44, %v1721_v20  ;;  %v2039_v13 = vsel %vm7694_vm10, %v1911_v0, %v1847_v55 }
 0x1a8   : > { %v2041_v26 = vsel %vm7716_vm14, %v1913_v30, %v1849_v60  ;;  %v2103_v31 = vsel %vm7698_vm11, %v2039_v13, %v1975_v17  ;;  %v658_v2 = vand.u32 1, %v594_v6  ;;  %v660_v39 = vand.u32 1, %v7683_v14 }
 0x1a9   : > { %v2105_v33 = vsel %vm7720_vm15, %v2041_v26, %v1977_v50  ;;  %v786_v45 = vand.u32 2, %v594_v6  ;;  %v788_v25 = vand.u32 2, %v7683_v14  ;;  %v914_v44 = vand.u32 4, %v594_v6 }
 0x1aa   : > { %v2147_v56 = vpack.c.bf16 %v2105_v33, %v2103_v31  ;;  %vm7796_vm0 = vcmp.ne.s32.totalorder %v658_v2, 0  ;;  %vm7800_vm1 = vcmp.ne.s32.totalorder %v660_v39, 0  ;;  %v916_v15 = vand.u32 4, %v7683_v14 }
 0x1ab   : > { %v1042_v48 = vand.u32 8, %v594_v6  ;;  %vm7805_vm2 = vcmp.ne.s32.totalorder %v786_v45, 0  ;;  %vm7809_vm3 = vcmp.ne.s32.totalorder %v788_v25, 0  ;;  %vm7813_vm4 = vcmp.ne.s32.totalorder %v914_v44, 0 }
 0x1ac   : > { %3787 = vmatpush.bf16.msra.mxu3 %v2147_v56  ;;  %v1044_v35 = vand.u32 8, %v7683_v14  ;;  %vm7818_vm5 = vcmp.ne.s32.totalorder %v916_v15, 0  ;;  %v1170_v41 = vsel %vm7796_vm0, -0.6961928, %v12937_v36  ;;  %v1172_v38 = vsel %vm7800_vm1, -0.6961928, %v12937_v36 }
 0x1ad   : > { %vm7822_vm6 = vcmp.ne.s32.totalorder %v1042_v48, 0  ;;  %v1234_v14 = vsel %vm7796_vm0, -0.3949175, %v12923_v52  ;;  %v1236_v60 = vsel %vm7800_vm1, -0.3949175, %v12923_v52  ;;  %v1362_v0 = vsel %vm7796_vm0, 0.0, %v12924_v9 }
 0x1ae   : > { %vm7832_vm7 = vcmp.ne.s32.totalorder %v1044_v35, 0  ;;  %v1298_v30 = vsel %vm7796_vm0, -0.18477343, %v12885_v57  ;;  %v1300_v17 = vsel %vm7800_vm1, -0.18477343, %v12885_v57  ;;  %v1364_v50 = vsel %vm7800_vm1, 0.0, %v12924_v9 }
 0x1af   : > { %v1618_v13 = vsel %vm7796_vm0, 1.0, %v12964_v40  ;;  %v1426_v26 = vsel %vm7796_vm0, 0.1609302, %v12866_v11  ;;  %v1428_v31 = vsel %vm7800_vm1, 0.1609302, %v12866_v11  ;;  %v1682_v2 = vsel %vm7805_vm2, %v1234_v14, %v1170_v41  ;;  %v7889_v35 = vld [vmem:[%s4819_s26 + $0x8] sm:$0xff] }
 0x1b0   : > { %v1490_v33 = vsel %vm7796_vm0, 0.33791524, %v12867_v24  ;;  %v1492_v39 = vsel %vm7800_vm1, 0.33791524, %v12867_v24  ;;  %v1554_v56 = vsel %vm7796_vm0, 0.562617, %v12868_v53  ;;  %v1684_v25 = vsel %vm7809_vm3, %v1236_v60, %v1172_v38 }
 0x1b1   : > { %v1556_v45 = vsel %vm7800_vm1, 0.562617, %v12868_v53  ;;  %v1620_v44 = vsel %vm7800_vm1, 1.0, %v12964_v40  ;;  %v1746_v15 = vsel %vm7805_vm2, %v1362_v0, %v1298_v30  ;;  %v1748_v48 = vsel %vm7809_vm3, %v1364_v50, %v1300_v17  ;;  %v7900_v60 = vld [vmem:[%s4819_s26 + $0x48] sm:$0xff] }
 0x1b2   : > { %v1810_v20 = vsel %vm7805_vm2, %v1490_v33, %v1426_v26  ;;  %v1812_v41 = vsel %vm7809_vm3, %v1492_v39, %v1428_v31  ;;  %v1874_v38 = vsel %vm7805_vm2, %v1618_v13, %v1554_v56  ;;  %v1876_v55 = vsel %vm7809_vm3, %v1620_v44, %v1556_v45 }
 0x1b3   : > { %v1938_v14 = vsel %vm7813_vm4, %v1746_v15, %v1682_v2  ;;  %v1940_v0 = vsel %vm7818_vm5, %v1748_v48, %v1684_v25  ;;  %v2002_v30 = vsel %vm7813_vm4, %v1874_v38, %v1810_v20  ;;  %v2004_v17 = vsel %vm7818_vm5, %v1876_v55, %v1812_v41 }
 0x1b4   : > { %v7910_v50 = vand.u32 255, %v13131_v46  ;;  %v2066_v28 = vsel %vm7822_vm6, %v2002_v30, %v1938_v14  ;;  %v2068_v13 = vsel %vm7832_vm7, %v2004_v17, %v1940_v0  ;;  %v13133_v26 = vunpack.c.3.s8 %v7652_v10 }
 0x1b5   : > { %v467_v63 = vunpack.c.2.s8 %v7889_v35  ;;  %v2128_v33 = vpack.c.bf16 %v2068_v13, %v2066_v28  ;;  %v469_v2 = vunpack.c.3.s8 %v7889_v35  ;;  %v499_v39 = vunpack.c.2.s8 %v7900_v60 }
 0x1b6   : > { %13132 = vst [vmem:[#allocation50_spill] sm:$0xff] %v7910_v50  ;;  %v7918_v31 = vand.u32 255, %v13133_v26  ;;  %v626_v32 = vand.u32 15, %v7910_v50  ;;  %v501_v43 = vunpack.c.3.s8 %v7900_v60  ;;  %v462_v45 = vunpack.c.0.s8 %v7417_v29 }
 0x1b7   : > { %v7925_v6 = vand.u32 255, %v467_v63  ;;  %3746 = vmatpush.bf16.msra.mxu0 %v2128_v33  ;;  %v8036_v0 = vand.u32 255, %v469_v2 }
 0x1b8   : > { %13134 = vst [vmem:[#allocation51_spill] sm:$0xff] %v7918_v31  ;;  %v628_v56 = vand.u32 15, %v7918_v31  ;;  %v690_v25 = vand.u32 1, %v626_v32  ;;  %v818_v44 = vand.u32 2, %v626_v32  ;;  %v946_v15 = vand.u32 4, %v626_v32 }
 0x1b9   : > { %v1074_v48 = vand.u32 8, %v626_v32  ;;  %v597_v30 = vand.u32 15, %v8036_v0 }
 0x1ba   : > { %v692_v20 = vand.u32 1, %v628_v56  ;;  %v820_v41 = vand.u32 2, %v628_v56  ;;  %v948_v38 = vand.u32 4, %v628_v56  ;;  %v1076_v55 = vand.u32 8, %v628_v56 }
 0x1bb   : > { %vm7929_vm8 = vcmp.ne.s32.totalorder %v690_v25, 0  ;;  %vm7933_vm9 = vcmp.ne.s32.totalorder %v818_v44, 0  ;;  %vm7937_vm10 = vcmp.ne.s32.totalorder %v946_v15, 0  ;;  %vm7941_vm11 = vcmp.ne.s32.totalorder %v1074_v48, 0 }
 0x1bc   : > { %vm7945_vm12 = vcmp.ne.s32.totalorder %v692_v20, 0  ;;  %vm7949_vm13 = vcmp.ne.s32.totalorder %v820_v41, 0  ;;  %vm7953_vm14 = vcmp.ne.s32.totalorder %v948_v38, 0  ;;  %vm7957_vm15 = vcmp.ne.s32.totalorder %v1076_v55, 0 }
 0x1bd   : > { %v1202_v63 = vsel %vm7929_vm8, -0.6961928, %v12937_v36  ;;  %v1204_v33 = vsel %vm7945_vm12, -0.6961928, %v12937_v36  ;;  %v1266_v32 = vsel %vm7929_vm8, -0.3949175, %v12923_v52 }
 0x1be   : > { %v1268_v25 = vsel %vm7945_vm12, -0.3949175, %v12923_v52  ;;  %v1330_v44 = vsel %vm7929_vm8, -0.18477343, %v12885_v57  ;;  %v1332_v15 = vsel %vm7945_vm12, -0.18477343, %v12885_v57  ;;  %v1714_v48 = vsel %vm7933_vm9, %v1266_v32, %v1202_v63 }
 0x1bf   : > { %v1394_v20 = vsel %vm7929_vm8, 0.0, %v12924_v9  ;;  %v1396_v41 = vsel %vm7945_vm12, 0.0, %v12924_v9  ;;  %v1458_v38 = vsel %vm7929_vm8, 0.1609302, %v12866_v11  ;;  %v1460_v55 = vsel %vm7945_vm12, 0.1609302, %v12866_v11 }
 0x1c0   : > { %v1522_v63 = vsel %vm7929_vm8, 0.33791524, %v12867_v24  ;;  %v1524_v32 = vsel %vm7945_vm12, 0.33791524, %v12867_v24  ;;  %v1586_v56 = vsel %vm7929_vm8, 0.562617, %v12868_v53  ;;  %v1716_v31 = vsel %vm7949_vm13, %v1268_v25, %v1204_v33 }
 0x1c1   : > { %v1588_v50 = vsel %vm7945_vm12, 0.562617, %v12868_v53  ;;  %v1650_v59 = vsel %vm7929_vm8, 1.0, %v12964_v40  ;;  %v1652_v37 = vsel %vm7945_vm12, 1.0, %v12964_v40  ;;  %v1778_v61 = vsel %vm7933_vm9, %v1394_v20, %v1330_v44 }
 0x1c2   : > { %v1780_v27 = vsel %vm7949_vm13, %v1396_v41, %v1332_v15  ;;  %v1842_v33 = vsel %vm7933_vm9, %v1522_v63, %v1458_v38  ;;  %v1844_v25 = vsel %vm7949_vm13, %v1524_v32, %v1460_v55  ;;  %v1906_v14 = vsel %vm7933_vm9, %v1650_v59, %v1586_v56 }
 0x1c3   : > { %v1908_v4 = vsel %vm7949_vm13, %v1652_v37, %v1588_v50  ;;  %v1970_v46 = vsel %vm7937_vm10, %v1778_v61, %v1714_v48  ;;  %v1972_v44 = vsel %vm7953_vm14, %v1780_v27, %v1716_v31  ;;  %v2034_v15 = vsel %vm7937_vm10, %v1906_v14, %v1842_v33 }
 0x1c4   : > { %v2036_v20 = vsel %vm7953_vm14, %v1908_v4, %v1844_v25  ;;  %v2098_v41 = vsel %vm7941_vm11, %v2034_v15, %v1970_v46  ;;  %v595_v59 = vand.u32 15, %v7925_v6  ;;  %v8041_v61 = vand.u32 255, %v499_v39 }
 0x1c5   : > { %v2100_v37 = vsel %vm7957_vm15, %v2036_v20, %v1972_v44  ;;  %v8043_v50 = vand.u32 255, %v501_v43  ;;  %v8045_v27 = vand.u32 255, %v462_v45  ;;  %v661_v26 = vand.u32 1, %v597_v30 }
 0x1c6   : > { %13151 = vst [vmem:[#allocation52_spill] sm:$0xff] %v8041_v61  ;;  %v2144_v31 = vpack.c.bf16 %v2100_v37, %v2098_v41  ;;  %v659_v4 = vand.u32 1, %v595_v59  ;;  %v787_v28 = vand.u32 2, %v595_v59  ;;  %v915_v17 = vand.u32 4, %v595_v59 }
 0x1c7   : > { %13152 = vst [vmem:[#allocation53_spill] sm:$0xff] %v8043_v50  ;;  %v1043_v13 = vand.u32 8, %v595_v59  ;;  %v627_v2 = vand.u32 15, %v8041_v61  ;;  %v8050_v56 = vand.u32 15, %v8043_v50  ;;  %v789_v43 = vand.u32 2, %v597_v30 }
 0x1c8   : > { %3760 = vmatpush.bf16.msra.mxu1 %v2144_v31  ;;  %vm8052_vm0 = vcmp.ne.s32.totalorder %v659_v4, 0  ;;  %vm8056_vm1 = vcmp.ne.s32.totalorder %v787_v28, 0  ;;  %v917_v48 = vand.u32 4, %v597_v30  ;;  %vm8060_vm2 = vcmp.ne.s32.totalorder %v915_v17, 0 }
 0x1c9   : > { %v1045_v55 = vand.u32 8, %v597_v30  ;;  %vm8064_vm3 = vcmp.ne.s32.totalorder %v1043_v13, 0  ;;  %vm8068_vm4 = vcmp.ne.s32.totalorder %v661_v26, 0  ;;  %vm8072_vm5 = vcmp.ne.s32.totalorder %v789_v43, 0 }
 0x1ca   : > { %v1171_v25 = vsel %vm8052_vm0, -0.6961928, %v12937_v36  ;;  %v1235_v14 = vsel %vm8052_vm0, -0.3949175, %v12923_v52  ;;  %vm8082_vm6 = vcmp.ne.s32.totalorder %v917_v48, 0  ;;  %v1363_v37 = vsel %vm8052_vm0, 0.0, %v12924_v9 }
 0x1cb   : > { %vm8086_vm7 = vcmp.ne.s32.totalorder %v1045_v55, 0  ;;  %v1173_v15 = vsel %vm8068_vm4, -0.6961928, %v12937_v36  ;;  %v1237_v20 = vsel %vm8068_vm4, -0.3949175, %v12923_v52  ;;  %v1365_v31 = vsel %vm8068_vm4, 0.0, %v12924_v9 }
 0x1cc   : > { %v1299_v41 = vsel %vm8052_vm0, -0.18477343, %v12885_v57  ;;  %v1301_v59 = vsel %vm8068_vm4, -0.18477343, %v12885_v57  ;;  %v1427_v30 = vsel %vm8052_vm0, 0.1609302, %v12866_v11  ;;  %v1683_v17 = vsel %vm8056_vm1, %v1235_v14, %v1171_v25 }
 0x1cd   : > { %v1429_v4 = vsel %vm8068_vm4, 0.1609302, %v12866_v11  ;;  %v1491_v28 = vsel %vm8052_vm0, 0.33791524, %v12867_v24  ;;  %v1493_v13 = vsel %vm8068_vm4, 0.33791524, %v12867_v24  ;;  %v1685_v48 = vsel %vm8072_vm5, %v1237_v20, %v1173_v15 }
 0x1ce   : > { %v1555_v26 = vsel %vm8052_vm0, 0.562617, %v12868_v53  ;;  %v1557_v43 = vsel %vm8068_vm4, 0.562617, %v12868_v53  ;;  %v1619_v55 = vsel %vm8052_vm0, 1.0, %v12964_v40  ;;  %v1621_v25 = vsel %vm8068_vm4, 1.0, %v12964_v40 }
 0x1cf   : > { %v1747_v14 = vsel %vm8056_vm1, %v1363_v37, %v1299_v41  ;;  %v1749_v50 = vsel %vm8072_vm5, %v1365_v31, %v1301_v59  ;;  %v1811_v61 = vsel %vm8056_vm1, %v1491_v28, %v1427_v30  ;;  %v1813_v15 = vsel %vm8072_vm5, %v1493_v13, %v1429_v4 }
 0x1d0   : > { %v1875_v39 = vsel %vm8056_vm1, %v1619_v55, %v1555_v26  ;;  %v1877_v20 = vsel %vm8072_vm5, %v1621_v25, %v1557_v43  ;;  %v1939_v32 = vsel %vm8060_vm2, %v1747_v14, %v1683_v17  ;;  %v1941_v41 = vsel %vm8082_vm6, %v1749_v50, %v1685_v48 }
 0x1d1   : > { %v2003_v59 = vsel %vm8060_vm2, %v1875_v39, %v1811_v61  ;;  %v2005_v37 = vsel %vm8082_vm6, %v1877_v20, %v1813_v15  ;;  %v691_v33 = vand.u32 1, %v627_v2  ;;  %v693_v30 = vand.u32 1, %v8050_v56 }
 0x1d2   : > { %v2067_v31 = vsel %vm8064_vm3, %v2003_v59, %v1939_v32  ;;  %v2069_v45 = vsel %vm8086_vm7, %v2005_v37, %v1941_v41  ;;  %v819_v28 = vand.u32 2, %v627_v2  ;;  %v821_v17 = vand.u32 2, %v8050_v56 }
 0x1d3   : > { %v2129_v4 = vpack.c.bf16 %v2069_v45, %v2067_v31  ;;  %v947_v50 = vand.u32 4, %v627_v2  ;;  %vm8162_vm8 = vcmp.ne.s32.totalorder %v691_v33, 0  ;;  %vm8166_vm9 = vcmp.ne.s32.totalorder %v693_v30, 0 }
 0x1d4   : > { %v949_v63 = vand.u32 4, %v8050_v56  ;;  %v1075_v46 = vand.u32 8, %v627_v2  ;;  %vm8171_vm10 = vcmp.ne.s32.totalorder %v819_v28, 0  ;;  %vm8175_vm11 = vcmp.ne.s32.totalorder %v821_v17, 0 }
 0x1d5   : > { %3774 = vmatpush.bf16.msra.mxu2 %v2129_v4  ;;  %vm8179_vm12 = vcmp.ne.s32.totalorder %v947_v50, 0  ;;  %v1077_v43 = vand.u32 8, %v8050_v56  ;;  %v1203_v55 = vsel %vm8162_vm8, -0.6961928, %v12937_v36  ;;  %v1205_v25 = vsel %vm8166_vm9, -0.6961928, %v12937_v36 }
 0x1d6   : > { %vm8184_vm13 = vcmp.ne.s32.totalorder %v949_v63, 0  ;;  %vm8188_vm14 = vcmp.ne.s32.totalorder %v1075_v46, 0  ;;  %v1267_v56 = vsel %vm8162_vm8, -0.3949175, %v12923_v52  ;;  %v1269_v15 = vsel %vm8166_vm9, -0.3949175, %v12923_v52 }
 0x1d7   : > { %vm8198_vm15 = vcmp.ne.s32.totalorder %v1077_v43, 0  ;;  %v1395_v39 = vsel %vm8162_vm8, 0.0, %v12924_v9  ;;  %v1331_v20 = vsel %vm8162_vm8, -0.18477343, %v12885_v57  ;;  %v1333_v32 = vsel %vm8166_vm9, -0.18477343, %v12885_v57 }
 0x1d8   : > { %v1397_v41 = vsel %vm8166_vm9, 0.0, %v12924_v9  ;;  %v1651_v59 = vsel %vm8162_vm8, 1.0, %v12964_v40  ;;  %v1459_v37 = vsel %vm8162_vm8, 0.1609302, %v12866_v11  ;;  %v1461_v31 = vsel %vm8166_vm9, 0.1609302, %v12866_v11 }
 0x1d9   : > { %v1523_v45 = vsel %vm8162_vm8, 0.33791524, %v12867_v24  ;;  %v1715_v33 = vsel %vm8171_vm10, %v1267_v56, %v1203_v55  ;;  %v1525_v30 = vsel %vm8166_vm9, 0.33791524, %v12867_v24  ;;  %v1587_v4 = vsel %vm8162_vm8, 0.562617, %v12868_v53 }
 0x1da   : > { %v1589_v28 = vsel %vm8166_vm9, 0.562617, %v12868_v53  ;;  %v1717_v17 = vsel %vm8175_vm11, %v1269_v15, %v1205_v25  ;;  %v1653_v50 = vsel %vm8166_vm9, 1.0, %v12964_v40  ;;  %v1779_v63 = vsel %vm8171_vm10, %v1395_v39, %v1331_v20 }
 0x1db   : > { %v1781_v46 = vsel %vm8175_vm11, %v1397_v41, %v1333_v32  ;;  %v1843_v38 = vsel %vm8171_vm10, %v1523_v45, %v1459_v37  ;;  %v1845_v43 = vsel %vm8175_vm11, %v1525_v30, %v1461_v31  ;;  %v1907_v55 = vsel %vm8171_vm10, %v1651_v59, %v1587_v4 }
 0x1dc   : > { %v1909_v25 = vsel %vm8175_vm11, %v1653_v50, %v1589_v28  ;;  %v1971_v61 = vsel %vm8179_vm12, %v1779_v63, %v1715_v33  ;;  %v1973_v56 = vsel %vm8184_vm13, %v1781_v46, %v1717_v17  ;;  %v2035_v15 = vsel %vm8179_vm12, %v1907_v55, %v1843_v38 }
 0x1dd   : > { %v2037_v39 = vsel %vm8184_vm13, %v1909_v25, %v1845_v43  ;;  %v13185_v20 = vunpack.c.1.s8 %v7417_v29  ;;  %v2099_v44 = vsel %vm8188_vm14, %v2035_v15, %v1971_v61  ;;  %v590_v41 = vand.u32 15, %v8045_v27 }
 0x1de   : > { %v2101_v13 = vsel %vm8198_vm15, %v2037_v39, %v1973_v56  ;;  %v494_v59 = vunpack.c.0.s8 %v7652_v10  ;;  %v496_v48 = vunpack.c.1.s8 %v7652_v10  ;;  %v463_v31 = vunpack.c.0.s8 %v7889_v35 }
 0x1df   : > { %v8270_v32 = vand.u32 255, %v13185_v20  ;;  %v2145_v37 = vpack.c.bf16 %v2101_v13, %v2099_v44  ;;  %v654_v29 = vand.u32 1, %v590_v41  ;;  %v782_v45 = vand.u32 2, %v590_v41 }
 0x1e0   : > { %v910_v33 = vand.u32 4, %v590_v41  ;;  %v1038_v30 = vand.u32 8, %v590_v41  ;;  %v465_v15 = vunpack.c.1.s8 %v7889_v35  ;;  %v8388_v50 = vand.u32 255, %v494_v59 }
 0x1e1   : > { %v592_v26 = vand.u32 15, %v8270_v32  ;;  %3788 = vmatpush.bf16.msra.mxu3 %v2145_v37  ;;  %vm8281_vm0 = vcmp.ne.s32.totalorder %v654_v29, 0  ;;  %vm8285_vm1 = vcmp.ne.s32.totalorder %v782_v45, 0  ;;  %v495_v10 = vunpack.c.0.s8 %v7900_v60 }
 0x1e2   : > { %vm8289_vm2 = vcmp.ne.s32.totalorder %v910_v33, 0  ;;  %vm8293_vm3 = vcmp.ne.s32.totalorder %v1038_v30, 0  ;;  %v1166_v25 = vsel %vm8281_vm0, -0.6961928, %v12937_v36  ;;  %v1230_v56 = vsel %vm8281_vm0, -0.3949175, %v12923_v52 }
 0x1e3   : > { %v656_v2 = vand.u32 1, %v592_v26  ;;  %v784_v4 = vand.u32 2, %v592_v26  ;;  %v912_v14 = vand.u32 4, %v592_v26  ;;  %v1040_v28 = vand.u32 8, %v592_v26 }
 0x1e4   : > { %v1294_v20 = vsel %vm8281_vm0, -0.18477343, %v12885_v57  ;;  %v1678_v13 = vsel %vm8285_vm1, %v1230_v56, %v1166_v25  ;;  %v1358_v41 = vsel %vm8281_vm0, 0.0, %v12924_v9  ;;  %v1422_v37 = vsel %vm8281_vm0, 0.1609302, %v12866_v11 }
 0x1e5   : > { %vm8297_vm4 = vcmp.ne.s32.totalorder %v656_v2, 0  ;;  %vm8301_vm5 = vcmp.ne.s32.totalorder %v784_v4, 0  ;;  %vm8305_vm6 = vcmp.ne.s32.totalorder %v912_v14, 0  ;;  %vm8309_vm7 = vcmp.ne.s32.totalorder %v1040_v28, 0 }
 0x1e6   : > { %v1168_v61 = vsel %vm8297_vm4, -0.6961928, %v12937_v36  ;;  %v1232_v39 = vsel %vm8297_vm4, -0.3949175, %v12923_v52  ;;  %v1296_v44 = vsel %vm8297_vm4, -0.18477343, %v12885_v57  ;;  %v1742_v28 = vsel %vm8285_vm1, %v1358_v41, %v1294_v20 }
 0x1e7   : > { %v1360_v35 = vsel %vm8297_vm4, 0.0, %v12924_v9  ;;  %v1424_v26 = vsel %vm8297_vm4, 0.1609302, %v12866_v11  ;;  %v1486_v29 = vsel %vm8281_vm0, 0.33791524, %v12867_v24  ;;  %v1680_v30 = vsel %vm8301_vm5, %v1232_v39, %v1168_v61 }
 0x1e8   : > { %v1488_v45 = vsel %vm8297_vm4, 0.33791524, %v12867_v24  ;;  %v1550_v33 = vsel %vm8281_vm0, 0.562617, %v12868_v53  ;;  %v1552_v2 = vsel %vm8297_vm4, 0.562617, %v12868_v53  ;;  %v1744_v25 = vsel %vm8301_vm5, %v1360_v35, %v1296_v44 }
 0x1e9   : > { %v1614_v4 = vsel %vm8281_vm0, 1.0, %v12964_v40  ;;  %v1616_v14 = vsel %vm8297_vm4, 1.0, %v12964_v40  ;;  %v1806_v61 = vsel %vm8285_vm1, %v1486_v29, %v1422_v37  ;;  %v1808_v56 = vsel %vm8301_vm5, %v1488_v45, %v1424_v26 }
 0x1ea   : > { %v1870_v17 = vsel %vm8285_vm1, %v1614_v4, %v1550_v33  ;;  %v1872_v39 = vsel %vm8301_vm5, %v1616_v14, %v1552_v2  ;;  %v1934_v46 = vsel %vm8289_vm2, %v1742_v28, %v1678_v13  ;;  %v1936_v20 = vsel %vm8305_vm6, %v1744_v25, %v1680_v30 }
 0x1eb   : > { %v1998_v44 = vsel %vm8289_vm2, %v1870_v17, %v1806_v61  ;;  %v2000_v41 = vsel %vm8305_vm6, %v1872_v39, %v1808_v56  ;;  %v8390_v37 = vand.u32 255, %v496_v48  ;;  %v8394_v13 = vand.u32 255, %v463_v31 }
 0x1ec   : > { %v2062_v35 = vsel %vm8293_vm3, %v1998_v44, %v1934_v46  ;;  %v2064_v38 = vsel %vm8309_vm7, %v2000_v41, %v1936_v20  ;;  %v8396_v26 = vand.u32 255, %v465_v15  ;;  %v622_v43 = vand.u32 15, %v8388_v50 }
 0x1ed   : > { %13202 = vst [vmem:[#allocation54_spill] sm:$0xff] %v8390_v37  ;;  %v2126_v29 = vpack.c.bf16 %v2064_v38, %v2062_v35  ;;  %v624_v45 = vand.u32 15, %v8390_v37  ;;  %v8402_v63 = vand.u32 15, %v8394_v13  ;;  %v8407_v48 = vand.u32 255, %v495_v10 }
 0x1ee   : > { %13203 = vst [vmem:[#allocation55_spill] sm:$0xff] %v8394_v13  ;;  %v8405_v59 = vand.u32 15, %v8396_v26  ;;  %v8410_v31 = vshra.s32 %v4864_v7, 4  ;;  %v686_v55 = vand.u32 1, %v622_v43  ;;  %v814_v33 = vand.u32 2, %v622_v43 }
 0x1ef   : > { %13204 = vst [vmem:[#allocation56_spill] sm:$0xff] %v8396_v26  ;;  %3747 = vmatpush.bf16.msra.mxu0 %v2126_v29  ;;  %v688_v15 = vand.u32 1, %v624_v45  ;;  %v816_v30 = vand.u32 2, %v624_v45  ;;  %v942_v2 = vand.u32 4, %v622_v43  ;;  %v944_v4 = vand.u32 4, %v624_v45 }
 0x1f0   : > { %13205 = vst [vmem:[#allocation57_spill] sm:$0xff] %v8407_v48  ;;  %v1070_v14 = vand.u32 8, %v622_v43  ;;  %v1072_v28 = vand.u32 8, %v624_v45  ;;  %vm8412_vm8 = vcmp.ne.s32.totalorder %v686_v55, 0  ;;  %vm8420_vm10 = vcmp.ne.s32.totalorder %v814_v33, 0 }
 0x1f1   : > { %vm8416_vm9 = vcmp.ne.s32.totalorder %v688_v15, 0  ;;  %vm8424_vm11 = vcmp.ne.s32.totalorder %v816_v30, 0  ;;  %vm8428_vm12 = vcmp.ne.s32.totalorder %v942_v2, 0  ;;  %vm8432_vm13 = vcmp.ne.s32.totalorder %v944_v4, 0 }
 0x1f2   : > { %vm8436_vm14 = vcmp.ne.s32.totalorder %v1070_v14, 0  ;;  %vm8440_vm15 = vcmp.ne.s32.totalorder %v1072_v28, 0  ;;  %v1198_v44 = vsel %vm8412_vm8, -0.6961928, %v12937_v36  ;;  %v1200_v41 = vsel %vm8416_vm9, -0.6961928, %v12937_v36 }
 0x1f3   : > { %v1262_v35 = vsel %vm8412_vm8, -0.3949175, %v12923_v52  ;;  %v1264_v10 = vsel %vm8416_vm9, -0.3949175, %v12923_v52  ;;  %v1326_v29 = vsel %vm8412_vm8, -0.18477343, %v12885_v57 }
 0x1f4   : > { %v1328_v43 = vsel %vm8416_vm9, -0.18477343, %v12885_v57  ;;  %v1710_v45 = vsel %vm8420_vm10, %v1262_v35, %v1198_v44  ;;  %v1390_v55 = vsel %vm8412_vm8, 0.0, %v12924_v9  ;;  %v1392_v15 = vsel %vm8416_vm9, 0.0, %v12924_v9 }
 0x1f5   : > { %v1454_v33 = vsel %vm8412_vm8, 0.1609302, %v12866_v11  ;;  %v1456_v30 = vsel %vm8416_vm9, 0.1609302, %v12866_v11  ;;  %v1518_v2 = vsel %vm8412_vm8, 0.33791524, %v12867_v24  ;;  %v1712_v28 = vsel %vm8424_vm11, %v1264_v10, %v1200_v41 }
 0x1f6   : > { %v1520_v4 = vsel %vm8416_vm9, 0.33791524, %v12867_v24  ;;  %v1582_v14 = vsel %vm8412_vm8, 0.562617, %v12868_v53  ;;  %v1584_v44 = vsel %vm8416_vm9, 0.562617, %v12868_v53  ;;  %v1774_v26 = vsel %vm8420_vm10, %v1390_v55, %v1326_v29 }
 0x1f7   : > { %v1646_v35 = vsel %vm8412_vm8, 1.0, %v12964_v40  ;;  %v1648_v38 = vsel %vm8416_vm9, 1.0, %v12964_v40  ;;  %v1776_v13 = vsel %vm8424_vm11, %v1392_v15, %v1328_v43  ;;  %v1838_v41 = vsel %vm8420_vm10, %v1518_v2, %v1454_v33 }
 0x1f8   : > { %v1840_v10 = vsel %vm8424_vm11, %v1520_v4, %v1456_v30  ;;  %v1902_v25 = vsel %vm8420_vm10, %v1646_v35, %v1582_v14  ;;  %v1904_v37 = vsel %vm8424_vm11, %v1648_v38, %v1584_v44  ;;  %v1966_v61 = vsel %vm8428_vm12, %v1774_v26, %v1710_v45 }
 0x1f9   : > { %v1968_v29 = vsel %vm8432_vm13, %v1776_v13, %v1712_v28  ;;  %v2030_v43 = vsel %vm8428_vm12, %v1902_v25, %v1838_v41  ;;  %v2032_v55 = vsel %vm8432_vm13, %v1904_v37, %v1840_v10  ;;  %v655_v7 = vand.u32 1, %v8402_v63 }
 0x1fa   : > { %v2094_v15 = vsel %vm8436_vm14, %v2030_v43, %v1966_v61  ;;  %v657_v56 = vand.u32 1, %v8405_v59  ;;  %v2096_v38 = vsel %vm8440_vm15, %v2032_v55, %v1968_v29  ;;  %v783_v26 = vand.u32 2, %v8402_v63 }
 0x1fb   : > { %v785_v13 = vand.u32 2, %v8405_v59  ;;  %v911_v17 = vand.u32 4, %v8402_v63  ;;  %v2142_v45 = vpack.c.bf16 %v2096_v38, %v2094_v15  ;;  %vm8526_vm0 = vcmp.ne.s32.totalorder %v655_v7, 0 }
 0x1fc   : > { %vm8530_vm1 = vcmp.ne.s32.totalorder %v657_v56, 0  ;;  %v913_v46 = vand.u32 4, %v8405_v59  ;;  %vm8535_vm2 = vcmp.ne.s32.totalorder %v783_v26, 0  ;;  %v1039_v2 = vand.u32 8, %v8402_v63 }
 0x1fd   : > { %vm8539_vm3 = vcmp.ne.s32.totalorder %v785_v13, 0  ;;  %vm8543_vm4 = vcmp.ne.s32.totalorder %v911_v17, 0  ;;  %3761 = vmatpush.bf16.msra.mxu1 %v2142_v45  ;;  %v1041_v14 = vand.u32 8, %v8405_v59  ;;  %v1167_v28 = vsel %vm8526_vm0, -0.6961928, %v12937_v36 }
 0x1fe   : > { %vm8548_vm5 = vcmp.ne.s32.totalorder %v913_v46, 0  ;;  %v1169_v44 = vsel %vm8530_vm1, -0.6961928, %v12937_v36  ;;  %vm8559_vm6 = vcmp.ne.s32.totalorder %v1039_v2, 0  ;;  %v1231_v63 = vsel %vm8526_vm0, -0.3949175, %v12923_v52 }
 0x1ff   : > { %v1233_v59 = vsel %vm8530_vm1, -0.3949175, %v12923_v52  ;;  %v1359_v41 = vsel %vm8526_vm0, 0.0, %v12924_v9  ;;  %vm8572_vm7 = vcmp.ne.s32.totalorder %v1041_v14, 0  ;;  %v1295_v25 = vsel %vm8526_vm0, -0.18477343, %v12885_v57 }
 0x200   : > { %v1297_v61 = vsel %vm8530_vm1, -0.18477343, %v12885_v57  ;;  %v1361_v29 = vsel %vm8530_vm1, 0.0, %v12924_v9  ;;  %v1423_v43 = vsel %vm8526_vm0, 0.1609302, %v12866_v11  ;;  %v1679_v7 = vsel %vm8535_vm2, %v1231_v63, %v1167_v28 }
 0x201   : > { %v1425_v55 = vsel %vm8530_vm1, 0.1609302, %v12866_v11  ;;  %v1487_v15 = vsel %vm8526_vm0, 0.33791524, %v12867_v24  ;;  %v1489_v56 = vsel %vm8530_vm1, 0.33791524, %v12867_v24  ;;  %v1681_v13 = vsel %vm8539_vm3, %v1233_v59, %v1169_v44 }
 0x202   : > { %v1551_v38 = vsel %vm8526_vm0, 0.562617, %v12868_v53  ;;  %v1553_v26 = vsel %vm8530_vm1, 0.562617, %v12868_v53  ;;  %v1615_v17 = vsel %vm8526_vm0, 1.0, %v12964_v40  ;;  %v1617_v45 = vsel %vm8530_vm1, 1.0, %v12964_v40 }
 0x203   : > { %v1743_v46 = vsel %vm8535_vm2, %v1359_v41, %v1295_v25  ;;  %v1745_v2 = vsel %vm8539_vm3, %v1361_v29, %v1297_v61  ;;  %v1807_v14 = vsel %vm8535_vm2, %v1487_v15, %v1423_v43  ;;  %v1809_v28 = vsel %vm8539_vm3, %v1489_v56, %v1425_v55 }
 0x204   : > { %v1871_v39 = vsel %vm8535_vm2, %v1615_v17, %v1551_v38  ;;  %v1873_v44 = vsel %vm8539_vm3, %v1617_v45, %v1553_v26  ;;  %v1935_v37 = vsel %vm8543_vm4, %v1743_v46, %v1679_v7  ;;  %v1937_v63 = vsel %vm8548_vm5, %v1745_v2, %v1681_v13 }
 0x205   : > { %v1999_v59 = vsel %vm8543_vm4, %v1871_v39, %v1807_v14  ;;  %v2001_v41 = vsel %vm8548_vm5, %v1873_v44, %v1809_v28  ;;  %v13238_v33 = vunpack.c.1.s8 %v7900_v60  ;;  %v623_v29 = vand.u32 15, %v8407_v48 }
 0x206   : > { %v2063_v25 = vsel %vm8559_vm6, %v1999_v59, %v1935_v37  ;;  %v2065_v20 = vsel %vm8572_vm7, %v2001_v41, %v1937_v63  ;;  %v8643_v55 = vshra.s32 %v4866_v8, 4  ;;  %v2250_v30 = vand.u32 1, %v8410_v31 }
 0x207   : > { %v8639_v61 = vand.u32 255, %v13238_v33  ;;  %v2127_v43 = vpack.c.bf16 %v2065_v20, %v2063_v25  ;;  %v687_v15 = vand.u32 1, %v623_v29  ;;  %v815_v35 = vand.u32 2, %v623_v29 }
 0x208   : > { %v943_v7 = vand.u32 4, %v623_v29  ;;  %v1071_v10 = vand.u32 8, %v623_v29  ;;  %v2252_v56 = vand.u32 1, %v8643_v55  ;;  %v2378_v60 = vand.u32 2, %v8410_v31 }
 0x209   : > { %13239 = vst [vmem:[#allocation58_spill] sm:$0xff] %v8639_v61  ;;  %v625_v4 = vand.u32 15, %v8639_v61  ;;  %3775 = vmatpush.bf16.msra.mxu2 %v2127_v43  ;;  %v2380_v38 = vand.u32 2, %v8643_v55  ;;  %vm8650_vm8 = vcmp.ne.s32.totalorder %v687_v15, 0  ;;  %vm8654_vm9 = vcmp.ne.s32.totalorder %v815_v35, 0 }
 0x20a   : > { %vm8658_vm10 = vcmp.ne.s32.totalorder %v943_v7, 0  ;;  %vm8662_vm11 = vcmp.ne.s32.totalorder %v1071_v10, 0  ;;  %vm8666_vm12 = vcmp.ne.s32.totalorder %v2250_v30, 0  ;;  %v1199_v37 = vsel %vm8650_vm8, -0.6961928, %v12937_v36 }
 0x20b   : > { %v689_v26 = vand.u32 1, %v625_v4  ;;  %v817_v8 = vand.u32 2, %v625_v4  ;;  %v945_v45 = vand.u32 4, %v625_v4  ;;  %v1073_v2 = vand.u32 8, %v625_v4 }
 0x20c   : > { %v1263_v63 = vsel %vm8650_vm8, -0.3949175, %v12923_v52  ;;  %v1327_v33 = vsel %vm8650_vm8, -0.18477343, %v12885_v57  ;;  %v1391_v43 = vsel %vm8650_vm8, 0.0, %v12924_v9  ;;  %vm8762_vm1 = vcmp.ne.s32.totalorder %v2252_v56, 0 }
 0x20d   : > { %vm8670_vm13 = vcmp.ne.s32.totalorder %v689_v26, 0  ;;  %vm8674_vm14 = vcmp.ne.s32.totalorder %v817_v8, 0  ;;  %vm8684_vm15 = vcmp.ne.s32.totalorder %v945_v45, 0  ;;  %vm8688_vm0 = vcmp.ne.s32.totalorder %v1073_v2, 0 }
 0x20e   : > { %v1201_v25 = vsel %vm8670_vm13, -0.6961928, %v12937_v36  ;;  %v1265_v20 = vsel %vm8670_vm13, -0.3949175, %v12923_v52  ;;  %v1329_v29 = vsel %vm8670_vm13, -0.18477343, %v12885_v57  ;;  %v1711_v7 = vsel %vm8654_vm9, %v1263_v63, %v1199_v37 }
 0x20f   : > { %v1393_v30 = vsel %vm8670_vm13, 0.0, %v12924_v9  ;;  %v1455_v4 = vsel %vm8650_vm8, 0.1609302, %v12866_v11  ;;  %v1457_v15 = vsel %vm8670_vm13, 0.1609302, %v12866_v11  ;;  %v1713_v45 = vsel %vm8674_vm14, %v1265_v20, %v1201_v25 }
 0x210   : > { %v1519_v35 = vsel %vm8650_vm8, 0.33791524, %v12867_v24  ;;  %v1521_v10 = vsel %vm8670_vm13, 0.33791524, %v12867_v24  ;;  %v1583_v26 = vsel %vm8650_vm8, 0.562617, %v12868_v53  ;;  %v1775_v63 = vsel %vm8654_vm9, %v1391_v43, %v1327_v33 }
 0x211   : > { %v1585_v8 = vsel %vm8670_vm13, 0.562617, %v12868_v53  ;;  %v1647_v2 = vsel %vm8650_vm8, 1.0, %v12964_v40  ;;  %v1649_v37 = vsel %vm8670_vm13, 1.0, %v12964_v40  ;;  %v1777_v61 = vsel %vm8674_vm14, %v1393_v30, %v1329_v29 }
 0x212   : > { %v1839_v48 = vsel %vm8654_vm9, %v1519_v35, %v1455_v4  ;;  %v1841_v25 = vsel %vm8674_vm14, %v1521_v10, %v1457_v15  ;;  %v1903_v13 = vsel %vm8654_vm9, %v1647_v2, %v1583_v26  ;;  %v1905_v20 = vsel %vm8674_vm14, %v1649_v37, %v1585_v8 }
 0x213   : > { %v1967_v39 = vsel %vm8658_vm10, %v1775_v63, %v1711_v7  ;;  %v1969_v33 = vsel %vm8684_vm15, %v1777_v61, %v1713_v45  ;;  %v2031_v29 = vsel %vm8658_vm10, %v1903_v13, %v1839_v48  ;;  %v2033_v43 = vsel %vm8684_vm15, %v1905_v20, %v1841_v25 }
 0x214   : > { %v2095_v30 = vsel %vm8662_vm11, %v2031_v29, %v1967_v39  ;;  %v2097_v17 = vsel %vm8688_vm0, %v2033_v43, %v1969_v33  ;;  %vm8766_vm2 = vcmp.ne.s32.totalorder %v2378_v60, 0  ;;  %vm8770_vm3 = vcmp.ne.s32.totalorder %v2380_v38, 0 }
 0x215   : > { %v2143_v61 = vpack.c.bf16 %v2097_v17, %v2095_v30  ;;  %v2506_v46 = vand.u32 4, %v8410_v31  ;;  %v2508_v14 = vand.u32 4, %v8643_v55  ;;  %v2634_v59 = vand.u32 8, %v8410_v31 }
 0x216   : > { %v2636_v56 = vand.u32 8, %v8643_v55  ;;  %v2762_v60 = vsel %vm8666_vm12, -0.6961928, %v12937_v36  ;;  %v2764_v41 = vsel %vm8762_vm1, -0.6961928, %v12937_v36  ;;  %v2954_v8 = vsel %vm8666_vm12, 0.0, %v12924_v9 }
 0x217   : > { %3789 = vmatpush.bf16.msra.mxu3 %v2143_v61  ;;  %vm8784_vm4 = vcmp.ne.s32.totalorder %v2506_v46, 0  ;;  %vm8788_vm5 = vcmp.ne.s32.totalorder %v2508_v14, 0  ;;  %v2826_v31 = vsel %vm8666_vm12, -0.3949175, %v12923_v52  ;;  %v2828_v55 = vsel %vm8762_vm1, -0.3949175, %v12923_v52 }
 0x218   : > { %vm8798_vm6 = vcmp.ne.s32.totalorder %v2634_v59, 0  ;;  %vm8802_vm7 = vcmp.ne.s32.totalorder %v2636_v56, 0  ;;  %v2890_v10 = vsel %vm8666_vm12, -0.18477343, %v12885_v57  ;;  %v2892_v26 = vsel %vm8762_vm1, -0.18477343, %v12885_v57 }
 0x219   : > { %v2956_v45 = vsel %vm8762_vm1, 0.0, %v12924_v9  ;;  %v3018_v2 = vsel %vm8666_vm12, 0.1609302, %v12866_v11  ;;  %v3020_v37 = vsel %vm8762_vm1, 0.1609302, %v12866_v11  ;;  %v3274_v20 = vsel %vm8766_vm2, %v2826_v31, %v2762_v60 }
 0x21a   : > { %v3082_v63 = vsel %vm8666_vm12, 0.33791524, %v12867_v24  ;;  %v3084_v25 = vsel %vm8762_vm1, 0.33791524, %v12867_v24  ;;  %v3146_v13 = vsel %vm8666_vm12, 0.562617, %v12868_v53  ;;  %v3276_v43 = vsel %vm8770_vm3, %v2828_v55, %v2764_v41 }
 0x21b   : > { %v3148_v39 = vsel %vm8762_vm1, 0.562617, %v12868_v53  ;;  %v3210_v33 = vsel %vm8666_vm12, 1.0, %v12964_v40  ;;  %v3212_v29 = vsel %vm8762_vm1, 1.0, %v12964_v40  ;;  %v3338_v30 = vsel %vm8766_vm2, %v2954_v8, %v2890_v10 }
 0x21c   : > { %v3340_v17 = vsel %vm8770_vm3, %v2956_v45, %v2892_v26  ;;  %v3402_v61 = vsel %vm8766_vm2, %v3082_v63, %v3018_v2  ;;  %v3404_v28 = vsel %vm8770_vm3, %v3084_v25, %v3020_v37  ;;  %v3466_v46 = vsel %vm8766_vm2, %v3210_v33, %v3146_v13 }
 0x21d   : > { %v3468_v44 = vsel %vm8770_vm3, %v3212_v29, %v3148_v39  ;;  %v3530_v14 = vsel %vm8784_vm4, %v3338_v30, %v3274_v20  ;;  %v3532_v59 = vsel %vm8788_vm5, %v3340_v17, %v3276_v43  ;;  %v3594_v56 = vsel %vm8784_vm4, %v3466_v46, %v3402_v61 }
 0x21e   : > { %v3596_v60 = vsel %vm8788_vm5, %v3468_v44, %v3404_v28  ;;  %v2218_v41 = vshra.s32 %v4873_v12, 4  ;;  %v2220_v4 = vshra.s32 %v4880_v18, 4  ;;  %v3658_v48 = vsel %vm8798_vm6, %v3594_v56, %v3530_v14 }
 0x21f   : > { %v3660_v31 = vsel %vm8802_vm7, %v3596_v60, %v3532_v59  ;;  %v8873_v55 = vshra.s32 %v4882_v19, 4  ;;  %v8876_v10 = vshra.s32 %v4887_v21, 4  ;;  %v2219_v13 = vshra.s32 %v4889_v22, 4 }
 0x220   : > { %v3708_v38 = vpack.c.bf16 %v3660_v31, %v3658_v48  ;;  %v2282_v26 = vand.u32 1, %v2218_v41  ;;  %v2284_v15 = vand.u32 1, %v2220_v4  ;;  %v2410_v8 = vand.u32 2, %v2218_v41 }
 0x221   : > { %v2412_v45 = vand.u32 2, %v2220_v4  ;;  %v2538_v12 = vand.u32 4, %v2218_v41  ;;  %v2540_v2 = vand.u32 4, %v2220_v4  ;;  %v2666_v18 = vand.u32 8, %v2218_v41 }
 0x222   : > { %3818 = vmatpush.bf16.msrb.mxu0 %v3708_v38  ;;  %vm8878_vm8 = vcmp.ne.s32.totalorder %v2282_v26, 0  ;;  %vm8882_vm9 = vcmp.ne.s32.totalorder %v2284_v15, 0  ;;  %vm8886_vm10 = vcmp.ne.s32.totalorder %v2410_v8, 0  ;;  %v2668_v21 = vand.u32 8, %v2220_v4 }
 0x223   : > { %vm8890_vm11 = vcmp.ne.s32.totalorder %v2412_v45, 0  ;;  %vm8894_vm12 = vcmp.ne.s32.totalorder %v2538_v12, 0  ;;  %vm8898_vm13 = vcmp.ne.s32.totalorder %v2540_v2, 0  ;;  %vm8902_vm14 = vcmp.ne.s32.totalorder %v2666_v18, 0 }
 0x224   : > { %vm8906_vm15 = vcmp.ne.s32.totalorder %v2668_v21, 0  ;;  %v2794_v39 = vsel %vm8878_vm8, -0.6961928, %v12937_v36  ;;  %v2796_v33 = vsel %vm8882_vm9, -0.6961928, %v12937_v36  ;;  %v2986_v29 = vsel %vm8878_vm8, 0.0, %v12924_v9 }
 0x225   : > { %v2858_v43 = vsel %vm8878_vm8, -0.3949175, %v12923_v52  ;;  %v2860_v30 = vsel %vm8882_vm9, -0.3949175, %v12923_v52  ;;  %v2922_v17 = vsel %vm8878_vm8, -0.18477343, %v12885_v57 }
 0x226   : > { %v2924_v61 = vsel %vm8882_vm9, -0.18477343, %v12885_v57  ;;  %v2988_v28 = vsel %vm8882_vm9, 0.0, %v12924_v9  ;;  %v3050_v46 = vsel %vm8878_vm8, 0.1609302, %v12866_v11  ;;  %v3242_v44 = vsel %vm8878_vm8, 1.0, %v12964_v40 }
 0x227   : > { %v3052_v14 = vsel %vm8882_vm9, 0.1609302, %v12866_v11  ;;  %v3114_v59 = vsel %vm8878_vm8, 0.33791524, %v12867_v24  ;;  %v3116_v56 = vsel %vm8882_vm9, 0.33791524, %v12867_v24  ;;  %v3306_v60 = vsel %vm8886_vm10, %v2858_v43, %v2794_v39 }
 0x228   : > { %v3178_v41 = vsel %vm8878_vm8, 0.562617, %v12868_v53  ;;  %v3180_v4 = vsel %vm8882_vm9, 0.562617, %v12868_v53  ;;  %v3244_v48 = vsel %vm8882_vm9, 1.0, %v12964_v40  ;;  %v3308_v31 = vsel %vm8890_vm11, %v2860_v30, %v2796_v33 }
 0x229   : > { %v3370_v38 = vsel %vm8886_vm10, %v2986_v29, %v2922_v17  ;;  %v3372_v26 = vsel %vm8890_vm11, %v2988_v28, %v2924_v61  ;;  %v3434_v15 = vsel %vm8886_vm10, %v3114_v59, %v3050_v46  ;;  %v3436_v8 = vsel %vm8890_vm11, %v3116_v56, %v3052_v14 }
 0x22a   : > { %v3498_v45 = vsel %vm8886_vm10, %v3242_v44, %v3178_v41  ;;  %v3500_v12 = vsel %vm8890_vm11, %v3244_v48, %v3180_v4  ;;  %v3562_v2 = vsel %vm8894_vm12, %v3370_v38, %v3306_v60  ;;  %v3564_v18 = vsel %vm8898_vm13, %v3372_v26, %v3308_v31 }
 0x22b   : > { %v3626_v35 = vsel %vm8894_vm12, %v3498_v45, %v3434_v15  ;;  %v3628_v7 = vsel %vm8898_vm13, %v3500_v12, %v3436_v8  ;;  %v2251_v21 = vand.u32 1, %v8873_v55  ;;  %v2253_v19 = vand.u32 1, %v8876_v10 }
 0x22c   : > { %v3690_v37 = vsel %vm8902_vm14, %v3626_v35, %v3562_v2  ;;  %v3692_v39 = vsel %vm8906_vm15, %v3628_v7, %v3564_v18  ;;  %v2379_v33 = vand.u32 2, %v8873_v55  ;;  %v2381_v29 = vand.u32 2, %v8876_v10 }
 0x22d   : > { %v3724_v43 = vpack.c.bf16 %v3692_v39, %v3690_v37  ;;  %vm8990_vm0 = vcmp.ne.s32.totalorder %v2251_v21, 0  ;;  %vm8994_vm1 = vcmp.ne.s32.totalorder %v2253_v19, 0  ;;  %v2507_v30 = vand.u32 4, %v8873_v55 }
 0x22e   : > { %vm8999_vm2 = vcmp.ne.s32.totalorder %v2379_v33, 0  ;;  %vm9003_vm3 = vcmp.ne.s32.totalorder %v2381_v29, 0  ;;  %v2509_v17 = vand.u32 4, %v8876_v10  ;;  %v2635_v61 = vand.u32 8, %v8873_v55 }
 0x22f   : > { %3832 = vmatpush.bf16.msrb.mxu1 %v3724_v43  ;;  %vm9009_vm4 = vcmp.ne.s32.totalorder %v2507_v30, 0  ;;  %v2637_v46 = vand.u32 8, %v8876_v10  ;;  %v2763_v44 = vsel %vm8990_vm0, -0.6961928, %v12937_v36  ;;  %v2765_v14 = vsel %vm8994_vm1, -0.6961928, %v12937_v36 }
 0x230   : > { %vm9020_vm5 = vcmp.ne.s32.totalorder %v2509_v17, 0  ;;  %vm9024_vm6 = vcmp.ne.s32.totalorder %v2635_v61, 0  ;;  %v2827_v10 = vsel %vm8990_vm0, -0.3949175, %v12923_v52  ;;  %v2829_v56 = vsel %vm8994_vm1, -0.3949175, %v12923_v52 }
 0x231   : > { %vm9034_vm7 = vcmp.ne.s32.totalorder %v2637_v46, 0  ;;  %v2891_v41 = vsel %vm8990_vm0, -0.18477343, %v12885_v57  ;;  %v2893_v4 = vsel %vm8994_vm1, -0.18477343, %v12885_v57  ;;  %v2955_v48 = vsel %vm8990_vm0, 0.0, %v12924_v9 }
 0x232   : > { %v2957_v31 = vsel %vm8994_vm1, 0.0, %v12924_v9  ;;  %v3019_v38 = vsel %vm8990_vm0, 0.1609302, %v12866_v11  ;;  %v3021_v26 = vsel %vm8994_vm1, 0.1609302, %v12866_v11  ;;  %v3211_v15 = vsel %vm8990_vm0, 1.0, %v12964_v40 }
 0x233   : > { %v3083_v8 = vsel %vm8990_vm0, 0.33791524, %v12867_v24  ;;  %v3085_v45 = vsel %vm8994_vm1, 0.33791524, %v12867_v24  ;;  %v3147_v12 = vsel %vm8990_vm0, 0.562617, %v12868_v53  ;;  %v3275_v2 = vsel %vm8999_vm2, %v2827_v10, %v2763_v44 }
 0x234   : > { %v3149_v18 = vsel %vm8994_vm1, 0.562617, %v12868_v53  ;;  %v3213_v35 = vsel %vm8994_vm1, 1.0, %v12964_v40  ;;  %v3277_v7 = vsel %vm9003_vm3, %v2829_v56, %v2765_v14  ;;  %v3339_v21 = vsel %vm8999_vm2, %v2955_v48, %v2891_v41 }
 0x235   : > { %v3341_v19 = vsel %vm9003_vm3, %v2957_v31, %v2893_v4  ;;  %v3403_v37 = vsel %vm8999_vm2, %v3083_v8, %v3019_v38  ;;  %v3405_v39 = vsel %vm9003_vm3, %v3085_v45, %v3021_v26  ;;  %v3467_v33 = vsel %vm8999_vm2, %v3211_v15, %v3147_v12 }
 0x236   : > { %v3469_v29 = vsel %vm9003_vm3, %v3213_v35, %v3149_v18  ;;  %v3531_v43 = vsel %vm9009_vm4, %v3339_v21, %v3275_v2  ;;  %v3533_v63 = vsel %vm9020_vm5, %v3341_v19, %v3277_v7  ;;  %v3595_v25 = vsel %vm9009_vm4, %v3467_v33, %v3403_v37 }
 0x237   : > { %v3597_v30 = vsel %vm9020_vm5, %v3469_v29, %v3405_v39  ;;  %v3659_v17 = vsel %vm9024_vm6, %v3595_v25, %v3531_v43  ;;  %v2221_v20 = vshra.s32 %v4891_v23, 4  ;;  %v9105_v46 = vshra.s32 %v5348_v49, 4 }
 0x238   : > { %v3661_v61 = vsel %vm9034_vm7, %v3597_v30, %v3533_v63  ;;  %v9108_v44 = vshra.s32 %v5352_v51, 4  ;;  %v9111_v28 = vshra.s32 %v5362_v62, 4  ;;  %v2283_v59 = vand.u32 1, %v2219_v13 }
 0x239   : > { %v3709_v14 = vpack.c.bf16 %v3661_v61, %v3659_v17  ;;  %v2285_v55 = vand.u32 1, %v2221_v20  ;;  %v2411_v10 = vand.u32 2, %v2219_v13  ;;  %v2413_v56 = vand.u32 2, %v2221_v20 }
 0x23a   : > { %v2539_v22 = vand.u32 4, %v2219_v13  ;;  %v2541_v41 = vand.u32 4, %v2221_v20  ;;  %v2667_v23 = vand.u32 8, %v2219_v13  ;;  %vm9113_vm8 = vcmp.ne.s32.totalorder %v2283_v59, 0 }
 0x23b   : > { %3846 = vmatpush.bf16.msrb.mxu2 %v3709_v14  ;;  %vm9117_vm9 = vcmp.ne.s32.totalorder %v2285_v55, 0  ;;  %vm9121_vm10 = vcmp.ne.s32.totalorder %v2411_v10, 0  ;;  %v2669_v62 = vand.u32 8, %v2221_v20  ;;  %vm9125_vm11 = vcmp.ne.s32.totalorder %v2413_v56, 0 }
 0x23c   : > { %vm9129_vm12 = vcmp.ne.s32.totalorder %v2539_v22, 0  ;;  %vm9133_vm13 = vcmp.ne.s32.totalorder %v2541_v41, 0  ;;  %vm9137_vm14 = vcmp.ne.s32.totalorder %v2667_v23, 0  ;;  %v2795_v15 = vsel %vm9113_vm8, -0.6961928, %v12937_v36 }
 0x23d   : > { %vm9141_vm15 = vcmp.ne.s32.totalorder %v2669_v62, 0  ;;  %v2797_v8 = vsel %vm9117_vm9, -0.6961928, %v12937_v36  ;;  %v2987_v45 = vsel %vm9113_vm8, 0.0, %v12924_v9  ;;  %v2859_v12 = vsel %vm9113_vm8, -0.3949175, %v12923_v52 }
 0x23e   : > { %v2861_v2 = vsel %vm9117_vm9, -0.3949175, %v12923_v52  ;;  %v2923_v18 = vsel %vm9113_vm8, -0.18477343, %v12885_v57  ;;  %v2925_v35 = vsel %vm9117_vm9, -0.18477343, %v12885_v57  ;;  %v3307_v29 = vsel %vm9121_vm10, %v2859_v12, %v2795_v15 }
 0x23f   : > { %v2989_v7 = vsel %vm9117_vm9, 0.0, %v12924_v9  ;;  %v3051_v21 = vsel %vm9113_vm8, 0.1609302, %v12866_v11  ;;  %v3243_v19 = vsel %vm9113_vm8, 1.0, %v12964_v40  ;;  %v3053_v37 = vsel %vm9117_vm9, 0.1609302, %v12866_v11 }
 0x240   : > { %v3115_v39 = vsel %vm9113_vm8, 0.33791524, %v12867_v24  ;;  %v3117_v33 = vsel %vm9117_vm9, 0.33791524, %v12867_v24  ;;  %v3179_v43 = vsel %vm9113_vm8, 0.562617, %v12868_v53  ;;  %v3309_v30 = vsel %vm9125_vm11, %v2861_v2, %v2797_v8 }
 0x241   : > { %v3181_v63 = vsel %vm9117_vm9, 0.562617, %v12868_v53  ;;  %v3245_v25 = vsel %vm9117_vm9, 1.0, %v12964_v40  ;;  %v3371_v17 = vsel %vm9121_vm10, %v2987_v45, %v2923_v18  ;;  %v3373_v13 = vsel %vm9125_vm11, %v2989_v7, %v2925_v35 }
 0x242   : > { %v3435_v20 = vsel %vm9121_vm10, %v3115_v39, %v3051_v21  ;;  %v3437_v61 = vsel %vm9125_vm11, %v3117_v33, %v3053_v37  ;;  %v3499_v14 = vsel %vm9121_vm10, %v3243_v19, %v3179_v43  ;;  %v3501_v59 = vsel %vm9125_vm11, %v3245_v25, %v3181_v63 }
 0x243   : > { %v3563_v55 = vsel %vm9129_vm12, %v3371_v17, %v3307_v29  ;;  %v3565_v10 = vsel %vm9133_vm13, %v3373_v13, %v3309_v30  ;;  %v3627_v56 = vsel %vm9129_vm12, %v3499_v14, %v3435_v20  ;;  %v3629_v22 = vsel %vm9133_vm13, %v3501_v59, %v3437_v61 }
 0x244   : > { %v2246_v41 = vand.u32 1, %v9105_v46  ;;  %v2248_v23 = vand.u32 1, %v9108_v44  ;;  %v3691_v60 = vsel %vm9137_vm14, %v3627_v56, %v3563_v55  ;;  %v3693_v49 = vsel %vm9141_vm15, %v3629_v22, %v3565_v10 }
 0x245   : > { %v2374_v51 = vand.u32 2, %v9105_v46  ;;  %v2376_v62 = vand.u32 2, %v9108_v44  ;;  %v3725_v4 = vpack.c.bf16 %v3693_v49, %v3691_v60  ;;  %v2502_v15 = vand.u32 4, %v9105_v46 }
 0x246   : > { %vm9225_vm0 = vcmp.ne.s32.totalorder %v2246_v41, 0  ;;  %vm9229_vm1 = vcmp.ne.s32.totalorder %v2248_v23, 0  ;;  %v2504_v8 = vand.u32 4, %v9108_v44  ;;  %v2630_v45 = vand.u32 8, %v9105_v46 }
 0x247   : > { %vm9234_vm2 = vcmp.ne.s32.totalorder %v2374_v51, 0  ;;  %vm9238_vm3 = vcmp.ne.s32.totalorder %v2376_v62, 0  ;;  %3860 = vmatpush.bf16.msrb.mxu3 %v3725_v4  ;;  %vm9244_vm4 = vcmp.ne.s32.totalorder %v2502_v15, 0  ;;  %v2632_v2 = vand.u32 8, %v9108_v44 }
 0x248   : > { %v2758_v18 = vsel %vm9225_vm0, -0.6961928, %v12937_v36  ;;  %v2760_v35 = vsel %vm9229_vm1, -0.6961928, %v12937_v36  ;;  %vm9255_vm5 = vcmp.ne.s32.totalorder %v2504_v8, 0  ;;  %vm9259_vm6 = vcmp.ne.s32.totalorder %v2630_v45, 0 }
 0x249   : > { %v2822_v44 = vsel %vm9225_vm0, -0.3949175, %v12923_v52  ;;  %v2824_v21 = vsel %vm9229_vm1, -0.3949175, %v12923_v52  ;;  %vm9269_vm7 = vcmp.ne.s32.totalorder %v2632_v2, 0  ;;  %v2950_v33 = vsel %vm9225_vm0, 0.0, %v12924_v9 }
 0x24a   : > { %v2886_v37 = vsel %vm9225_vm0, -0.18477343, %v12885_v57  ;;  %v2888_v39 = vsel %vm9229_vm1, -0.18477343, %v12885_v57  ;;  %v2952_v29 = vsel %vm9229_vm1, 0.0, %v12924_v9  ;;  %v3206_v25 = vsel %vm9225_vm0, 1.0, %v12964_v40 }
 0x24b   : > { %v3014_v43 = vsel %vm9225_vm0, 0.1609302, %v12866_v11  ;;  %v3016_v63 = vsel %vm9229_vm1, 0.1609302, %v12866_v11  ;;  %v3078_v30 = vsel %vm9225_vm0, 0.33791524, %v12867_v24  ;;  %v3270_v20 = vsel %vm9234_vm2, %v2822_v44, %v2758_v18 }
 0x24c   : > { %v3080_v17 = vsel %vm9229_vm1, 0.33791524, %v12867_v24  ;;  %v3142_v13 = vsel %vm9225_vm0, 0.562617, %v12868_v53  ;;  %v3144_v61 = vsel %vm9229_vm1, 0.562617, %v12868_v53  ;;  %v3272_v59 = vsel %vm9238_vm3, %v2824_v21, %v2760_v35 }
 0x24d   : > { %v3208_v14 = vsel %vm9229_vm1, 1.0, %v12964_v40  ;;  %v3334_v55 = vsel %vm9234_vm2, %v2950_v33, %v2886_v37  ;;  %v3336_v10 = vsel %vm9238_vm3, %v2952_v29, %v2888_v39  ;;  %v3398_v56 = vsel %vm9234_vm2, %v3078_v30, %v3014_v43 }
 0x24e   : > { %v3400_v22 = vsel %vm9238_vm3, %v3080_v17, %v3016_v63  ;;  %v3462_v41 = vsel %vm9234_vm2, %v3206_v25, %v3142_v13  ;;  %v3464_v23 = vsel %vm9238_vm3, %v3208_v14, %v3144_v61  ;;  %v3526_v60 = vsel %vm9244_vm4, %v3334_v55, %v3270_v20 }
 0x24f   : > { %v3528_v49 = vsel %vm9255_vm5, %v3336_v10, %v3272_v59  ;;  %v3590_v51 = vsel %vm9244_vm4, %v3462_v41, %v3398_v56  ;;  %v3592_v62 = vsel %vm9255_vm5, %v3464_v23, %v3400_v22  ;;  %v2216_v48 = vshra.s32 %v5364_v1, 4 }
 0x250   : > { %v3654_v4 = vsel %vm9259_vm6, %v3590_v51, %v3526_v60  ;;  %v2278_v31 = vand.u32 1, %v9111_v28  ;;  %v3656_v15 = vsel %vm9269_vm7, %v3592_v62, %v3528_v49  ;;  %v2406_v38 = vand.u32 2, %v9111_v28 }
 0x251   : > { %v2534_v26 = vand.u32 4, %v9111_v28  ;;  %v2662_v8 = vand.u32 8, %v9111_v28  ;;  %v3706_v45 = vpack.c.bf16 %v3656_v15, %v3654_v4  ;;  %v2280_v12 = vand.u32 1, %v2216_v48  ;;  %v4180_v4 = vld [vmem:[%s4812_s24] sm:$0xf] }
 0x252   : > { %vm9342_vm8 = vcmp.ne.s32.totalorder %v2278_v31, 0  ;;  %v2408_v18 = vand.u32 2, %v2216_v48  ;;  %vm9346_vm9 = vcmp.ne.s32.totalorder %v2406_v38, 0  ;;  %v2536_v35 = vand.u32 4, %v2216_v48 }
 0x253   : > { %vm9350_vm10 = vcmp.ne.s32.totalorder %v2534_v26, 0  ;;  %v2664_v46 = vand.u32 8, %v2216_v48  ;;  %3819 = vmatpush.bf16.msrb.mxu0 %v3706_v45  ;;  %vm9354_vm11 = vcmp.ne.s32.totalorder %v2280_v12, 0  ;;  %vm9362_vm13 = vcmp.ne.s32.totalorder %v2662_v8, 0  ;;  %v4206_v48 = vld [vmem:[%s4812_s24 + $0xc] sm:$0xf0] }
 0x254   : > { %vm9358_vm12 = vcmp.ne.s32.totalorder %v2408_v18, 0  ;;  %v2790_v19 = vsel %vm9342_vm8, -0.6961928, %v12937_v36  ;;  %vm9369_vm14 = vcmp.ne.s32.totalorder %v2536_v35, 0  ;;  %v2792_v33 = vsel %vm9354_vm11, -0.6961928, %v12937_v36 }
 0x255   : > { %vm9373_vm15 = vcmp.ne.s32.totalorder %v2664_v46, 0  ;;  %v2854_v29 = vsel %vm9342_vm8, -0.3949175, %v12923_v52  ;;  %v2856_v43 = vsel %vm9354_vm11, -0.3949175, %v12923_v52  ;;  %v2982_v17 = vsel %vm9342_vm8, 0.0, %v12924_v9 }
 0x256   : > { %v2918_v63 = vsel %vm9342_vm8, -0.18477343, %v12885_v57  ;;  %v2920_v25 = vsel %vm9354_vm11, -0.18477343, %v12885_v57  ;;  %v3302_v30 = vsel %vm9346_vm9, %v2854_v29, %v2790_v19  ;;  %v2984_v13 = vsel %vm9354_vm11, 0.0, %v12924_v9 }
 0x257   : > { %v3046_v20 = vsel %vm9342_vm8, 0.1609302, %v12866_v11  ;;  %v3048_v61 = vsel %vm9354_vm11, 0.1609302, %v12866_v11  ;;  %v3110_v14 = vsel %vm9342_vm8, 0.33791524, %v12867_v24  ;;  %v3304_v10 = vsel %vm9358_vm12, %v2856_v43, %v2792_v33 }
 0x258   : > { %v3112_v59 = vsel %vm9354_vm11, 0.33791524, %v12867_v24  ;;  %v3174_v55 = vsel %vm9342_vm8, 0.562617, %v12868_v53  ;;  %v3176_v56 = vsel %vm9354_vm11, 0.562617, %v12868_v53  ;;  %v3366_v23 = vsel %vm9346_vm9, %v2982_v17, %v2918_v63 }
 0x259   : > { %v3238_v22 = vsel %vm9342_vm8, 1.0, %v12964_v40  ;;  %v3240_v41 = vsel %vm9354_vm11, 1.0, %v12964_v40  ;;  %v3368_v60 = vsel %vm9358_vm12, %v2984_v13, %v2920_v25  ;;  %v3430_v49 = vsel %vm9346_vm9, %v3110_v14, %v3046_v20  ;;  %v4182_v43 = vld [vmem:[%s4812_s24 + $0x10] sm:$0xf0] }
 0x25a   : > { %v3432_v51 = vsel %vm9358_vm12, %v3112_v59, %v3048_v61  ;;  %v3494_v62 = vsel %vm9346_vm9, %v3238_v22, %v3174_v55  ;;  %v3496_v31 = vsel %vm9358_vm12, %v3240_v41, %v3176_v56  ;;  %v3558_v15 = vsel %vm9350_vm10, %v3366_v23, %v3302_v30 }
 0x25b   : > { %v3560_v38 = vsel %vm9369_vm14, %v3368_v60, %v3304_v10  ;;  %v3622_v26 = vsel %vm9350_vm10, %v3494_v62, %v3430_v49  ;;  %v3624_v8 = vsel %vm9369_vm14, %v3496_v31, %v3432_v51  ;;  %v2183_v12 = vshra.s32 %v5366_v3, 4 }
 0x25c   : > { %v3686_v45 = vsel %vm9362_vm13, %v3622_v26, %v3558_v15  ;;  %v2185_v2 = vshra.s32 %v5480_v5, 4  ;;  %v3688_v18 = vsel %vm9373_vm15, %v3624_v8, %v3560_v38  ;;  %v9455_v1 = vshra.s32 %v5485_v16, 4  ;;  %v4204_v5 = vld [vmem:[%s4812_s24 + $0x4] sm:$0xf] }
 0x25d   : > { %v9458_v35 = vshra.s32 %v5710_v42, 4  ;;  %v4181_v7 = vor.u32 %v4206_v48, %v4180_v4  ;;  %v3722_v46 = vpack.c.bf16 %v3688_v18, %v3686_v45  ;;  %v2247_v28 = vand.u32 1, %v2183_v12 }
 0x25e   : > { %v2249_v44 = vand.u32 1, %v2185_v2  ;;  %v2375_v21 = vand.u32 2, %v2183_v12  ;;  %v2377_v19 = vand.u32 2, %v2185_v2  ;;  %v2503_v37 = vand.u32 4, %v2183_v12 }
 0x25f   : > { %v2505_v3 = vand.u32 4, %v2185_v2  ;;  %v2631_v33 = vand.u32 8, %v2183_v12  ;;  %3776 = vmatmul.bf16.vlgmr.msra.gmra.mxu2 %v4181_v7  ;;  %3748 = vmatmul.bf16.vlgmr.msra.gmra.mxu0 %v4181_v7  ;;  %vm9461_vm0 = vcmp.ne.s32.totalorder %v2247_v28, 0  ;;  %v2633_v29 = vand.u32 8, %v2185_v2 }
 0x260   : > { %3833 = vmatpush.bf16.msrb.mxu1 %v3722_v46  ;;  %vm9465_vm1 = vcmp.ne.s32.totalorder %v2249_v44, 0  ;;  %vm9469_vm2 = vcmp.ne.s32.totalorder %v2375_v21, 0  ;;  %vm9474_vm3 = vcmp.ne.s32.totalorder %v2377_v19, 0  ;;  %vm9478_vm4 = vcmp.ne.s32.totalorder %v2503_v37, 0 }
 0x261   : > { %vm9482_vm5 = vcmp.ne.s32.totalorder %v2505_v3, 0  ;;  %vm9486_vm6 = vcmp.ne.s32.totalorder %v2631_v33, 0  ;;  %vm9490_vm7 = vcmp.ne.s32.totalorder %v2633_v29, 0  ;;  %v2759_v20 = vsel %vm9461_vm0, -0.6961928, %v12937_v36 }
 0x262   : > { %v2761_v61 = vsel %vm9465_vm1, -0.6961928, %v12937_v36  ;;  %v2951_v14 = vsel %vm9461_vm0, 0.0, %v12924_v9  ;;  %v2823_v59 = vsel %vm9461_vm0, -0.3949175, %v12923_v52  ;;  %v4185_v56 = vor.u32 %v4204_v5, %v4182_v43 }
 0x263   : > { %v2825_v55 = vsel %vm9465_vm1, -0.3949175, %v12923_v52  ;;  %v2887_v10 = vsel %vm9461_vm0, -0.18477343, %v12885_v57  ;;  %v2889_v22 = vsel %vm9465_vm1, -0.18477343, %v12885_v57  ;;  %v3271_v4 = vsel %vm9469_vm2, %v2823_v59, %v2759_v20 }
 0x264   : > { %v2953_v41 = vsel %vm9465_vm1, 0.0, %v12924_v9  ;;  %v3015_v23 = vsel %vm9461_vm0, 0.1609302, %v12866_v11  ;;  %v3207_v60 = vsel %vm9461_vm0, 1.0, %v12964_v40  ;;  %v3017_v49 = vsel %vm9465_vm1, 0.1609302, %v12866_v11  ;;  %3790 = vmatmul.bf16.vlgmr.msra.gmra.mxu3 %v4185_v56  ;;  %3762 = vmatmul.bf16.vlgmr.msra.gmra.mxu1 %v4185_v56 }
 0x265   : > { %v3079_v51 = vsel %vm9461_vm0, 0.33791524, %v12867_v24  ;;  %v3081_v62 = vsel %vm9465_vm1, 0.33791524, %v12867_v24  ;;  %v3143_v48 = vsel %vm9461_vm0, 0.562617, %v12868_v53  ;;  %v3273_v38 = vsel %vm9474_vm3, %v2825_v55, %v2761_v61 }
 0x266   : > { %v3145_v31 = vsel %vm9465_vm1, 0.562617, %v12868_v53  ;;  %v3209_v15 = vsel %vm9465_vm1, 1.0, %v12964_v40  ;;  %v3335_v26 = vsel %vm9469_vm2, %v2951_v14, %v2887_v10  ;;  %v3337_v8 = vsel %vm9474_vm3, %v2953_v41, %v2889_v22 }
 0x267   : > { %v3399_v45 = vsel %vm9469_vm2, %v3079_v51, %v3015_v23  ;;  %v3401_v12 = vsel %vm9474_vm3, %v3081_v62, %v3017_v49  ;;  %v3463_v2 = vsel %vm9469_vm2, %v3207_v60, %v3143_v48  ;;  %v3465_v18 = vsel %vm9474_vm3, %v3209_v15, %v3145_v31 }
 0x268   : > { %v3527_v7 = vsel %vm9478_vm4, %v3335_v26, %v3271_v4  ;;  %v3529_v46 = vsel %vm9482_vm5, %v3337_v8, %v3273_v38  ;;  %v3591_v28 = vsel %vm9478_vm4, %v3463_v2, %v3399_v45  ;;  %v3593_v44 = vsel %vm9482_vm5, %v3465_v18, %v3401_v12 }
 0x269   : > { %v2279_v21 = vand.u32 1, %v9455_v1  ;;  %v2281_v19 = vand.u32 1, %v9458_v35  ;;  %v3655_v37 = vsel %vm9486_vm6, %v3591_v28, %v3527_v7  ;;  %v3657_v3 = vsel %vm9490_vm7, %v3593_v44, %v3529_v46 }
 0x26a   : > { %v2407_v33 = vand.u32 2, %v9455_v1  ;;  %v2409_v5 = vand.u32 2, %v9458_v35  ;;  %v3707_v16 = vpack.c.bf16 %v3657_v3, %v3655_v37  ;;  %v2535_v29 = vand.u32 4, %v9455_v1 }
 0x26b   : > { %vm9574_vm8 = vcmp.ne.s32.totalorder %v2279_v21, 0  ;;  %vm9578_vm9 = vcmp.ne.s32.totalorder %v2281_v19, 0  ;;  %v2537_v25 = vand.u32 4, %v9458_v35  ;;  %v2663_v30 = vand.u32 8, %v9455_v1 }
 0x26c   : > { %vm9583_vm10 = vcmp.ne.s32.totalorder %v2407_v33, 0  ;;  %vm9587_vm11 = vcmp.ne.s32.totalorder %v2409_v5, 0  ;;  %3847 = vmatpush.bf16.msrb.mxu2 %v3707_v16  ;;  %vm9593_vm12 = vcmp.ne.s32.totalorder %v2535_v29, 0  ;;  %v2665_v13 = vand.u32 8, %v9458_v35  ;;  %v13384_v16 = vld [vmem:[#allocation20_spill] sm:$0xff] }
 0x26d   : > { %v2791_v20 = vsel %vm9574_vm8, -0.6961928, %v12937_v36  ;;  %v2793_v61 = vsel %vm9578_vm9, -0.6961928, %v12937_v36  ;;  %vm9604_vm13 = vcmp.ne.s32.totalorder %v2537_v25, 0  ;;  %vm9608_vm14 = vcmp.ne.s32.totalorder %v2663_v30, 0 }
 0x26e   : > { %v2855_v35 = vsel %vm9574_vm8, -0.3949175, %v12923_v52  ;;  %v2857_v59 = vsel %vm9578_vm9, -0.3949175, %v12923_v52  ;;  %vm9618_vm15 = vcmp.ne.s32.totalorder %v2665_v13, 0  ;;  %v2983_v22 = vsel %vm9574_vm8, 0.0, %v12924_v9 }
 0x26f   : > { %v2919_v10 = vsel %vm9574_vm8, -0.18477343, %v12885_v57  ;;  %v2921_v56 = vsel %vm9578_vm9, -0.18477343, %v12885_v57  ;;  %v2985_v41 = vsel %vm9578_vm9, 0.0, %v12924_v9  ;;  %v3239_v49 = vsel %vm9574_vm8, 1.0, %v12964_v40 }
 0x270   : > { %v3047_v23 = vsel %vm9574_vm8, 0.1609302, %v12866_v11  ;;  %v3049_v60 = vsel %vm9578_vm9, 0.1609302, %v12866_v11  ;;  %v3111_v51 = vsel %vm9574_vm8, 0.33791524, %v12867_v24  ;;  %v3303_v48 = vsel %vm9583_vm10, %v2855_v35, %v2791_v20 }
 0x271   : > { %v3113_v62 = vsel %vm9578_vm9, 0.33791524, %v12867_v24  ;;  %v3175_v4 = vsel %vm9574_vm8, 0.562617, %v12868_v53  ;;  %v3177_v31 = vsel %vm9578_vm9, 0.562617, %v12868_v53  ;;  %v3305_v38 = vsel %vm9587_vm11, %v2857_v59, %v2793_v61 }
 0x272   : > { %v3241_v15 = vsel %vm9578_vm9, 1.0, %v12964_v40  ;;  %v3367_v26 = vsel %vm9583_vm10, %v2983_v22, %v2919_v10  ;;  %v3369_v8 = vsel %vm9587_vm11, %v2985_v41, %v2921_v56  ;;  %v3431_v45 = vsel %vm9583_vm10, %v3111_v51, %v3047_v23 }
 0x273   : > { %v3433_v12 = vsel %vm9587_vm11, %v3113_v62, %v3049_v60  ;;  %v3495_v2 = vsel %vm9583_vm10, %v3239_v49, %v3175_v4  ;;  %v3497_v18 = vsel %vm9587_vm11, %v3241_v15, %v3177_v31  ;;  %v3559_v7 = vsel %vm9593_vm12, %v3367_v26, %v3303_v48 }
 0x274   : > { %v3561_v46 = vsel %vm9604_vm13, %v3369_v8, %v3305_v38  ;;  %v3623_v28 = vsel %vm9593_vm12, %v3495_v2, %v3431_v45  ;;  %v3625_v44 = vsel %vm9604_vm13, %v3497_v18, %v3433_v12  ;;  %v2178_v19 = vshra.s32 %v5720_v54, 4 }
 0x275   : > { %v3687_v21 = vsel %vm9608_vm14, %v3623_v28, %v3559_v7  ;;  %v2180_v37 = vshra.s32 %v5723_v34, 4  ;;  %v3689_v3 = vsel %vm9618_vm15, %v3625_v44, %v3561_v46  ;;  %v9689_v33 = vshra.s32 %v5957_v58, 4 }
 0x276   : > { %v9692_v5 = vshra.s32 %v5959_v47, 4  ;;  %v9695_v42 = vshra.s32 %v13384_v16, 4  ;;  %v3723_v39 = vpack.c.bf16 %v3689_v3, %v3687_v21  ;;  %v2242_v29 = vand.u32 1, %v2178_v19 }
 0x277   : > { %v2244_v43 = vand.u32 1, %v2180_v37  ;;  %v2370_v63 = vand.u32 2, %v2178_v19  ;;  %v2372_v25 = vand.u32 2, %v2180_v37  ;;  %v2498_v54 = vand.u32 4, %v2178_v19 }
 0x278   : > { %v2500_v30 = vand.u32 4, %v2180_v37  ;;  %v2626_v34 = vand.u32 8, %v2178_v19  ;;  %3861 = vmatpush.bf16.msrb.mxu3 %v3723_v39  ;;  %vm9697_vm0 = vcmp.ne.s32.totalorder %v2242_v29, 0  ;;  %v2628_v13 = vand.u32 8, %v2180_v37 }
 0x279   : > { %vm9701_vm1 = vcmp.ne.s32.totalorder %v2244_v43, 0  ;;  %vm9705_vm2 = vcmp.ne.s32.totalorder %v2370_v63, 0  ;;  %vm9709_vm3 = vcmp.ne.s32.totalorder %v2372_v25, 0  ;;  %vm9713_vm4 = vcmp.ne.s32.totalorder %v2498_v54, 0 }
 0x27a   : > { %vm9717_vm5 = vcmp.ne.s32.totalorder %v2500_v30, 0  ;;  %vm9721_vm6 = vcmp.ne.s32.totalorder %v2626_v34, 0  ;;  %vm9725_vm7 = vcmp.ne.s32.totalorder %v2628_v13, 0  ;;  %v2754_v59 = vsel %vm9697_vm0, -0.6961928, %v12937_v36 }
 0x27b   : > { %v2756_v55 = vsel %vm9701_vm1, -0.6961928, %v12937_v36  ;;  %v2946_v10 = vsel %vm9697_vm0, 0.0, %v12924_v9  ;;  %v2818_v56 = vsel %vm9697_vm0, -0.3949175, %v12923_v52  ;;  %v2948_v60 = vsel %vm9701_vm1, 0.0, %v12924_v9 }
 0x27c   : > { %v2820_v22 = vsel %vm9701_vm1, -0.3949175, %v12923_v52  ;;  %v2882_v41 = vsel %vm9697_vm0, -0.18477343, %v12885_v57  ;;  %v2884_v23 = vsel %vm9701_vm1, -0.18477343, %v12885_v57  ;;  %v3266_v31 = vsel %vm9705_vm2, %v2818_v56, %v2754_v59 }
 0x27d   : > { %v3010_v49 = vsel %vm9697_vm0, 0.1609302, %v12866_v11  ;;  %v3202_v51 = vsel %vm9697_vm0, 1.0, %v12964_v40  ;;  %v3012_v62 = vsel %vm9701_vm1, 0.1609302, %v12866_v11  ;;  %v3204_v26 = vsel %vm9701_vm1, 1.0, %v12964_v40 }
 0x27e   : > { %v3074_v4 = vsel %vm9697_vm0, 0.33791524, %v12867_v24  ;;  %v3076_v48 = vsel %vm9701_vm1, 0.33791524, %v12867_v24  ;;  %v3138_v15 = vsel %vm9697_vm0, 0.562617, %v12868_v53  ;;  %v3268_v8 = vsel %vm9709_vm3, %v2820_v22, %v2756_v55 }
 0x27f   : > { %v3140_v38 = vsel %vm9701_vm1, 0.562617, %v12868_v53  ;;  %v3330_v45 = vsel %vm9705_vm2, %v2946_v10, %v2882_v41  ;;  %v3332_v12 = vsel %vm9709_vm3, %v2948_v60, %v2884_v23  ;;  %v3394_v2 = vsel %vm9705_vm2, %v3074_v4, %v3010_v49 }
 0x280   : > { %v3396_v18 = vsel %vm9709_vm3, %v3076_v48, %v3012_v62  ;;  %v3458_v7 = vsel %vm9705_vm2, %v3202_v51, %v3138_v15  ;;  %v3460_v46 = vsel %vm9709_vm3, %v3204_v26, %v3140_v38  ;;  %v3522_v28 = vsel %vm9713_vm4, %v3330_v45, %v3266_v31 }
 0x281   : > { %v3524_v44 = vsel %vm9717_vm5, %v3332_v12, %v3268_v8  ;;  %v3586_v21 = vsel %vm9713_vm4, %v3458_v7, %v3394_v2  ;;  %v3588_v19 = vsel %vm9717_vm5, %v3460_v46, %v3396_v18  ;;  %v2274_v37 = vand.u32 1, %v9689_v33 }
 0x282   : > { %v2276_v3 = vand.u32 1, %v9692_v5  ;;  %v3650_v16 = vsel %vm9721_vm6, %v3586_v21, %v3522_v28  ;;  %v3652_v39 = vsel %vm9725_vm7, %v3588_v19, %v3524_v44  ;;  %v2402_v29 = vand.u32 2, %v9689_v33  ;;  %v13417_v21 = vld [vmem:[#allocation21_spill] sm:$0xff] }
 0x283   : > { %v2404_v43 = vand.u32 2, %v9692_v5  ;;  %v3704_v63 = vpack.c.bf16 %v3652_v39, %v3650_v16  ;;  %vm9809_vm8 = vcmp.ne.s32.totalorder %v2274_v37, 0  ;;  %v2530_v30 = vand.u32 4, %v9689_v33 }
 0x284   : > { %vm9813_vm9 = vcmp.ne.s32.totalorder %v2276_v3, 0  ;;  %vm9818_vm10 = vcmp.ne.s32.totalorder %v2402_v29, 0  ;;  %v2532_v58 = vand.u32 4, %v9692_v5  ;;  %v2658_v47 = vand.u32 8, %v9689_v33 }
 0x285   : > { %vm9822_vm11 = vcmp.ne.s32.totalorder %v2404_v43, 0  ;;  %3820 = vmatpush.bf16.msrb.mxu0 %v3704_v63  ;;  %vm9828_vm12 = vcmp.ne.s32.totalorder %v2530_v30, 0  ;;  %v2660_v20 = vand.u32 8, %v9692_v5  ;;  %v2786_v61 = vsel %vm9809_vm8, -0.6961928, %v12937_v36 }
 0x286   : > { %v2788_v14 = vsel %vm9813_vm9, -0.6961928, %v12937_v36  ;;  %vm9839_vm13 = vcmp.ne.s32.totalorder %v2532_v58, 0  ;;  %vm9843_vm14 = vcmp.ne.s32.totalorder %v2658_v47, 0  ;;  %v2850_v5 = vsel %vm9809_vm8, -0.3949175, %v12923_v52 }
 0x287   : > { %v2852_v35 = vsel %vm9813_vm9, -0.3949175, %v12923_v52  ;;  %vm9853_vm15 = vcmp.ne.s32.totalorder %v2660_v20, 0  ;;  %v2914_v55 = vsel %vm9809_vm8, -0.18477343, %v12885_v57  ;;  %v2978_v56 = vsel %vm9809_vm8, 0.0, %v12924_v9 }
 0x288   : > { %v2916_v10 = vsel %vm9813_vm9, -0.18477343, %v12885_v57  ;;  %v2980_v22 = vsel %vm9813_vm9, 0.0, %v12924_v9  ;;  %v3042_v41 = vsel %vm9809_vm8, 0.1609302, %v12866_v11  ;;  %v3234_v60 = vsel %vm9809_vm8, 1.0, %v12964_v40 }
 0x289   : > { %v3044_v23 = vsel %vm9813_vm9, 0.1609302, %v12866_v11  ;;  %v3106_v49 = vsel %vm9809_vm8, 0.33791524, %v12867_v24  ;;  %v3108_v51 = vsel %vm9813_vm9, 0.33791524, %v12867_v24  ;;  %v3298_v4 = vsel %vm9818_vm10, %v2850_v5, %v2786_v61 }
 0x28a   : > { %v3170_v62 = vsel %vm9809_vm8, 0.562617, %v12868_v53  ;;  %v3172_v48 = vsel %vm9813_vm9, 0.562617, %v12868_v53  ;;  %v3236_v31 = vsel %vm9813_vm9, 1.0, %v12964_v40  ;;  %v3300_v15 = vsel %vm9822_vm11, %v2852_v35, %v2788_v14 }
 0x28b   : > { %v3362_v38 = vsel %vm9818_vm10, %v2978_v56, %v2914_v55  ;;  %v3364_v26 = vsel %vm9822_vm11, %v2980_v22, %v2916_v10  ;;  %v3426_v8 = vsel %vm9818_vm10, %v3106_v49, %v3042_v41  ;;  %v3428_v45 = vsel %vm9822_vm11, %v3108_v51, %v3044_v23 }
 0x28c   : > { %v3490_v12 = vsel %vm9818_vm10, %v3234_v60, %v3170_v62  ;;  %v3492_v2 = vsel %vm9822_vm11, %v3236_v31, %v3172_v48  ;;  %v3554_v18 = vsel %vm9828_vm12, %v3362_v38, %v3298_v4  ;;  %v3556_v7 = vsel %vm9839_vm13, %v3364_v26, %v3300_v15 }
 0x28d   : > { %v3618_v46 = vsel %vm9828_vm12, %v3490_v12, %v3426_v8  ;;  %v3620_v28 = vsel %vm9839_vm13, %v3492_v2, %v3428_v45  ;;  %v2181_v19 = vshra.s32 %v13417_v21, 4  ;;  %v2243_v37 = vand.u32 1, %v9695_v42  ;;  %v13435_v21 = vld [vmem:[#allocation23_spill] sm:$0xff] }
 0x28e   : > { %v3682_v44 = vsel %vm9843_vm14, %v3618_v46, %v3554_v18  ;;  %v3684_v3 = vsel %vm9853_vm15, %v3620_v28, %v3556_v7  ;;  %v2371_v16 = vand.u32 2, %v9695_v42  ;;  %v2499_v39 = vand.u32 4, %v9695_v42  ;;  %v13434_v28 = vld [vmem:[#allocation22_spill] sm:$0xff] }
 0x28f   : > { %v2627_v29 = vand.u32 8, %v9695_v42  ;;  %v3720_v43 = vpack.c.bf16 %v3684_v3, %v3682_v44  ;;  %v2245_v63 = vand.u32 1, %v2181_v19  ;;  %vm9926_vm0 = vcmp.ne.s32.totalorder %v2243_v37, 0  ;;  %v13436_v3 = vld [vmem:[#allocation24_spill] sm:$0xff] }
 0x290   : > { %v2373_v54 = vand.u32 2, %v2181_v19  ;;  %vm9930_vm1 = vcmp.ne.s32.totalorder %v2371_v16, 0  ;;  %v2501_v34 = vand.u32 4, %v2181_v19  ;;  %vm9934_vm2 = vcmp.ne.s32.totalorder %v2499_v39, 0  ;;  %v13437_v39 = vld [vmem:[#allocation25_spill] sm:$0xff] }
 0x291   : > { %v2629_v58 = vand.u32 8, %v2181_v19  ;;  %3834 = vmatpush.bf16.msrb.mxu1 %v3720_v43  ;;  %vm9938_vm3 = vcmp.ne.s32.totalorder %v2245_v63, 0  ;;  %vm9946_vm5 = vcmp.ne.s32.totalorder %v2627_v29, 0  ;;  %v2755_v20 = vsel %vm9926_vm0, -0.6961928, %v12937_v36  ;;  %v13438_v43 = vld [vmem:[#allocation26_spill] sm:$0xff] }
 0x292   : > { %vm9942_vm4 = vcmp.ne.s32.totalorder %v2373_v54, 0  ;;  %vm9953_vm6 = vcmp.ne.s32.totalorder %v2501_v34, 0  ;;  %v2757_v1 = vsel %vm9938_vm3, -0.6961928, %v12937_v36  ;;  %v2819_v33 = vsel %vm9926_vm0, -0.3949175, %v12923_v52 }
 0x293   : > { %vm9957_vm7 = vcmp.ne.s32.totalorder %v2629_v58, 0  ;;  %v2821_v5 = vsel %vm9938_vm3, -0.3949175, %v12923_v52  ;;  %v2883_v35 = vsel %vm9926_vm0, -0.18477343, %v12885_v57  ;;  %v3267_v55 = vsel %vm9930_vm1, %v2819_v33, %v2755_v20 }
 0x294   : > { %v2885_v59 = vsel %vm9938_vm3, -0.18477343, %v12885_v57  ;;  %v2947_v10 = vsel %vm9926_vm0, 0.0, %v12924_v9  ;;  %v2949_v56 = vsel %vm9938_vm3, 0.0, %v12924_v9  ;;  %v3011_v22 = vsel %vm9926_vm0, 0.1609302, %v12866_v11 }
 0x295   : > { %v3013_v41 = vsel %vm9938_vm3, 0.1609302, %v12866_v11  ;;  %v3075_v23 = vsel %vm9926_vm0, 0.33791524, %v12867_v24  ;;  %v3077_v60 = vsel %vm9938_vm3, 0.33791524, %v12867_v24  ;;  %v3269_v51 = vsel %vm9942_vm4, %v2821_v5, %v2757_v1 }
 0x296   : > { %v3139_v49 = vsel %vm9926_vm0, 0.562617, %v12868_v53  ;;  %v3141_v62 = vsel %vm9938_vm3, 0.562617, %v12868_v53  ;;  %v3203_v4 = vsel %vm9926_vm0, 1.0, %v12964_v40  ;;  %v3205_v48 = vsel %vm9938_vm3, 1.0, %v12964_v40 }
 0x297   : > { %v3331_v31 = vsel %vm9930_vm1, %v2947_v10, %v2883_v35  ;;  %v3333_v15 = vsel %vm9942_vm4, %v2949_v56, %v2885_v59  ;;  %v3395_v38 = vsel %vm9930_vm1, %v3075_v23, %v3011_v22  ;;  %v3397_v26 = vsel %vm9942_vm4, %v3077_v60, %v3013_v41 }
 0x298   : > { %v3459_v8 = vsel %vm9930_vm1, %v3203_v4, %v3139_v49  ;;  %v3461_v45 = vsel %vm9942_vm4, %v3205_v48, %v3141_v62  ;;  %v3523_v12 = vsel %vm9934_vm2, %v3331_v31, %v3267_v55  ;;  %v3525_v2 = vsel %vm9953_vm6, %v3333_v15, %v3269_v51 }
 0x299   : > { %v3587_v18 = vsel %vm9934_vm2, %v3459_v8, %v3395_v38  ;;  %v3589_v7 = vsel %vm9953_vm6, %v3461_v45, %v3397_v26  ;;  %v2211_v44 = vshra.s32 %v13434_v28, 4  ;;  %v2213_v19 = vshra.s32 %v13435_v21, 4 }
 0x29a   : > { %v3651_v46 = vsel %vm9946_vm5, %v3587_v18, %v3523_v12  ;;  %v3653_v37 = vsel %vm9957_vm7, %v3589_v7, %v3525_v2  ;;  %v10037_v16 = vshra.s32 %v13436_v3, 4  ;;  %v10040_v29 = vshra.s32 %v13437_v39, 4 }
 0x29b   : > { %v10043_v63 = vshra.s32 %v13438_v43, 4  ;;  %v3705_v25 = vpack.c.bf16 %v3653_v37, %v3651_v46  ;;  %v2275_v54 = vand.u32 1, %v2211_v44  ;;  %v2277_v30 = vand.u32 1, %v2213_v19 }
 0x29c   : > { %v2403_v34 = vand.u32 2, %v2211_v44  ;;  %v2405_v17 = vand.u32 2, %v2213_v19  ;;  %v2531_v58 = vand.u32 4, %v2211_v44  ;;  %v2533_v42 = vand.u32 4, %v2213_v19 }
 0x29d   : > { %v2659_v47 = vand.u32 8, %v2211_v44  ;;  %3848 = vmatpush.bf16.msrb.mxu2 %v3705_v25  ;;  %vm10045_vm8 = vcmp.ne.s32.totalorder %v2275_v54, 0  ;;  %vm10049_vm9 = vcmp.ne.s32.totalorder %v2277_v30, 0  ;;  %v2661_v14 = vand.u32 8, %v2213_v19 }
 0x29e   : > { %vm10053_vm10 = vcmp.ne.s32.totalorder %v2403_v34, 0  ;;  %vm10057_vm11 = vcmp.ne.s32.totalorder %v2405_v17, 0  ;;  %vm10061_vm12 = vcmp.ne.s32.totalorder %v2531_v58, 0  ;;  %vm10065_vm13 = vcmp.ne.s32.totalorder %v2533_v42, 0 }
 0x29f   : > { %vm10069_vm14 = vcmp.ne.s32.totalorder %v2659_v47, 0  ;;  %vm10073_vm15 = vcmp.ne.s32.totalorder %v2661_v14, 0  ;;  %v2787_v55 = vsel %vm10045_vm8, -0.6961928, %v12937_v36  ;;  %v2789_v10 = vsel %vm10049_vm9, -0.6961928, %v12937_v36 }
 0x2a0   : > { %v2979_v56 = vsel %vm10045_vm8, 0.0, %v12924_v9  ;;  %v2851_v22 = vsel %vm10045_vm8, -0.3949175, %v12923_v52  ;;  %v2853_v41 = vsel %vm10049_vm9, -0.3949175, %v12923_v52  ;;  %v2981_v49 = vsel %vm10049_vm9, 0.0, %v12924_v9 }
 0x2a1   : > { %v2915_v23 = vsel %vm10045_vm8, -0.18477343, %v12885_v57  ;;  %v2917_v60 = vsel %vm10049_vm9, -0.18477343, %v12885_v57  ;;  %v3043_v51 = vsel %vm10045_vm8, 0.1609302, %v12866_v11  ;;  %v3299_v15 = vsel %vm10053_vm10, %v2851_v22, %v2787_v55 }
 0x2a2   : > { %v3235_v62 = vsel %vm10045_vm8, 1.0, %v12964_v40  ;;  %v3045_v4 = vsel %vm10049_vm9, 0.1609302, %v12866_v11  ;;  %v3107_v48 = vsel %vm10045_vm8, 0.33791524, %v12867_v24  ;;  %v3237_v8 = vsel %vm10049_vm9, 1.0, %v12964_v40 }
 0x2a3   : > { %v3109_v31 = vsel %vm10049_vm9, 0.33791524, %v12867_v24  ;;  %v3171_v38 = vsel %vm10045_vm8, 0.562617, %v12868_v53  ;;  %v3173_v26 = vsel %vm10049_vm9, 0.562617, %v12868_v53  ;;  %v3301_v45 = vsel %vm10057_vm11, %v2853_v41, %v2789_v10 }
 0x2a4   : > { %v3363_v12 = vsel %vm10053_vm10, %v2979_v56, %v2915_v23  ;;  %v3365_v2 = vsel %vm10057_vm11, %v2981_v49, %v2917_v60  ;;  %v3427_v18 = vsel %vm10053_vm10, %v3107_v48, %v3043_v51  ;;  %v3429_v7 = vsel %vm10057_vm11, %v3109_v31, %v3045_v4 }
 0x2a5   : > { %v3491_v46 = vsel %vm10053_vm10, %v3235_v62, %v3171_v38  ;;  %v3493_v28 = vsel %vm10057_vm11, %v3237_v8, %v3173_v26  ;;  %v3555_v44 = vsel %vm10061_vm12, %v3363_v12, %v3299_v15  ;;  %v3557_v21 = vsel %vm10065_vm13, %v3365_v2, %v3301_v45 }
 0x2a6   : > { %v3619_v19 = vsel %vm10061_vm12, %v3491_v46, %v3427_v18  ;;  %v3621_v37 = vsel %vm10065_vm13, %v3493_v28, %v3429_v7  ;;  %v2238_v3 = vand.u32 1, %v10037_v16  ;;  %v2240_v39 = vand.u32 1, %v10040_v29 }
 0x2a7   : > { %v3683_v43 = vsel %vm10069_vm14, %v3619_v19, %v3555_v44  ;;  %v3685_v25 = vsel %vm10073_vm15, %v3621_v37, %v3557_v21  ;;  %v2366_v54 = vand.u32 2, %v10037_v16  ;;  %v2368_v30 = vand.u32 2, %v10040_v29  ;;  %v13471_v19 = vld [vmem:[#allocation27_spill] sm:$0xff] }
 0x2a8   : > { %v3721_v34 = vpack.c.bf16 %v3685_v25, %v3683_v43  ;;  %vm10157_vm0 = vcmp.ne.s32.totalorder %v2238_v3, 0  ;;  %vm10161_vm1 = vcmp.ne.s32.totalorder %v2240_v39, 0  ;;  %v2494_v42 = vand.u32 4, %v10037_v16 }
 0x2a9   : > { %vm10166_vm2 = vcmp.ne.s32.totalorder %v2366_v54, 0  ;;  %vm10170_vm3 = vcmp.ne.s32.totalorder %v2368_v30, 0  ;;  %v2496_v20 = vand.u32 4, %v10040_v29  ;;  %v2622_v61 = vand.u32 8, %v10037_v16 }
 0x2aa   : > { %3862 = vmatpush.bf16.msrb.mxu3 %v3721_v34  ;;  %vm10176_vm4 = vcmp.ne.s32.totalorder %v2494_v42, 0  ;;  %v2624_v1 = vand.u32 8, %v10040_v29  ;;  %v2750_v33 = vsel %vm10157_vm0, -0.6961928, %v12937_v36  ;;  %v2752_v5 = vsel %vm10161_vm1, -0.6961928, %v12937_v36 }
 0x2ab   : > { %vm10187_vm5 = vcmp.ne.s32.totalorder %v2496_v20, 0  ;;  %vm10191_vm6 = vcmp.ne.s32.totalorder %v2622_v61, 0  ;;  %v2814_v29 = vsel %vm10157_vm0, -0.3949175, %v12923_v52  ;;  %v2816_v59 = vsel %vm10161_vm1, -0.3949175, %v12923_v52 }
 0x2ac   : > { %vm10201_vm7 = vcmp.ne.s32.totalorder %v2624_v1, 0  ;;  %v2878_v10 = vsel %vm10157_vm0, -0.18477343, %v12885_v57  ;;  %v2880_v56 = vsel %vm10161_vm1, -0.18477343, %v12885_v57  ;;  %v2942_v22 = vsel %vm10157_vm0, 0.0, %v12924_v9 }
 0x2ad   : > { %v2944_v41 = vsel %vm10161_vm1, 0.0, %v12924_v9  ;;  %v3006_v23 = vsel %vm10157_vm0, 0.1609302, %v12866_v11  ;;  %v3008_v60 = vsel %vm10161_vm1, 0.1609302, %v12866_v11  ;;  %v3198_v49 = vsel %vm10157_vm0, 1.0, %v12964_v40 }
 0x2ae   : > { %v3070_v51 = vsel %vm10157_vm0, 0.33791524, %v12867_v24  ;;  %v3072_v62 = vsel %vm10161_vm1, 0.33791524, %v12867_v24  ;;  %v3134_v4 = vsel %vm10157_vm0, 0.562617, %v12868_v53  ;;  %v3262_v48 = vsel %vm10166_vm2, %v2814_v29, %v2750_v33 }
 0x2af   : > { %v3136_v31 = vsel %vm10161_vm1, 0.562617, %v12868_v53  ;;  %v3200_v15 = vsel %vm10161_vm1, 1.0, %v12964_v40  ;;  %v3264_v38 = vsel %vm10170_vm3, %v2816_v59, %v2752_v5  ;;  %v3326_v26 = vsel %vm10166_vm2, %v2942_v22, %v2878_v10 }
 0x2b0   : > { %v3328_v8 = vsel %vm10170_vm3, %v2944_v41, %v2880_v56  ;;  %v3390_v45 = vsel %vm10166_vm2, %v3070_v51, %v3006_v23  ;;  %v3392_v12 = vsel %vm10170_vm3, %v3072_v62, %v3008_v60  ;;  %v3454_v2 = vsel %vm10166_vm2, %v3198_v49, %v3134_v4 }
 0x2b1   : > { %v3456_v18 = vsel %vm10170_vm3, %v3200_v15, %v3136_v31  ;;  %v3518_v7 = vsel %vm10176_vm4, %v3326_v26, %v3262_v48  ;;  %v3520_v46 = vsel %vm10187_vm5, %v3328_v8, %v3264_v38  ;;  %v3582_v28 = vsel %vm10176_vm4, %v3454_v2, %v3390_v45 }
 0x2b2   : > { %v3584_v44 = vsel %vm10187_vm5, %v3456_v18, %v3392_v12  ;;  %v3646_v21 = vsel %vm10191_vm6, %v3582_v28, %v3518_v7  ;;  %v2208_v37 = vshra.s32 %v13471_v19, 4  ;;  %v2270_v3 = vand.u32 1, %v10043_v63  ;;  %v13489_v19 = vld [vmem:[#allocation29_spill] sm:$0xff] }
 0x2b3   : > { %v3648_v39 = vsel %vm10201_vm7, %v3584_v44, %v3520_v46  ;;  %v2398_v43 = vand.u32 2, %v10043_v63  ;;  %v2526_v25 = vand.u32 4, %v10043_v63  ;;  %v2654_v54 = vand.u32 8, %v10043_v63  ;;  %v13488_v44 = vld [vmem:[#allocation28_spill] sm:$0xff] }
 0x2b4   : > { %v3702_v30 = vpack.c.bf16 %v3648_v39, %v3646_v21  ;;  %v2272_v34 = vand.u32 1, %v2208_v37  ;;  %vm10274_vm8 = vcmp.ne.s32.totalorder %v2270_v3, 0  ;;  %v2400_v58 = vand.u32 2, %v2208_v37  ;;  %v13490_v39 = vld [vmem:[#allocation30_spill] sm:$0xff] }
 0x2b5   : > { %vm10278_vm9 = vcmp.ne.s32.totalorder %v2398_v43, 0  ;;  %v2528_v47 = vand.u32 4, %v2208_v37  ;;  %vm10282_vm10 = vcmp.ne.s32.totalorder %v2526_v25, 0  ;;  %v2656_v20 = vand.u32 8, %v2208_v37  ;;  %v13491_v25 = vld [vmem:[#allocation31_spill] sm:$0xff] }
 0x2b6   : > { %3821 = vmatpush.bf16.msrb.mxu0 %v3702_v30  ;;  %vm10286_vm11 = vcmp.ne.s32.totalorder %v2272_v34, 0  ;;  %vm10290_vm12 = vcmp.ne.s32.totalorder %v2400_v58, 0  ;;  %vm10294_vm13 = vcmp.ne.s32.totalorder %v2654_v54, 0  ;;  %v2782_v1 = vsel %vm10274_vm8, -0.6961928, %v12937_v36  ;;  %v13492_v30 = vld [vmem:[#allocation32_spill] sm:$0xff] }
 0x2b7   : > { %vm10301_vm14 = vcmp.ne.s32.totalorder %v2528_v47, 0  ;;  %vm10305_vm15 = vcmp.ne.s32.totalorder %v2656_v20, 0  ;;  %v2784_v35 = vsel %vm10286_vm11, -0.6961928, %v12937_v36  ;;  %v2846_v16 = vsel %vm10274_vm8, -0.3949175, %v12923_v52 }
 0x2b8   : > { %v2848_v29 = vsel %vm10286_vm11, -0.3949175, %v12923_v52  ;;  %v2910_v59 = vsel %vm10274_vm8, -0.18477343, %v12885_v57  ;;  %v2912_v55 = vsel %vm10286_vm11, -0.18477343, %v12885_v57  ;;  %v3294_v10 = vsel %vm10278_vm9, %v2846_v16, %v2782_v1 }
 0x2b9   : > { %v2974_v56 = vsel %vm10274_vm8, 0.0, %v12924_v9  ;;  %v2976_v22 = vsel %vm10286_vm11, 0.0, %v12924_v9  ;;  %v3038_v41 = vsel %vm10274_vm8, 0.1609302, %v12866_v11  ;;  %v3040_v23 = vsel %vm10286_vm11, 0.1609302, %v12866_v11 }
 0x2ba   : > { %v3102_v60 = vsel %vm10274_vm8, 0.33791524, %v12867_v24  ;;  %v3104_v49 = vsel %vm10286_vm11, 0.33791524, %v12867_v24  ;;  %v3166_v51 = vsel %vm10274_vm8, 0.562617, %v12868_v53  ;;  %v3296_v62 = vsel %vm10290_vm12, %v2848_v29, %v2784_v35 }
 0x2bb   : > { %v3168_v4 = vsel %vm10286_vm11, 0.562617, %v12868_v53  ;;  %v3230_v48 = vsel %vm10274_vm8, 1.0, %v12964_v40  ;;  %v3232_v31 = vsel %vm10286_vm11, 1.0, %v12964_v40  ;;  %v3358_v15 = vsel %vm10278_vm9, %v2974_v56, %v2910_v59 }
 0x2bc   : > { %v3360_v38 = vsel %vm10290_vm12, %v2976_v22, %v2912_v55  ;;  %v3422_v26 = vsel %vm10278_vm9, %v3102_v60, %v3038_v41  ;;  %v3424_v8 = vsel %vm10290_vm12, %v3104_v49, %v3040_v23  ;;  %v3486_v45 = vsel %vm10278_vm9, %v3230_v48, %v3166_v51 }
 0x2bd   : > { %v3488_v12 = vsel %vm10290_vm12, %v3232_v31, %v3168_v4  ;;  %v3550_v2 = vsel %vm10282_vm10, %v3358_v15, %v3294_v10  ;;  %v3552_v18 = vsel %vm10301_vm14, %v3360_v38, %v3296_v62  ;;  %v3614_v7 = vsel %vm10282_vm10, %v3486_v45, %v3422_v26 }
 0x2be   : > { %v3616_v46 = vsel %vm10301_vm14, %v3488_v12, %v3424_v8  ;;  %v3678_v28 = vsel %vm10294_vm13, %v3614_v7, %v3550_v2  ;;  %v2175_v21 = vshra.s32 %v13488_v44, 4  ;;  %v2177_v37 = vshra.s32 %v13489_v19, 4 }
 0x2bf   : > { %v3680_v3 = vsel %vm10305_vm15, %v3616_v46, %v3552_v18  ;;  %v10385_v43 = vshra.s32 %v13490_v39, 4  ;;  %v10388_v54 = vshra.s32 %v13491_v25, 4  ;;  %v10391_v34 = vshra.s32 %v13492_v30, 4 }
 0x2c0   : > { %v3718_v17 = vpack.c.bf16 %v3680_v3, %v3678_v28  ;;  %v2239_v58 = vand.u32 1, %v2175_v21  ;;  %v2241_v42 = vand.u32 1, %v2177_v37  ;;  %v2367_v47 = vand.u32 2, %v2175_v21 }
 0x2c1   : > { %v2369_v13 = vand.u32 2, %v2177_v37  ;;  %v2495_v20 = vand.u32 4, %v2175_v21  ;;  %v2497_v63 = vand.u32 4, %v2177_v37  ;;  %v2623_v61 = vand.u32 8, %v2175_v21 }
 0x2c2   : > { %3835 = vmatpush.bf16.msrb.mxu1 %v3718_v17  ;;  %vm10393_vm0 = vcmp.ne.s32.totalorder %v2239_v58, 0  ;;  %vm10397_vm1 = vcmp.ne.s32.totalorder %v2241_v42, 0  ;;  %vm10401_vm2 = vcmp.ne.s32.totalorder %v2367_v47, 0  ;;  %v2625_v5 = vand.u32 8, %v2177_v37 }
 0x2c3   : > { %vm10405_vm3 = vcmp.ne.s32.totalorder %v2369_v13, 0  ;;  %vm10409_vm4 = vcmp.ne.s32.totalorder %v2495_v20, 0  ;;  %vm10413_vm5 = vcmp.ne.s32.totalorder %v2497_v63, 0  ;;  %vm10417_vm6 = vcmp.ne.s32.totalorder %v2623_v61, 0 }
 0x2c4   : > { %vm10421_vm7 = vcmp.ne.s32.totalorder %v2625_v5, 0  ;;  %v2751_v10 = vsel %vm10393_vm0, -0.6961928, %v12937_v36  ;;  %v2753_v56 = vsel %vm10397_vm1, -0.6961928, %v12937_v36  ;;  %v2943_v22 = vsel %vm10393_vm0, 0.0, %v12924_v9 }
 0x2c5   : > { %v2815_v41 = vsel %vm10393_vm0, -0.3949175, %v12923_v52  ;;  %v2817_v23 = vsel %vm10397_vm1, -0.3949175, %v12923_v52  ;;  %v2879_v60 = vsel %vm10393_vm0, -0.18477343, %v12885_v57 }
 0x2c6   : > { %v2881_v49 = vsel %vm10397_vm1, -0.18477343, %v12885_v57  ;;  %v2945_v51 = vsel %vm10397_vm1, 0.0, %v12924_v9  ;;  %v3007_v62 = vsel %vm10393_vm0, 0.1609302, %v12866_v11  ;;  %v3199_v4 = vsel %vm10393_vm0, 1.0, %v12964_v40 }
 0x2c7   : > { %v3009_v48 = vsel %vm10397_vm1, 0.1609302, %v12866_v11  ;;  %v3071_v31 = vsel %vm10393_vm0, 0.33791524, %v12867_v24  ;;  %v3073_v15 = vsel %vm10397_vm1, 0.33791524, %v12867_v24  ;;  %v3263_v38 = vsel %vm10401_vm2, %v2815_v41, %v2751_v10 }
 0x2c8   : > { %v3135_v26 = vsel %vm10393_vm0, 0.562617, %v12868_v53  ;;  %v3137_v8 = vsel %vm10397_vm1, 0.562617, %v12868_v53  ;;  %v3201_v45 = vsel %vm10397_vm1, 1.0, %v12964_v40  ;;  %v3265_v12 = vsel %vm10405_vm3, %v2817_v23, %v2753_v56 }
 0x2c9   : > { %v3327_v2 = vsel %vm10401_vm2, %v2943_v22, %v2879_v60  ;;  %v3329_v18 = vsel %vm10405_vm3, %v2945_v51, %v2881_v49  ;;  %v3391_v7 = vsel %vm10401_vm2, %v3071_v31, %v3007_v62  ;;  %v3393_v46 = vsel %vm10405_vm3, %v3073_v15, %v3009_v48 }
 0x2ca   : > { %v3455_v28 = vsel %vm10401_vm2, %v3199_v4, %v3135_v26  ;;  %v3457_v44 = vsel %vm10405_vm3, %v3201_v45, %v3137_v8  ;;  %v3519_v21 = vsel %vm10409_vm4, %v3327_v2, %v3263_v38  ;;  %v3521_v19 = vsel %vm10413_vm5, %v3329_v18, %v3265_v12 }
 0x2cb   : > { %v3583_v37 = vsel %vm10409_vm4, %v3455_v28, %v3391_v7  ;;  %v3585_v3 = vsel %vm10413_vm5, %v3457_v44, %v3393_v46  ;;  %v2271_v39 = vand.u32 1, %v10385_v43  ;;  %v2273_v25 = vand.u32 1, %v10388_v54 }
 0x2cc   : > { %v3647_v30 = vsel %vm10417_vm6, %v3583_v37, %v3519_v21  ;;  %v3649_v17 = vsel %vm10421_vm7, %v3585_v3, %v3521_v19  ;;  %v2399_v58 = vand.u32 2, %v10385_v43  ;;  %v2401_v42 = vand.u32 2, %v10388_v54  ;;  %v13525_v37 = vld [vmem:[#allocation33_spill] sm:$0xff] }
 0x2cd   : > { %v3703_v47 = vpack.c.bf16 %v3649_v17, %v3647_v30  ;;  %vm10505_vm8 = vcmp.ne.s32.totalorder %v2271_v39, 0  ;;  %vm10509_vm9 = vcmp.ne.s32.totalorder %v2273_v25, 0  ;;  %v2527_v63 = vand.u32 4, %v10385_v43 }
 0x2ce   : > { %vm10514_vm10 = vcmp.ne.s32.totalorder %v2399_v58, 0  ;;  %vm10518_vm11 = vcmp.ne.s32.totalorder %v2401_v42, 0  ;;  %v2529_v1 = vand.u32 4, %v10388_v54  ;;  %v2655_v33 = vand.u32 8, %v10385_v43 }
 0x2cf   : > { %3849 = vmatpush.bf16.msrb.mxu2 %v3703_v47  ;;  %vm10524_vm12 = vcmp.ne.s32.totalorder %v2527_v63, 0  ;;  %v2657_v35 = vand.u32 8, %v10388_v54  ;;  %v2783_v16 = vsel %vm10505_vm8, -0.6961928, %v12937_v36  ;;  %v2785_v29 = vsel %vm10509_vm9, -0.6961928, %v12937_v36 }
 0x2d0   : > { %vm10535_vm13 = vcmp.ne.s32.totalorder %v2529_v1, 0  ;;  %vm10539_vm14 = vcmp.ne.s32.totalorder %v2655_v33, 0  ;;  %v2847_v54 = vsel %vm10505_vm8, -0.3949175, %v12923_v52  ;;  %v2849_v55 = vsel %vm10509_vm9, -0.3949175, %v12923_v52 }
 0x2d1   : > { %vm10549_vm15 = vcmp.ne.s32.totalorder %v2657_v35, 0  ;;  %v2911_v56 = vsel %vm10505_vm8, -0.18477343, %v12885_v57  ;;  %v2913_v22 = vsel %vm10509_vm9, -0.18477343, %v12885_v57  ;;  %v2975_v41 = vsel %vm10505_vm8, 0.0, %v12924_v9 }
 0x2d2   : > { %v2977_v23 = vsel %vm10509_vm9, 0.0, %v12924_v9  ;;  %v3039_v60 = vsel %vm10505_vm8, 0.1609302, %v12866_v11  ;;  %v3041_v49 = vsel %vm10509_vm9, 0.1609302, %v12866_v11  ;;  %v3231_v51 = vsel %vm10505_vm8, 1.0, %v12964_v40 }
 0x2d3   : > { %v3103_v62 = vsel %vm10505_vm8, 0.33791524, %v12867_v24  ;;  %v3105_v4 = vsel %vm10509_vm9, 0.33791524, %v12867_v24  ;;  %v3167_v48 = vsel %vm10505_vm8, 0.562617, %v12868_v53  ;;  %v3295_v31 = vsel %vm10514_vm10, %v2847_v54, %v2783_v16 }
 0x2d4   : > { %v3169_v15 = vsel %vm10509_vm9, 0.562617, %v12868_v53  ;;  %v3233_v38 = vsel %vm10509_vm9, 1.0, %v12964_v40  ;;  %v3297_v26 = vsel %vm10518_vm11, %v2849_v55, %v2785_v29  ;;  %v3359_v8 = vsel %vm10514_vm10, %v2975_v41, %v2911_v56 }
 0x2d5   : > { %v3361_v45 = vsel %vm10518_vm11, %v2977_v23, %v2913_v22  ;;  %v3423_v12 = vsel %vm10514_vm10, %v3103_v62, %v3039_v60  ;;  %v3425_v2 = vsel %vm10518_vm11, %v3105_v4, %v3041_v49  ;;  %v3487_v18 = vsel %vm10514_vm10, %v3231_v51, %v3167_v48 }
 0x2d6   : > { %v3489_v7 = vsel %vm10518_vm11, %v3233_v38, %v3169_v15  ;;  %v3551_v46 = vsel %vm10524_vm12, %v3359_v8, %v3295_v31  ;;  %v3553_v28 = vsel %vm10535_vm13, %v3361_v45, %v3297_v26  ;;  %v3615_v44 = vsel %vm10524_vm12, %v3487_v18, %v3423_v12 }
 0x2d7   : > { %v3617_v21 = vsel %vm10535_vm13, %v3489_v7, %v3425_v2  ;;  %v3679_v19 = vsel %vm10539_vm14, %v3615_v44, %v3551_v46  ;;  %v2172_v3 = vshra.s32 %v13525_v37, 4  ;;  %v2234_v39 = vand.u32 1, %v10391_v34  ;;  %v13543_v37 = vld [vmem:[#allocation35_spill] sm:$0xff] }
 0x2d8   : > { %v3681_v25 = vsel %vm10549_vm15, %v3617_v21, %v3553_v28  ;;  %v2362_v30 = vand.u32 2, %v10391_v34  ;;  %v2490_v17 = vand.u32 4, %v10391_v34  ;;  %v2618_v58 = vand.u32 8, %v10391_v34  ;;  %v13542_v21 = vld [vmem:[#allocation34_spill] sm:$0xff] }
 0x2d9   : > { %v3719_v42 = vpack.c.bf16 %v3681_v25, %v3679_v19  ;;  %v2236_v47 = vand.u32 1, %v2172_v3  ;;  %vm10622_vm0 = vcmp.ne.s32.totalorder %v2234_v39, 0  ;;  %v2364_v20 = vand.u32 2, %v2172_v3  ;;  %v13544_v25 = vld [vmem:[#allocation36_spill] sm:$0xff] }
 0x2da   : > { %vm10626_vm1 = vcmp.ne.s32.totalorder %v2362_v30, 0  ;;  %v2492_v61 = vand.u32 4, %v2172_v3  ;;  %vm10630_vm2 = vcmp.ne.s32.totalorder %v2490_v17, 0  ;;  %v2620_v1 = vand.u32 8, %v2172_v3  ;;  %v13545_v17 = vld [vmem:[#allocation37_spill] sm:$0xff] }
 0x2db   : > { %3863 = vmatpush.bf16.msrb.mxu3 %v3719_v42  ;;  %vm10634_vm3 = vcmp.ne.s32.totalorder %v2236_v47, 0  ;;  %vm10638_vm4 = vcmp.ne.s32.totalorder %v2364_v20, 0  ;;  %vm10642_vm5 = vcmp.ne.s32.totalorder %v2618_v58, 0  ;;  %v2746_v35 = vsel %vm10622_vm0, -0.6961928, %v12937_v36  ;;  %v13546_v42 = vld [vmem:[#allocation38_spill] sm:$0xff] }
 0x2dc   : > { %vm10649_vm6 = vcmp.ne.s32.totalorder %v2492_v61, 0  ;;  %vm10653_vm7 = vcmp.ne.s32.totalorder %v2620_v1, 0  ;;  %v2748_v59 = vsel %vm10634_vm3, -0.6961928, %v12937_v36  ;;  %v2810_v43 = vsel %vm10622_vm0, -0.3949175, %v12923_v52 }
 0x2dd   : > { %v2812_v54 = vsel %vm10634_vm3, -0.3949175, %v12923_v52  ;;  %v2874_v55 = vsel %vm10622_vm0, -0.18477343, %v12885_v57  ;;  %v2876_v10 = vsel %vm10634_vm3, -0.18477343, %v12885_v57  ;;  %v3258_v56 = vsel %vm10626_vm1, %v2810_v43, %v2746_v35 }
 0x2de   : > { %v2938_v22 = vsel %vm10622_vm0, 0.0, %v12924_v9  ;;  %v2940_v41 = vsel %vm10634_vm3, 0.0, %v12924_v9  ;;  %v3002_v23 = vsel %vm10622_vm0, 0.1609302, %v12866_v11  ;;  %v3004_v60 = vsel %vm10634_vm3, 0.1609302, %v12866_v11 }
 0x2df   : > { %v3066_v49 = vsel %vm10622_vm0, 0.33791524, %v12867_v24  ;;  %v3068_v51 = vsel %vm10634_vm3, 0.33791524, %v12867_v24  ;;  %v3130_v62 = vsel %vm10622_vm0, 0.562617, %v12868_v53  ;;  %v3260_v4 = vsel %vm10638_vm4, %v2812_v54, %v2748_v59 }
 0x2e0   : > { %v3132_v48 = vsel %vm10634_vm3, 0.562617, %v12868_v53  ;;  %v3194_v31 = vsel %vm10622_vm0, 1.0, %v12964_v40  ;;  %v3196_v15 = vsel %vm10634_vm3, 1.0, %v12964_v40  ;;  %v3322_v38 = vsel %vm10626_vm1, %v2938_v22, %v2874_v55 }
 0x2e1   : > { %v3324_v26 = vsel %vm10638_vm4, %v2940_v41, %v2876_v10  ;;  %v3386_v8 = vsel %vm10626_vm1, %v3066_v49, %v3002_v23  ;;  %v3388_v45 = vsel %vm10638_vm4, %v3068_v51, %v3004_v60  ;;  %v3450_v12 = vsel %vm10626_vm1, %v3194_v31, %v3130_v62 }
 0x2e2   : > { %v3452_v2 = vsel %vm10638_vm4, %v3196_v15, %v3132_v48  ;;  %v3514_v18 = vsel %vm10630_vm2, %v3322_v38, %v3258_v56  ;;  %v3516_v7 = vsel %vm10649_vm6, %v3324_v26, %v3260_v4  ;;  %v3578_v46 = vsel %vm10630_vm2, %v3450_v12, %v3386_v8 }
 0x2e3   : > { %v3580_v28 = vsel %vm10649_vm6, %v3452_v2, %v3388_v45  ;;  %v3642_v44 = vsel %vm10642_vm5, %v3578_v46, %v3514_v18  ;;  %v2202_v19 = vshra.s32 %v13542_v21, 4  ;;  %v2204_v3 = vshra.s32 %v13543_v37, 4 }
 0x2e4   : > { %v3644_v39 = vsel %vm10653_vm7, %v3580_v28, %v3516_v7  ;;  %v10733_v30 = vshra.s32 %v13544_v25, 4  ;;  %v10736_v58 = vshra.s32 %v13545_v17, 4  ;;  %v10739_v47 = vshra.s32 %v13546_v42, 4 }
 0x2e5   : > { %v3700_v13 = vpack.c.bf16 %v3644_v39, %v3642_v44  ;;  %v2266_v20 = vand.u32 1, %v2202_v19  ;;  %v2268_v63 = vand.u32 1, %v2204_v3  ;;  %v2394_v61 = vand.u32 2, %v2202_v19 }
 0x2e6   : > { %v2396_v14 = vand.u32 2, %v2204_v3  ;;  %v2522_v1 = vand.u32 4, %v2202_v19  ;;  %v2524_v34 = vand.u32 4, %v2204_v3  ;;  %v2650_v33 = vand.u32 8, %v2202_v19 }
 0x2e7   : > { %3822 = vmatpush.bf16.msrb.mxu0 %v3700_v13  ;;  %vm10741_vm8 = vcmp.ne.s32.totalorder %v2266_v20, 0  ;;  %vm10745_vm9 = vcmp.ne.s32.totalorder %v2268_v63, 0  ;;  %vm10749_vm10 = vcmp.ne.s32.totalorder %v2394_v61, 0  ;;  %v2652_v29 = vand.u32 8, %v2204_v3 }
 0x2e8   : > { %vm10753_vm11 = vcmp.ne.s32.totalorder %v2396_v14, 0  ;;  %vm10757_vm12 = vcmp.ne.s32.totalorder %v2522_v1, 0  ;;  %vm10761_vm13 = vcmp.ne.s32.totalorder %v2524_v34, 0  ;;  %vm10765_vm14 = vcmp.ne.s32.totalorder %v2650_v33, 0 }
 0x2e9   : > { %vm10769_vm15 = vcmp.ne.s32.totalorder %v2652_v29, 0  ;;  %v2778_v56 = vsel %vm10741_vm8, -0.6961928, %v12937_v36  ;;  %v2780_v22 = vsel %vm10745_vm9, -0.6961928, %v12937_v36  ;;  %v2970_v41 = vsel %vm10741_vm8, 0.0, %v12924_v9 }
 0x2ea   : > { %v2842_v23 = vsel %vm10741_vm8, -0.3949175, %v12923_v52  ;;  %v2844_v60 = vsel %vm10745_vm9, -0.3949175, %v12923_v52  ;;  %v2906_v49 = vsel %vm10741_vm8, -0.18477343, %v12885_v57 }
 0x2eb   : > { %v2908_v51 = vsel %vm10745_vm9, -0.18477343, %v12885_v57  ;;  %v2972_v62 = vsel %vm10745_vm9, 0.0, %v12924_v9  ;;  %v3034_v4 = vsel %vm10741_vm8, 0.1609302, %v12866_v11  ;;  %v3226_v48 = vsel %vm10741_vm8, 1.0, %v12964_v40 }
 0x2ec   : > { %v3036_v31 = vsel %vm10745_vm9, 0.1609302, %v12866_v11  ;;  %v3098_v15 = vsel %vm10741_vm8, 0.33791524, %v12867_v24  ;;  %v3100_v38 = vsel %vm10745_vm9, 0.33791524, %v12867_v24  ;;  %v3290_v26 = vsel %vm10749_vm10, %v2842_v23, %v2778_v56 }
 0x2ed   : > { %v3162_v8 = vsel %vm10741_vm8, 0.562617, %v12868_v53  ;;  %v3164_v45 = vsel %vm10745_vm9, 0.562617, %v12868_v53  ;;  %v3228_v12 = vsel %vm10745_vm9, 1.0, %v12964_v40  ;;  %v3292_v2 = vsel %vm10753_vm11, %v2844_v60, %v2780_v22 }
 0x2ee   : > { %v3354_v18 = vsel %vm10749_vm10, %v2970_v41, %v2906_v49  ;;  %v3356_v7 = vsel %vm10753_vm11, %v2972_v62, %v2908_v51  ;;  %v3418_v46 = vsel %vm10749_vm10, %v3098_v15, %v3034_v4  ;;  %v3420_v28 = vsel %vm10753_vm11, %v3100_v38, %v3036_v31 }
 0x2ef   : > { %v3482_v44 = vsel %vm10749_vm10, %v3226_v48, %v3162_v8  ;;  %v3484_v21 = vsel %vm10753_vm11, %v3228_v12, %v3164_v45  ;;  %v3546_v19 = vsel %vm10757_vm12, %v3354_v18, %v3290_v26  ;;  %v3548_v37 = vsel %vm10761_vm13, %v3356_v7, %v3292_v2 }
 0x2f0   : > { %v3610_v3 = vsel %vm10757_vm12, %v3482_v44, %v3418_v46  ;;  %v3612_v39 = vsel %vm10761_vm13, %v3484_v21, %v3420_v28  ;;  %v2235_v25 = vand.u32 1, %v10733_v30  ;;  %v2237_v17 = vand.u32 1, %v10736_v58 }
 0x2f1   : > { %v3674_v42 = vsel %vm10765_vm14, %v3610_v3, %v3546_v19  ;;  %v3676_v13 = vsel %vm10769_vm15, %v3612_v39, %v3548_v37  ;;  %v2363_v20 = vand.u32 2, %v10733_v30  ;;  %v2365_v63 = vand.u32 2, %v10736_v58  ;;  %v13579_v3 = vld [vmem:[#allocation39_spill] sm:$0xff] }
 0x2f2   : > { %v3716_v61 = vpack.c.bf16 %v3676_v13, %v3674_v42  ;;  %vm10853_vm0 = vcmp.ne.s32.totalorder %v2235_v25, 0  ;;  %vm10857_vm1 = vcmp.ne.s32.totalorder %v2237_v17, 0  ;;  %v2491_v34 = vand.u32 4, %v10733_v30 }
 0x2f3   : > { %vm10862_vm2 = vcmp.ne.s32.totalorder %v2363_v20, 0  ;;  %vm10866_vm3 = vcmp.ne.s32.totalorder %v2365_v63, 0  ;;  %v2493_v35 = vand.u32 4, %v10736_v58  ;;  %v2619_v16 = vand.u32 8, %v10733_v30 }
 0x2f4   : > { %3836 = vmatpush.bf16.msrb.mxu1 %v3716_v61  ;;  %vm10872_vm4 = vcmp.ne.s32.totalorder %v2491_v34, 0  ;;  %v2621_v59 = vand.u32 8, %v10736_v58  ;;  %v2747_v43 = vsel %vm10853_vm0, -0.6961928, %v12937_v36  ;;  %v2749_v54 = vsel %vm10857_vm1, -0.6961928, %v12937_v36 }
 0x2f5   : > { %vm10883_vm5 = vcmp.ne.s32.totalorder %v2493_v35, 0  ;;  %vm10887_vm6 = vcmp.ne.s32.totalorder %v2619_v16, 0  ;;  %v2811_v58 = vsel %vm10853_vm0, -0.3949175, %v12923_v52  ;;  %v2813_v10 = vsel %vm10857_vm1, -0.3949175, %v12923_v52 }
 0x2f6   : > { %vm10897_vm7 = vcmp.ne.s32.totalorder %v2621_v59, 0  ;;  %v2875_v22 = vsel %vm10853_vm0, -0.18477343, %v12885_v57  ;;  %v2877_v41 = vsel %vm10857_vm1, -0.18477343, %v12885_v57  ;;  %v2939_v23 = vsel %vm10853_vm0, 0.0, %v12924_v9 }
 0x2f7   : > { %v2941_v60 = vsel %vm10857_vm1, 0.0, %v12924_v9  ;;  %v3003_v49 = vsel %vm10853_vm0, 0.1609302, %v12866_v11  ;;  %v3005_v51 = vsel %vm10857_vm1, 0.1609302, %v12866_v11  ;;  %v3195_v62 = vsel %vm10853_vm0, 1.0, %v12964_v40 }
 0x2f8   : > { %v3067_v4 = vsel %vm10853_vm0, 0.33791524, %v12867_v24  ;;  %v3069_v48 = vsel %vm10857_vm1, 0.33791524, %v12867_v24  ;;  %v3131_v31 = vsel %vm10853_vm0, 0.562617, %v12868_v53  ;;  %v3259_v15 = vsel %vm10862_vm2, %v2811_v58, %v2747_v43 }
 0x2f9   : > { %v3133_v38 = vsel %vm10857_vm1, 0.562617, %v12868_v53  ;;  %v3197_v26 = vsel %vm10857_vm1, 1.0, %v12964_v40  ;;  %v3261_v8 = vsel %vm10866_vm3, %v2813_v10, %v2749_v54  ;;  %v3323_v45 = vsel %vm10862_vm2, %v2939_v23, %v2875_v22 }
 0x2fa   : > { %v3325_v12 = vsel %vm10866_vm3, %v2941_v60, %v2877_v41  ;;  %v3387_v2 = vsel %vm10862_vm2, %v3067_v4, %v3003_v49  ;;  %v3389_v18 = vsel %vm10866_vm3, %v3069_v48, %v3005_v51  ;;  %v3451_v7 = vsel %vm10862_vm2, %v3195_v62, %v3131_v31 }
 0x2fb   : > { %v3453_v46 = vsel %vm10866_vm3, %v3197_v26, %v3133_v38  ;;  %v3515_v28 = vsel %vm10872_vm4, %v3323_v45, %v3259_v15  ;;  %v3517_v44 = vsel %vm10883_vm5, %v3325_v12, %v3261_v8  ;;  %v3579_v21 = vsel %vm10872_vm4, %v3451_v7, %v3387_v2 }
 0x2fc   : > { %v3581_v19 = vsel %vm10883_vm5, %v3453_v46, %v3389_v18  ;;  %v3643_v37 = vsel %vm10887_vm6, %v3579_v21, %v3515_v28  ;;  %v2205_v39 = vshra.s32 %v13579_v3, 4  ;;  %v2267_v25 = vand.u32 1, %v10739_v47  ;;  %v13597_v3 = vld [vmem:[#allocation41_spill] sm:$0xff] }
 0x2fd   : > { %v3645_v17 = vsel %vm10897_vm7, %v3581_v19, %v3517_v44  ;;  %v2395_v42 = vand.u32 2, %v10739_v47  ;;  %v2523_v13 = vand.u32 4, %v10739_v47  ;;  %v2651_v20 = vand.u32 8, %v10739_v47  ;;  %v13596_v19 = vld [vmem:[#allocation40_spill] sm:$0xff] }
 0x2fe   : > { %v3701_v63 = vpack.c.bf16 %v3645_v17, %v3643_v37  ;;  %v2269_v61 = vand.u32 1, %v2205_v39  ;;  %vm10970_vm8 = vcmp.ne.s32.totalorder %v2267_v25, 0  ;;  %v2397_v1 = vand.u32 2, %v2205_v39  ;;  %v13598_v17 = vld [vmem:[#allocation42_spill] sm:$0xff] }
 0x2ff   : > { %vm10974_vm9 = vcmp.ne.s32.totalorder %v2395_v42, 0  ;;  %v2525_v33 = vand.u32 4, %v2205_v39  ;;  %vm10978_vm10 = vcmp.ne.s32.totalorder %v2523_v13, 0  ;;  %v2653_v35 = vand.u32 8, %v2205_v39  ;;  %v13599_v13 = vld [vmem:[#allocation43_spill] sm:$0xff] }
 0x300   : > { %3850 = vmatpush.bf16.msrb.mxu2 %v3701_v63  ;;  %vm10982_vm11 = vcmp.ne.s32.totalorder %v2269_v61, 0  ;;  %vm10986_vm12 = vcmp.ne.s32.totalorder %v2397_v1, 0  ;;  %vm10990_vm13 = vcmp.ne.s32.totalorder %v2651_v20, 0  ;;  %v2779_v59 = vsel %vm10970_vm8, -0.6961928, %v12937_v36  ;;  %v13600_v63 = vld [vmem:[#allocation44_spill] sm:$0xff] }
 0x301   : > { %vm10997_vm14 = vcmp.ne.s32.totalorder %v2525_v33, 0  ;;  %vm11001_vm15 = vcmp.ne.s32.totalorder %v2653_v35, 0  ;;  %v2781_v55 = vsel %vm10982_vm11, -0.6961928, %v12937_v36  ;;  %v2843_v30 = vsel %vm10970_vm8, -0.3949175, %v12923_v52 }
 0x302   : > { %v2845_v58 = vsel %vm10982_vm11, -0.3949175, %v12923_v52  ;;  %v2907_v10 = vsel %vm10970_vm8, -0.18477343, %v12885_v57  ;;  %v2909_v56 = vsel %vm10982_vm11, -0.18477343, %v12885_v57  ;;  %v3291_v22 = vsel %vm10974_vm9, %v2843_v30, %v2779_v59 }
 0x303   : > { %v2971_v41 = vsel %vm10970_vm8, 0.0, %v12924_v9  ;;  %v2973_v23 = vsel %vm10982_vm11, 0.0, %v12924_v9  ;;  %v3035_v60 = vsel %vm10970_vm8, 0.1609302, %v12866_v11  ;;  %v3037_v49 = vsel %vm10982_vm11, 0.1609302, %v12866_v11 }
 0x304   : > { %v3099_v51 = vsel %vm10970_vm8, 0.33791524, %v12867_v24  ;;  %v3101_v62 = vsel %vm10982_vm11, 0.33791524, %v12867_v24  ;;  %v3163_v4 = vsel %vm10970_vm8, 0.562617, %v12868_v53  ;;  %v3293_v48 = vsel %vm10986_vm12, %v2845_v58, %v2781_v55 }
 0x305   : > { %v3165_v31 = vsel %vm10982_vm11, 0.562617, %v12868_v53  ;;  %v3227_v15 = vsel %vm10970_vm8, 1.0, %v12964_v40  ;;  %v3229_v38 = vsel %vm10982_vm11, 1.0, %v12964_v40  ;;  %v3355_v26 = vsel %vm10974_vm9, %v2971_v41, %v2907_v10 }
 0x306   : > { %v3357_v8 = vsel %vm10986_vm12, %v2973_v23, %v2909_v56  ;;  %v3419_v45 = vsel %vm10974_vm9, %v3099_v51, %v3035_v60  ;;  %v3421_v12 = vsel %vm10986_vm12, %v3101_v62, %v3037_v49  ;;  %v3483_v2 = vsel %vm10974_vm9, %v3227_v15, %v3163_v4 }
 0x307   : > { %v3485_v18 = vsel %vm10986_vm12, %v3229_v38, %v3165_v31  ;;  %v3547_v7 = vsel %vm10978_vm10, %v3355_v26, %v3291_v22  ;;  %v3549_v46 = vsel %vm10997_vm14, %v3357_v8, %v3293_v48  ;;  %v3611_v28 = vsel %vm10978_vm10, %v3483_v2, %v3419_v45 }
 0x308   : > { %v3613_v44 = vsel %vm10997_vm14, %v3485_v18, %v3421_v12  ;;  %v3675_v21 = vsel %vm10990_vm13, %v3611_v28, %v3547_v7  ;;  %v2166_v37 = vshra.s32 %v13596_v19, 4  ;;  %v2168_v39 = vshra.s32 %v13597_v3, 4 }
 0x309   : > { %v3677_v25 = vsel %vm11001_vm15, %v3613_v44, %v3549_v46  ;;  %v11081_v42 = vshra.s32 %v13598_v17, 4  ;;  %v11084_v20 = vshra.s32 %v13599_v13, 4  ;;  %v11087_v61 = vshra.s32 %v13600_v63, 4 }
 0x30a   : > { %v3717_v14 = vpack.c.bf16 %v3677_v25, %v3675_v21  ;;  %v2230_v1 = vand.u32 1, %v2166_v37  ;;  %v2232_v34 = vand.u32 1, %v2168_v39  ;;  %v2358_v33 = vand.u32 2, %v2166_v37 }
 0x30b   : > { %v2360_v5 = vand.u32 2, %v2168_v39  ;;  %v2486_v35 = vand.u32 4, %v2166_v37  ;;  %v2488_v47 = vand.u32 4, %v2168_v39  ;;  %v2614_v16 = vand.u32 8, %v2166_v37 }
 0x30c   : > { %3864 = vmatpush.bf16.msrb.mxu3 %v3717_v14  ;;  %vm11089_vm0 = vcmp.ne.s32.totalorder %v2230_v1, 0  ;;  %vm11093_vm1 = vcmp.ne.s32.totalorder %v2232_v34, 0  ;;  %vm11097_vm2 = vcmp.ne.s32.totalorder %v2358_v33, 0  ;;  %v2616_v54 = vand.u32 8, %v2168_v39 }
 0x30d   : > { %vm11101_vm3 = vcmp.ne.s32.totalorder %v2360_v5, 0  ;;  %vm11105_vm4 = vcmp.ne.s32.totalorder %v2486_v35, 0  ;;  %vm11109_vm5 = vcmp.ne.s32.totalorder %v2488_v47, 0  ;;  %vm11113_vm6 = vcmp.ne.s32.totalorder %v2614_v16, 0 }
 0x30e   : > { %vm11117_vm7 = vcmp.ne.s32.totalorder %v2616_v54, 0  ;;  %v2742_v22 = vsel %vm11089_vm0, -0.6961928, %v12937_v36  ;;  %v2744_v41 = vsel %vm11093_vm1, -0.6961928, %v12937_v36  ;;  %v2934_v23 = vsel %vm11089_vm0, 0.0, %v12924_v9 }
 0x30f   : > { %v2806_v60 = vsel %vm11089_vm0, -0.3949175, %v12923_v52  ;;  %v2808_v49 = vsel %vm11093_vm1, -0.3949175, %v12923_v52  ;;  %v2870_v51 = vsel %vm11089_vm0, -0.18477343, %v12885_v57 }
 0x310   : > { %v2872_v62 = vsel %vm11093_vm1, -0.18477343, %v12885_v57  ;;  %v2936_v4 = vsel %vm11093_vm1, 0.0, %v12924_v9  ;;  %v2998_v48 = vsel %vm11089_vm0, 0.1609302, %v12866_v11  ;;  %v3190_v31 = vsel %vm11089_vm0, 1.0, %v12964_v40 }
 0x311   : > { %v3000_v15 = vsel %vm11093_vm1, 0.1609302, %v12866_v11  ;;  %v3062_v38 = vsel %vm11089_vm0, 0.33791524, %v12867_v24  ;;  %v3064_v26 = vsel %vm11093_vm1, 0.33791524, %v12867_v24  ;;  %v3254_v8 = vsel %vm11097_vm2, %v2806_v60, %v2742_v22 }
 0x312   : > { %v3126_v45 = vsel %vm11089_vm0, 0.562617, %v12868_v53  ;;  %v3128_v12 = vsel %vm11093_vm1, 0.562617, %v12868_v53  ;;  %v3192_v2 = vsel %vm11093_vm1, 1.0, %v12964_v40  ;;  %v3256_v18 = vsel %vm11101_vm3, %v2808_v49, %v2744_v41 }
 0x313   : > { %v3318_v7 = vsel %vm11097_vm2, %v2934_v23, %v2870_v51  ;;  %v3320_v46 = vsel %vm11101_vm3, %v2936_v4, %v2872_v62  ;;  %v3382_v28 = vsel %vm11097_vm2, %v3062_v38, %v2998_v48  ;;  %v3384_v44 = vsel %vm11101_vm3, %v3064_v26, %v3000_v15 }
 0x314   : > { %v3446_v21 = vsel %vm11097_vm2, %v3190_v31, %v3126_v45  ;;  %v3448_v19 = vsel %vm11101_vm3, %v3192_v2, %v3128_v12  ;;  %v3510_v37 = vsel %vm11105_vm4, %v3318_v7, %v3254_v8  ;;  %v3512_v3 = vsel %vm11109_vm5, %v3320_v46, %v3256_v18 }
 0x315   : > { %v3574_v39 = vsel %vm11105_vm4, %v3446_v21, %v3382_v28  ;;  %v3576_v25 = vsel %vm11109_vm5, %v3448_v19, %v3384_v44  ;;  %v2262_v17 = vand.u32 1, %v11081_v42  ;;  %v2264_v13 = vand.u32 1, %v11084_v20 }
 0x316   : > { %v3638_v63 = vsel %vm11113_vm6, %v3574_v39, %v3510_v37  ;;  %v3640_v14 = vsel %vm11117_vm7, %v3576_v25, %v3512_v3  ;;  %v2390_v1 = vand.u32 2, %v11081_v42  ;;  %v2392_v34 = vand.u32 2, %v11084_v20  ;;  %v13633_v39 = vld [vmem:[#allocation45_spill] sm:$0xff] }
 0x317   : > { %v3698_v33 = vpack.c.bf16 %v3640_v14, %v3638_v63  ;;  %vm11201_vm8 = vcmp.ne.s32.totalorder %v2262_v17, 0  ;;  %vm11205_vm9 = vcmp.ne.s32.totalorder %v2264_v13, 0  ;;  %v2518_v47 = vand.u32 4, %v11081_v42 }
 0x318   : > { %vm11210_vm10 = vcmp.ne.s32.totalorder %v2390_v1, 0  ;;  %vm11214_vm11 = vcmp.ne.s32.totalorder %v2392_v34, 0  ;;  %v2520_v59 = vand.u32 4, %v11084_v20  ;;  %v2646_v43 = vand.u32 8, %v11081_v42 }
 0x319   : > { %3823 = vmatpush.bf16.msrb.mxu0 %v3698_v33  ;;  %vm11220_vm12 = vcmp.ne.s32.totalorder %v2518_v47, 0  ;;  %v2648_v55 = vand.u32 8, %v11084_v20  ;;  %v2774_v30 = vsel %vm11201_vm8, -0.6961928, %v12937_v36  ;;  %v2776_v58 = vsel %vm11205_vm9, -0.6961928, %v12937_v36 }
 0x31a   : > { %vm11231_vm13 = vcmp.ne.s32.totalorder %v2520_v59, 0  ;;  %vm11235_vm14 = vcmp.ne.s32.totalorder %v2646_v43, 0  ;;  %v2838_v20 = vsel %vm11201_vm8, -0.3949175, %v12923_v52  ;;  %v2840_v56 = vsel %vm11205_vm9, -0.3949175, %v12923_v52 }
 0x31b   : > { %vm11245_vm15 = vcmp.ne.s32.totalorder %v2648_v55, 0  ;;  %v2902_v41 = vsel %vm11201_vm8, -0.18477343, %v12885_v57  ;;  %v2904_v23 = vsel %vm11205_vm9, -0.18477343, %v12885_v57  ;;  %v2966_v60 = vsel %vm11201_vm8, 0.0, %v12924_v9 }
 0x31c   : > { %v2968_v49 = vsel %vm11205_vm9, 0.0, %v12924_v9  ;;  %v3030_v51 = vsel %vm11201_vm8, 0.1609302, %v12866_v11  ;;  %v3032_v62 = vsel %vm11205_vm9, 0.1609302, %v12866_v11  ;;  %v3222_v4 = vsel %vm11201_vm8, 1.0, %v12964_v40 }
 0x31d   : > { %v3094_v48 = vsel %vm11201_vm8, 0.33791524, %v12867_v24  ;;  %v3096_v31 = vsel %vm11205_vm9, 0.33791524, %v12867_v24  ;;  %v3158_v15 = vsel %vm11201_vm8, 0.562617, %v12868_v53  ;;  %v3286_v38 = vsel %vm11210_vm10, %v2838_v20, %v2774_v30 }
 0x31e   : > { %v3160_v26 = vsel %vm11205_vm9, 0.562617, %v12868_v53  ;;  %v3224_v8 = vsel %vm11205_vm9, 1.0, %v12964_v40  ;;  %v3288_v45 = vsel %vm11214_vm11, %v2840_v56, %v2776_v58  ;;  %v3350_v12 = vsel %vm11210_vm10, %v2966_v60, %v2902_v41 }
 0x31f   : > { %v3352_v2 = vsel %vm11214_vm11, %v2968_v49, %v2904_v23  ;;  %v3414_v18 = vsel %vm11210_vm10, %v3094_v48, %v3030_v51  ;;  %v3416_v7 = vsel %vm11214_vm11, %v3096_v31, %v3032_v62  ;;  %v3478_v46 = vsel %vm11210_vm10, %v3222_v4, %v3158_v15 }
 0x320   : > { %v3480_v28 = vsel %vm11214_vm11, %v3224_v8, %v3160_v26  ;;  %v3542_v44 = vsel %vm11220_vm12, %v3350_v12, %v3286_v38  ;;  %v3544_v21 = vsel %vm11231_vm13, %v3352_v2, %v3288_v45  ;;  %v3606_v19 = vsel %vm11220_vm12, %v3478_v46, %v3414_v18 }
 0x321   : > { %v3608_v37 = vsel %vm11231_vm13, %v3480_v28, %v3416_v7  ;;  %v3670_v3 = vsel %vm11235_vm14, %v3606_v19, %v3542_v44  ;;  %v2169_v25 = vshra.s32 %v13633_v39, 4  ;;  %v2231_v17 = vand.u32 1, %v11087_v61  ;;  %v13651_v39 = vld [vmem:[#allocation47_spill] sm:$0xff] }
 0x322   : > { %v3672_v13 = vsel %vm11245_vm15, %v3608_v37, %v3544_v21  ;;  %v2359_v63 = vand.u32 2, %v11087_v61  ;;  %v2487_v14 = vand.u32 4, %v11087_v61  ;;  %v2615_v1 = vand.u32 8, %v11087_v61  ;;  %v13650_v37 = vld [vmem:[#allocation46_spill] sm:$0xff] }
 0x323   : > { %v3714_v34 = vpack.c.bf16 %v3672_v13, %v3670_v3  ;;  %v2233_v33 = vand.u32 1, %v2169_v25  ;;  %vm11318_vm0 = vcmp.ne.s32.totalorder %v2231_v17, 0  ;;  %v2361_v35 = vand.u32 2, %v2169_v25  ;;  %v13652_v13 = vld [vmem:[#allocation48_spill] sm:$0xff] }
 0x324   : > { %vm11322_vm1 = vcmp.ne.s32.totalorder %v2359_v63, 0  ;;  %v2489_v16 = vand.u32 4, %v2169_v25  ;;  %vm11326_vm2 = vcmp.ne.s32.totalorder %v2487_v14, 0  ;;  %v2617_v59 = vand.u32 8, %v2169_v25  ;;  %v13653_v14 = vld [vmem:[#allocation49_spill] sm:$0xff] }
 0x325   : > { %3837 = vmatpush.bf16.msrb.mxu1 %v3714_v34  ;;  %vm11330_vm3 = vcmp.ne.s32.totalorder %v2233_v33, 0  ;;  %vm11334_vm4 = vcmp.ne.s32.totalorder %v2361_v35, 0  ;;  %vm11338_vm5 = vcmp.ne.s32.totalorder %v2615_v1, 0  ;;  %v2743_v55 = vsel %vm11318_vm0, -0.6961928, %v12937_v36  ;;  %v13654_v34 = vld [vmem:[#allocation50_spill] sm:$0xff] }
 0x326   : > { %vm11345_vm6 = vcmp.ne.s32.totalorder %v2489_v16, 0  ;;  %vm11349_vm7 = vcmp.ne.s32.totalorder %v2617_v59, 0  ;;  %v2745_v10 = vsel %vm11330_vm3, -0.6961928, %v12937_v36  ;;  %v2807_v42 = vsel %vm11318_vm0, -0.3949175, %v12923_v52 }
 0x327   : > { %v2809_v20 = vsel %vm11330_vm3, -0.3949175, %v12923_v52  ;;  %v2871_v56 = vsel %vm11318_vm0, -0.18477343, %v12885_v57  ;;  %v2873_v22 = vsel %vm11330_vm3, -0.18477343, %v12885_v57  ;;  %v3255_v41 = vsel %vm11322_vm1, %v2807_v42, %v2743_v55 }
 0x328   : > { %v2935_v23 = vsel %vm11318_vm0, 0.0, %v12924_v9  ;;  %v2937_v60 = vsel %vm11330_vm3, 0.0, %v12924_v9  ;;  %v2999_v49 = vsel %vm11318_vm0, 0.1609302, %v12866_v11  ;;  %v3001_v51 = vsel %vm11330_vm3, 0.1609302, %v12866_v11 }
 0x329   : > { %v3063_v62 = vsel %vm11318_vm0, 0.33791524, %v12867_v24  ;;  %v3065_v4 = vsel %vm11330_vm3, 0.33791524, %v12867_v24  ;;  %v3127_v48 = vsel %vm11318_vm0, 0.562617, %v12868_v53  ;;  %v3257_v31 = vsel %vm11334_vm4, %v2809_v20, %v2745_v10 }
 0x32a   : > { %v3129_v15 = vsel %vm11330_vm3, 0.562617, %v12868_v53  ;;  %v3191_v38 = vsel %vm11318_vm0, 1.0, %v12964_v40  ;;  %v3193_v26 = vsel %vm11330_vm3, 1.0, %v12964_v40  ;;  %v3319_v8 = vsel %vm11322_vm1, %v2935_v23, %v2871_v56 }
 0x32b   : > { %v3321_v45 = vsel %vm11334_vm4, %v2937_v60, %v2873_v22  ;;  %v3383_v12 = vsel %vm11322_vm1, %v3063_v62, %v2999_v49  ;;  %v3385_v2 = vsel %vm11334_vm4, %v3065_v4, %v3001_v51  ;;  %v3447_v18 = vsel %vm11322_vm1, %v3191_v38, %v3127_v48 }
 0x32c   : > { %v3449_v7 = vsel %vm11334_vm4, %v3193_v26, %v3129_v15  ;;  %v3511_v46 = vsel %vm11326_vm2, %v3319_v8, %v3255_v41  ;;  %v3513_v28 = vsel %vm11345_vm6, %v3321_v45, %v3257_v31  ;;  %v3575_v44 = vsel %vm11326_vm2, %v3447_v18, %v3383_v12 }
 0x32d   : > { %v3577_v21 = vsel %vm11345_vm6, %v3449_v7, %v3385_v2  ;;  %v3639_v19 = vsel %vm11338_vm5, %v3575_v44, %v3511_v46  ;;  %v2199_v3 = vshra.s32 %v13650_v37, 4  ;;  %v2201_v25 = vshra.s32 %v13651_v39, 4 }
 0x32e   : > { %v3641_v17 = vsel %vm11349_vm7, %v3577_v21, %v3513_v28  ;;  %v11429_v63 = vshra.s32 %v13652_v13, 4  ;;  %v11432_v1 = vshra.s32 %v13653_v14, 4  ;;  %v11435_v33 = vshra.s32 %v13654_v34, 4 }
 0x32f   : > { %v3699_v5 = vpack.c.bf16 %v3641_v17, %v3639_v19  ;;  %v2263_v35 = vand.u32 1, %v2199_v3  ;;  %v2265_v47 = vand.u32 1, %v2201_v25  ;;  %v2391_v16 = vand.u32 2, %v2199_v3 }
 0x330   : > { %v2393_v29 = vand.u32 2, %v2201_v25  ;;  %v2519_v59 = vand.u32 4, %v2199_v3  ;;  %v2521_v61 = vand.u32 4, %v2201_v25  ;;  %v2647_v43 = vand.u32 8, %v2199_v3 }
 0x331   : > { %3851 = vmatpush.bf16.msrb.mxu2 %v3699_v5  ;;  %vm11437_vm8 = vcmp.ne.s32.totalorder %v2263_v35, 0  ;;  %vm11441_vm9 = vcmp.ne.s32.totalorder %v2265_v47, 0  ;;  %vm11445_vm10 = vcmp.ne.s32.totalorder %v2391_v16, 0  ;;  %v2649_v58 = vand.u32 8, %v2201_v25 }
 0x332   : > { %vm11449_vm11 = vcmp.ne.s32.totalorder %v2393_v29, 0  ;;  %vm11453_vm12 = vcmp.ne.s32.totalorder %v2519_v59, 0  ;;  %vm11457_vm13 = vcmp.ne.s32.totalorder %v2521_v61, 0  ;;  %vm11461_vm14 = vcmp.ne.s32.totalorder %v2647_v43, 0 }
 0x333   : > { %vm11465_vm15 = vcmp.ne.s32.totalorder %v2649_v58, 0  ;;  %v2775_v41 = vsel %vm11437_vm8, -0.6961928, %v12937_v36  ;;  %v2777_v23 = vsel %vm11441_vm9, -0.6961928, %v12937_v36  ;;  %v2967_v60 = vsel %vm11437_vm8, 0.0, %v12924_v9 }
 0x334   : > { %v2839_v49 = vsel %vm11437_vm8, -0.3949175, %v12923_v52  ;;  %v2841_v51 = vsel %vm11441_vm9, -0.3949175, %v12923_v52  ;;  %v2903_v62 = vsel %vm11437_vm8, -0.18477343, %v12885_v57 }
 0x335   : > { %v2905_v4 = vsel %vm11441_vm9, -0.18477343, %v12885_v57  ;;  %v2969_v48 = vsel %vm11441_vm9, 0.0, %v12924_v9  ;;  %v3031_v31 = vsel %vm11437_vm8, 0.1609302, %v12866_v11  ;;  %v3223_v15 = vsel %vm11437_vm8, 1.0, %v12964_v40 }
 0x336   : > { %v3033_v38 = vsel %vm11441_vm9, 0.1609302, %v12866_v11  ;;  %v3095_v26 = vsel %vm11437_vm8, 0.33791524, %v12867_v24  ;;  %v3097_v8 = vsel %vm11441_vm9, 0.33791524, %v12867_v24  ;;  %v3287_v45 = vsel %vm11445_vm10, %v2839_v49, %v2775_v41 }
 0x337   : > { %v3159_v12 = vsel %vm11437_vm8, 0.562617, %v12868_v53  ;;  %v3161_v2 = vsel %vm11441_vm9, 0.562617, %v12868_v53  ;;  %v3225_v18 = vsel %vm11441_vm9, 1.0, %v12964_v40  ;;  %v3289_v7 = vsel %vm11449_vm11, %v2841_v51, %v2777_v23 }
 0x338   : > { %v3351_v46 = vsel %vm11445_vm10, %v2967_v60, %v2903_v62  ;;  %v3353_v28 = vsel %vm11449_vm11, %v2969_v48, %v2905_v4  ;;  %v3415_v44 = vsel %vm11445_vm10, %v3095_v26, %v3031_v31  ;;  %v3417_v21 = vsel %vm11449_vm11, %v3097_v8, %v3033_v38 }
 0x339   : > { %v3479_v19 = vsel %vm11445_vm10, %v3223_v15, %v3159_v12  ;;  %v3481_v37 = vsel %vm11449_vm11, %v3225_v18, %v3161_v2  ;;  %v3543_v3 = vsel %vm11453_vm12, %v3351_v46, %v3287_v45  ;;  %v3545_v39 = vsel %vm11457_vm13, %v3353_v28, %v3289_v7 }
 0x33a   : > { %v3607_v25 = vsel %vm11453_vm12, %v3479_v19, %v3415_v44  ;;  %v3609_v17 = vsel %vm11457_vm13, %v3481_v37, %v3417_v21  ;;  %v2226_v13 = vand.u32 1, %v11429_v63  ;;  %v2228_v14 = vand.u32 1, %v11432_v1 }
 0x33b   : > { %v3671_v34 = vsel %vm11461_vm14, %v3607_v25, %v3543_v3  ;;  %v3673_v5 = vsel %vm11465_vm15, %v3609_v17, %v3545_v39  ;;  %v2354_v35 = vand.u32 2, %v11429_v63  ;;  %v2356_v47 = vand.u32 2, %v11432_v1  ;;  %v13687_v25 = vld [vmem:[#allocation51_spill] sm:$0xff] }
 0x33c   : > { %v3715_v16 = vpack.c.bf16 %v3673_v5, %v3671_v34  ;;  %vm11549_vm0 = vcmp.ne.s32.totalorder %v2226_v13, 0  ;;  %vm11553_vm1 = vcmp.ne.s32.totalorder %v2228_v14, 0  ;;  %v2482_v61 = vand.u32 4, %v11429_v63 }
 0x33d   : > { %vm11558_vm2 = vcmp.ne.s32.totalorder %v2354_v35, 0  ;;  %vm11562_vm3 = vcmp.ne.s32.totalorder %v2356_v47, 0  ;;  %v2484_v55 = vand.u32 4, %v11432_v1  ;;  %v2610_v30 = vand.u32 8, %v11429_v63 }
 0x33e   : > { %3865 = vmatpush.bf16.msrb.mxu3 %v3715_v16  ;;  %vm11568_vm4 = vcmp.ne.s32.totalorder %v2482_v61, 0  ;;  %v2612_v10 = vand.u32 8, %v11432_v1  ;;  %v2738_v42 = vsel %vm11549_vm0, -0.6961928, %v12937_v36  ;;  %v2740_v20 = vsel %vm11553_vm1, -0.6961928, %v12937_v36 }
 0x33f   : > { %vm11579_vm5 = vcmp.ne.s32.totalorder %v2484_v55, 0  ;;  %vm11583_vm6 = vcmp.ne.s32.totalorder %v2610_v30, 0  ;;  %v2802_v1 = vsel %vm11549_vm0, -0.3949175, %v12923_v52  ;;  %v2804_v22 = vsel %vm11553_vm1, -0.3949175, %v12923_v52 }
 0x340   : > { %vm11593_vm7 = vcmp.ne.s32.totalorder %v2612_v10, 0  ;;  %v2866_v23 = vsel %vm11549_vm0, -0.18477343, %v12885_v57  ;;  %v2868_v60 = vsel %vm11553_vm1, -0.18477343, %v12885_v57  ;;  %v2930_v49 = vsel %vm11549_vm0, 0.0, %v12924_v9 }
 0x341   : > { %v2932_v51 = vsel %vm11553_vm1, 0.0, %v12924_v9  ;;  %v2994_v62 = vsel %vm11549_vm0, 0.1609302, %v12866_v11  ;;  %v2996_v4 = vsel %vm11553_vm1, 0.1609302, %v12866_v11  ;;  %v3186_v48 = vsel %vm11549_vm0, 1.0, %v12964_v40 }
 0x342   : > { %v3058_v31 = vsel %vm11549_vm0, 0.33791524, %v12867_v24  ;;  %v3060_v15 = vsel %vm11553_vm1, 0.33791524, %v12867_v24  ;;  %v3122_v38 = vsel %vm11549_vm0, 0.562617, %v12868_v53  ;;  %v3250_v26 = vsel %vm11558_vm2, %v2802_v1, %v2738_v42 }
 0x343   : > { %v3124_v8 = vsel %vm11553_vm1, 0.562617, %v12868_v53  ;;  %v3188_v45 = vsel %vm11553_vm1, 1.0, %v12964_v40  ;;  %v3252_v12 = vsel %vm11562_vm3, %v2804_v22, %v2740_v20  ;;  %v3314_v2 = vsel %vm11558_vm2, %v2930_v49, %v2866_v23 }
 0x344   : > { %v3316_v18 = vsel %vm11562_vm3, %v2932_v51, %v2868_v60  ;;  %v3378_v7 = vsel %vm11558_vm2, %v3058_v31, %v2994_v62  ;;  %v3380_v46 = vsel %vm11562_vm3, %v3060_v15, %v2996_v4  ;;  %v3442_v28 = vsel %vm11558_vm2, %v3186_v48, %v3122_v38 }
 0x345   : > { %v3444_v44 = vsel %vm11562_vm3, %v3188_v45, %v3124_v8  ;;  %v3506_v21 = vsel %vm11568_vm4, %v3314_v2, %v3250_v26  ;;  %v3508_v19 = vsel %vm11579_vm5, %v3316_v18, %v3252_v12  ;;  %v3570_v37 = vsel %vm11568_vm4, %v3442_v28, %v3378_v7 }
 0x346   : > { %v3572_v3 = vsel %vm11579_vm5, %v3444_v44, %v3380_v46  ;;  %v3634_v39 = vsel %vm11583_vm6, %v3570_v37, %v3506_v21  ;;  %v2196_v17 = vshra.s32 %v13687_v25, 4  ;;  %v2258_v13 = vand.u32 1, %v11435_v33 }
 0x347   : > { %v3636_v14 = vsel %vm11593_vm7, %v3572_v3, %v3508_v19  ;;  %v2386_v34 = vand.u32 2, %v11435_v33  ;;  %v2514_v5 = vand.u32 4, %v11435_v33  ;;  %v2642_v35 = vand.u32 8, %v11435_v33 }
 0x348   : > { %v3696_v47 = vpack.c.bf16 %v3636_v14, %v3634_v39  ;;  %v2260_v16 = vand.u32 1, %v2196_v17  ;;  %vm11666_vm8 = vcmp.ne.s32.totalorder %v2258_v13, 0  ;;  %v2388_v59 = vand.u32 2, %v2196_v17  ;;  %v13705_v14 = vld [vmem:[#allocation53_spill] sm:$0xff] }
 0x349   : > { %vm11670_vm9 = vcmp.ne.s32.totalorder %v2386_v34, 0  ;;  %v2516_v43 = vand.u32 4, %v2196_v17  ;;  %vm11674_vm10 = vcmp.ne.s32.totalorder %v2514_v5, 0  ;;  %v2644_v55 = vand.u32 8, %v2196_v17  ;;  %v13704_v17 = vld [vmem:[#allocation52_spill] sm:$0xff] }
 0x34a   : > { %3824 = vmatpush.bf16.msrb.mxu0 %v3696_v47  ;;  %vm11678_vm11 = vcmp.ne.s32.totalorder %v2260_v16, 0  ;;  %vm11682_vm12 = vcmp.ne.s32.totalorder %v2388_v59, 0  ;;  %vm11686_vm13 = vcmp.ne.s32.totalorder %v2642_v35, 0  ;;  %v2770_v10 = vsel %vm11666_vm8, -0.6961928, %v12937_v36 }
 0x34b   : > { %vm11693_vm14 = vcmp.ne.s32.totalorder %v2516_v43, 0  ;;  %vm11697_vm15 = vcmp.ne.s32.totalorder %v2644_v55, 0  ;;  %v2772_v56 = vsel %vm11678_vm11, -0.6961928, %v12937_v36  ;;  %v2834_v63 = vsel %vm11666_vm8, -0.3949175, %v12923_v52 }
 0x34c   : > { %v2836_v1 = vsel %vm11678_vm11, -0.3949175, %v12923_v52  ;;  %v2898_v22 = vsel %vm11666_vm8, -0.18477343, %v12885_v57  ;;  %v2900_v41 = vsel %vm11678_vm11, -0.18477343, %v12885_v57  ;;  %v3282_v23 = vsel %vm11670_vm9, %v2834_v63, %v2770_v10 }
 0x34d   : > { %v2962_v60 = vsel %vm11666_vm8, 0.0, %v12924_v9  ;;  %v2964_v49 = vsel %vm11678_vm11, 0.0, %v12924_v9  ;;  %v3026_v51 = vsel %vm11666_vm8, 0.1609302, %v12866_v11  ;;  %v3028_v62 = vsel %vm11678_vm11, 0.1609302, %v12866_v11 }
 0x34e   : > { %v3090_v4 = vsel %vm11666_vm8, 0.33791524, %v12867_v24  ;;  %v3092_v48 = vsel %vm11678_vm11, 0.33791524, %v12867_v24  ;;  %v3154_v31 = vsel %vm11666_vm8, 0.562617, %v12868_v53  ;;  %v3284_v15 = vsel %vm11682_vm12, %v2836_v1, %v2772_v56 }
 0x34f   : > { %v3156_v38 = vsel %vm11678_vm11, 0.562617, %v12868_v53  ;;  %v3218_v26 = vsel %vm11666_vm8, 1.0, %v12964_v40  ;;  %v3220_v8 = vsel %vm11678_vm11, 1.0, %v12964_v40  ;;  %v3346_v45 = vsel %vm11670_vm9, %v2962_v60, %v2898_v22 }
 0x350   : > { %v3348_v12 = vsel %vm11682_vm12, %v2964_v49, %v2900_v41  ;;  %v3410_v2 = vsel %vm11670_vm9, %v3090_v4, %v3026_v51  ;;  %v3412_v18 = vsel %vm11682_vm12, %v3092_v48, %v3028_v62  ;;  %v3474_v7 = vsel %vm11670_vm9, %v3218_v26, %v3154_v31 }
 0x351   : > { %v3476_v46 = vsel %vm11682_vm12, %v3220_v8, %v3156_v38  ;;  %v3538_v28 = vsel %vm11674_vm10, %v3346_v45, %v3282_v23  ;;  %v3540_v44 = vsel %vm11693_vm14, %v3348_v12, %v3284_v15  ;;  %v3602_v21 = vsel %vm11674_vm10, %v3474_v7, %v3410_v2 }
 0x352   : > { %v3604_v19 = vsel %vm11693_vm14, %v3476_v46, %v3412_v18  ;;  %v3666_v37 = vsel %vm11686_vm13, %v3602_v21, %v3538_v28  ;;  %v2163_v3 = vshra.s32 %v7925_v6, 4  ;;  %v2165_v39 = vshra.s32 %v8036_v0, 4 }
 0x353   : > { %v3668_v25 = vsel %vm11697_vm15, %v3604_v19, %v3540_v44  ;;  %v11777_v13 = vshra.s32 %v13704_v17, 4  ;;  %v11780_v34 = vshra.s32 %v13705_v14, 4  ;;  %v11783_v5 = vshra.s32 %v8045_v27, 4 }
 0x354   : > { %v3712_v35 = vpack.c.bf16 %v3668_v25, %v3666_v37  ;;  %v2227_v47 = vand.u32 1, %v2163_v3  ;;  %v2229_v16 = vand.u32 1, %v2165_v39  ;;  %v2355_v29 = vand.u32 2, %v2163_v3 }
 0x355   : > { %v2357_v59 = vand.u32 2, %v2165_v39  ;;  %v2483_v6 = vand.u32 4, %v2163_v3  ;;  %v2485_v61 = vand.u32 4, %v2165_v39  ;;  %v2611_v0 = vand.u32 8, %v2163_v3 }
 0x356   : > { %3838 = vmatpush.bf16.msrb.mxu1 %v3712_v35  ;;  %vm11785_vm0 = vcmp.ne.s32.totalorder %v2227_v47, 0  ;;  %vm11789_vm1 = vcmp.ne.s32.totalorder %v2229_v16, 0  ;;  %vm11793_vm2 = vcmp.ne.s32.totalorder %v2355_v29, 0  ;;  %v2613_v55 = vand.u32 8, %v2165_v39 }
 0x357   : > { %vm11797_vm3 = vcmp.ne.s32.totalorder %v2357_v59, 0  ;;  %vm11801_vm4 = vcmp.ne.s32.totalorder %v2483_v6, 0  ;;  %vm11805_vm5 = vcmp.ne.s32.totalorder %v2485_v61, 0  ;;  %vm11809_vm6 = vcmp.ne.s32.totalorder %v2611_v0, 0 }
 0x358   : > { %vm11813_vm7 = vcmp.ne.s32.totalorder %v2613_v55, 0  ;;  %v2739_v20 = vsel %vm11785_vm0, -0.6961928, %v12937_v36  ;;  %v2741_v56 = vsel %vm11789_vm1, -0.6961928, %v12937_v36  ;;  %v2931_v63 = vsel %vm11785_vm0, 0.0, %v12924_v9 }
 0x359   : > { %v2803_v1 = vsel %vm11785_vm0, -0.3949175, %v12923_v52  ;;  %v2805_v22 = vsel %vm11789_vm1, -0.3949175, %v12923_v52  ;;  %v2867_v41 = vsel %vm11785_vm0, -0.18477343, %v12885_v57 }
 0x35a   : > { %v2869_v23 = vsel %vm11789_vm1, -0.18477343, %v12885_v57  ;;  %v2933_v60 = vsel %vm11789_vm1, 0.0, %v12924_v9  ;;  %v2995_v49 = vsel %vm11785_vm0, 0.1609302, %v12866_v11  ;;  %v3187_v51 = vsel %vm11785_vm0, 1.0, %v12964_v40 }
 0x35b   : > { %v2997_v62 = vsel %vm11789_vm1, 0.1609302, %v12866_v11  ;;  %v3059_v4 = vsel %vm11785_vm0, 0.33791524, %v12867_v24  ;;  %v3061_v48 = vsel %vm11789_vm1, 0.33791524, %v12867_v24  ;;  %v3251_v31 = vsel %vm11793_vm2, %v2803_v1, %v2739_v20 }
 0x35c   : > { %v3123_v15 = vsel %vm11785_vm0, 0.562617, %v12868_v53  ;;  %v3125_v38 = vsel %vm11789_vm1, 0.562617, %v12868_v53  ;;  %v3189_v26 = vsel %vm11789_vm1, 1.0, %v12964_v40  ;;  %v3253_v8 = vsel %vm11797_vm3, %v2805_v22, %v2741_v56 }
 0x35d   : > { %v3315_v45 = vsel %vm11793_vm2, %v2931_v63, %v2867_v41  ;;  %v3317_v12 = vsel %vm11797_vm3, %v2933_v60, %v2869_v23  ;;  %v3379_v2 = vsel %vm11793_vm2, %v3059_v4, %v2995_v49  ;;  %v3381_v18 = vsel %vm11797_vm3, %v3061_v48, %v2997_v62 }
 0x35e   : > { %v3443_v7 = vsel %vm11793_vm2, %v3187_v51, %v3123_v15  ;;  %v3445_v46 = vsel %vm11797_vm3, %v3189_v26, %v3125_v38  ;;  %v3507_v28 = vsel %vm11801_vm4, %v3315_v45, %v3251_v31  ;;  %v3509_v44 = vsel %vm11805_vm5, %v3317_v12, %v3253_v8 }
 0x35f   : > { %v3571_v21 = vsel %vm11801_vm4, %v3443_v7, %v3379_v2  ;;  %v3573_v19 = vsel %vm11805_vm5, %v3445_v46, %v3381_v18  ;;  %v2259_v37 = vand.u32 1, %v11777_v13  ;;  %v2261_v3 = vand.u32 1, %v11780_v34 }
 0x360   : > { %v3635_v39 = vsel %vm11809_vm6, %v3571_v21, %v3507_v28  ;;  %v3637_v25 = vsel %vm11813_vm7, %v3573_v19, %v3509_v44  ;;  %v2387_v17 = vand.u32 2, %v11777_v13  ;;  %v2389_v14 = vand.u32 2, %v11780_v34 }
 0x361   : > { %v3697_v35 = vpack.c.bf16 %v3637_v25, %v3635_v39  ;;  %vm11897_vm8 = vcmp.ne.s32.totalorder %v2259_v37, 0  ;;  %vm11901_vm9 = vcmp.ne.s32.totalorder %v2261_v3, 0  ;;  %v2515_v29 = vand.u32 4, %v11777_v13 }
 0x362   : > { %vm11906_vm10 = vcmp.ne.s32.totalorder %v2387_v17, 0  ;;  %vm11910_vm11 = vcmp.ne.s32.totalorder %v2389_v14, 0  ;;  %v2517_v61 = vand.u32 4, %v11780_v34  ;;  %v2643_v0 = vand.u32 8, %v11777_v13 }
 0x363   : > { %3852 = vmatpush.bf16.msrb.mxu2 %v3697_v35  ;;  %vm11916_vm12 = vcmp.ne.s32.totalorder %v2515_v29, 0  ;;  %v2645_v54 = vand.u32 8, %v11780_v34  ;;  %v2771_v27 = vsel %vm11897_vm8, -0.6961928, %v12937_v36  ;;  %v2773_v55 = vsel %vm11901_vm9, -0.6961928, %v12937_v36 }
 0x364   : > { %vm11927_vm13 = vcmp.ne.s32.totalorder %v2517_v61, 0  ;;  %vm11931_vm14 = vcmp.ne.s32.totalorder %v2643_v0, 0  ;;  %v2835_v34 = vsel %vm11897_vm8, -0.3949175, %v12923_v52  ;;  %v2837_v30 = vsel %vm11901_vm9, -0.3949175, %v12923_v52 }
 0x365   : > { %vm11941_vm15 = vcmp.ne.s32.totalorder %v2645_v54, 0  ;;  %v2899_v10 = vsel %vm11897_vm8, -0.18477343, %v12885_v57  ;;  %v2901_v42 = vsel %vm11901_vm9, -0.18477343, %v12885_v57  ;;  %v2963_v20 = vsel %vm11897_vm8, 0.0, %v12924_v9 }
 0x366   : > { %v2965_v56 = vsel %vm11901_vm9, 0.0, %v12924_v9  ;;  %v3027_v63 = vsel %vm11897_vm8, 0.1609302, %v12866_v11  ;;  %v3029_v1 = vsel %vm11901_vm9, 0.1609302, %v12866_v11  ;;  %v3219_v22 = vsel %vm11897_vm8, 1.0, %v12964_v40 }
 0x367   : > { %v3091_v41 = vsel %vm11897_vm8, 0.33791524, %v12867_v24  ;;  %v3093_v23 = vsel %vm11901_vm9, 0.33791524, %v12867_v24  ;;  %v3155_v60 = vsel %vm11897_vm8, 0.562617, %v12868_v53  ;;  %v3283_v49 = vsel %vm11906_vm10, %v2835_v34, %v2771_v27 }
 0x368   : > { %v3157_v51 = vsel %vm11901_vm9, 0.562617, %v12868_v53  ;;  %v3221_v62 = vsel %vm11901_vm9, 1.0, %v12964_v40  ;;  %v3285_v4 = vsel %vm11910_vm11, %v2837_v30, %v2773_v55  ;;  %v3347_v48 = vsel %vm11906_vm10, %v2963_v20, %v2899_v10 }
 0x369   : > { %v3349_v31 = vsel %vm11910_vm11, %v2965_v56, %v2901_v42  ;;  %v3411_v15 = vsel %vm11906_vm10, %v3091_v41, %v3027_v63  ;;  %v3413_v38 = vsel %vm11910_vm11, %v3093_v23, %v3029_v1  ;;  %v3475_v26 = vsel %vm11906_vm10, %v3219_v22, %v3155_v60 }
 0x36a   : > { %v3477_v8 = vsel %vm11910_vm11, %v3221_v62, %v3157_v51  ;;  %v3539_v45 = vsel %vm11916_vm12, %v3347_v48, %v3283_v49  ;;  %v3541_v12 = vsel %vm11927_vm13, %v3349_v31, %v3285_v4  ;;  %v3603_v2 = vsel %vm11916_vm12, %v3475_v26, %v3411_v15 }
 0x36b   : > { %v3605_v18 = vsel %vm11927_vm13, %v3477_v8, %v3413_v38  ;;  %v3667_v7 = vsel %vm11931_vm14, %v3603_v2, %v3539_v45  ;;  %v2160_v46 = vshra.s32 %v8270_v32, 4  ;;  %v2222_v28 = vand.u32 1, %v11783_v5  ;;  %v13754_v8 = vld [vmem:[#allocation54_spill] sm:$0xff]  ;;  %v13755_v2 = vld [vmem:[#allocation55_spill] sm:$0xff] }
 0x36c   : > { %v3669_v44 = vsel %vm11941_vm15, %v3605_v18, %v3541_v12  ;;  %v2350_v21 = vand.u32 2, %v11783_v5  ;;  %v2478_v19 = vand.u32 4, %v11783_v5  ;;  %v2606_v37 = vand.u32 8, %v11783_v5  ;;  %v4205_v5 = vld [vmem:[%s4812_s24 + $0xc] sm:$0xf] }
 0x36d   : > { %v3713_v3 = vpack.c.bf16 %v3669_v44, %v3667_v7  ;;  %v2224_v39 = vand.u32 1, %v2160_v46  ;;  %vm12014_vm0 = vcmp.ne.s32.totalorder %v2222_v28, 0  ;;  %v2352_v17 = vand.u32 2, %v2160_v46  ;;  %v13756_v7 = vld [vmem:[#allocation56_spill] sm:$0xff]  ;;  %v13757_v28 = vld [vmem:[#allocation57_spill] sm:$0xff] }
 0x36e   : > { %vm12018_vm1 = vcmp.ne.s32.totalorder %v2350_v21, 0  ;;  %v2480_v14 = vand.u32 4, %v2160_v46  ;;  %vm12022_vm2 = vcmp.ne.s32.totalorder %v2478_v19, 0  ;;  %v2608_v47 = vand.u32 8, %v2160_v46 }
 0x36f   : > { %3866 = vmatpush.bf16.msrb.mxu3 %v3713_v3  ;;  %vm12026_vm3 = vcmp.ne.s32.totalorder %v2224_v39, 0  ;;  %vm12030_vm4 = vcmp.ne.s32.totalorder %v2352_v17, 0  ;;  %vm12034_vm5 = vcmp.ne.s32.totalorder %v2606_v37, 0  ;;  %v2734_v59 = vsel %vm12014_vm0, -0.6961928, %v12937_v36 }
 0x370   : > { %vm12041_vm6 = vcmp.ne.s32.totalorder %v2480_v14, 0  ;;  %vm12045_vm7 = vcmp.ne.s32.totalorder %v2608_v47, 0  ;;  %v2736_v0 = vsel %vm12026_vm3, -0.6961928, %v12937_v36  ;;  %v2798_v43 = vsel %vm12014_vm0, -0.3949175, %v12923_v52 }
 0x371   : > { %v2800_v54 = vsel %vm12026_vm3, -0.3949175, %v12923_v52  ;;  %v2862_v27 = vsel %vm12014_vm0, -0.18477343, %v12885_v57  ;;  %v2864_v55 = vsel %vm12026_vm3, -0.18477343, %v12885_v57  ;;  %v3246_v33 = vsel %vm12018_vm1, %v2798_v43, %v2734_v59 }
 0x372   : > { %v2926_v13 = vsel %vm12014_vm0, 0.0, %v12924_v9  ;;  %v2928_v34 = vsel %vm12026_vm3, 0.0, %v12924_v9  ;;  %v2990_v30 = vsel %vm12014_vm0, 0.1609302, %v12866_v11  ;;  %v2992_v58 = vsel %vm12026_vm3, 0.1609302, %v12866_v11 }
 0x373   : > { %v3054_v10 = vsel %vm12014_vm0, 0.33791524, %v12867_v24  ;;  %v3056_v42 = vsel %vm12026_vm3, 0.33791524, %v12867_v24  ;;  %v3118_v20 = vsel %vm12014_vm0, 0.562617, %v12868_v53  ;;  %v3248_v56 = vsel %vm12030_vm4, %v2800_v54, %v2736_v0 }
 0x374   : > { %v3120_v63 = vsel %vm12026_vm3, 0.562617, %v12868_v53  ;;  %v3182_v1 = vsel %vm12014_vm0, 1.0, %v12964_v40  ;;  %v3184_v22 = vsel %vm12026_vm3, 1.0, %v12964_v40  ;;  %v3310_v41 = vsel %vm12018_vm1, %v2926_v13, %v2862_v27 }
 0x375   : > { %v3312_v23 = vsel %vm12030_vm4, %v2928_v34, %v2864_v55  ;;  %v3374_v60 = vsel %vm12018_vm1, %v3054_v10, %v2990_v30  ;;  %v3376_v49 = vsel %vm12030_vm4, %v3056_v42, %v2992_v58  ;;  %v3438_v51 = vsel %vm12018_vm1, %v3182_v1, %v3118_v20 }
 0x376   : > { %v3440_v62 = vsel %vm12030_vm4, %v3184_v22, %v3120_v63  ;;  %v3502_v4 = vsel %vm12022_vm2, %v3310_v41, %v3246_v33  ;;  %v3504_v48 = vsel %vm12041_vm6, %v3312_v23, %v3248_v56  ;;  %v3566_v31 = vsel %vm12022_vm2, %v3438_v51, %v3374_v60 }
 0x377   : > { %v3568_v15 = vsel %vm12041_vm6, %v3440_v62, %v3376_v49  ;;  %v3630_v38 = vsel %vm12034_vm5, %v3566_v31, %v3502_v4  ;;  %v2190_v26 = vshra.s32 %v8388_v50, 4  ;;  %v2192_v45 = vshra.s32 %v13754_v8, 4 }
 0x378   : > { %v3632_v12 = vsel %vm12045_vm7, %v3568_v15, %v3504_v48  ;;  %v12125_v18 = vshra.s32 %v13755_v2, 4  ;;  %v12128_v46 = vshra.s32 %v13756_v7, 4  ;;  %v12131_v44 = vshra.s32 %v13757_v28, 4 }
 0x379   : > { %v3694_v21 = vpack.c.bf16 %v3632_v12, %v3630_v38  ;;  %v2254_v19 = vand.u32 1, %v2190_v26  ;;  %v2256_v37 = vand.u32 1, %v2192_v45  ;;  %v2382_v3 = vand.u32 2, %v2190_v26 }
 0x37a   : > { %v2384_v39 = vand.u32 2, %v2192_v45  ;;  %v2510_v50 = vand.u32 4, %v2190_v26  ;;  %v2512_v25 = vand.u32 4, %v2192_v45  ;;  %v2638_v17 = vand.u32 8, %v2190_v26 }
 0x37b   : > { %3825 = vmatpush.bf16.msrb.mxu0 %v3694_v21  ;;  %vm12133_vm8 = vcmp.ne.s32.totalorder %v2254_v19, 0  ;;  %vm12137_vm9 = vcmp.ne.s32.totalorder %v2256_v37, 0  ;;  %vm12141_vm10 = vcmp.ne.s32.totalorder %v2382_v3, 0  ;;  %v2640_v47 = vand.u32 8, %v2192_v45 }
 0x37c   : > { %vm12145_vm11 = vcmp.ne.s32.totalorder %v2384_v39, 0  ;;  %vm12149_vm12 = vcmp.ne.s32.totalorder %v2510_v50, 0  ;;  %vm12153_vm13 = vcmp.ne.s32.totalorder %v2512_v25, 0  ;;  %vm12157_vm14 = vcmp.ne.s32.totalorder %v2638_v17, 0 }
 0x37d   : > { %vm12161_vm15 = vcmp.ne.s32.totalorder %v2640_v47, 0  ;;  %v2766_v61 = vsel %vm12133_vm8, -0.6961928, %v12937_v36  ;;  %v2768_v0 = vsel %vm12137_vm9, -0.6961928, %v12937_v36  ;;  %v2958_v43 = vsel %vm12133_vm8, 0.0, %v12924_v9 }
 0x37e   : > { %v2830_v54 = vsel %vm12133_vm8, -0.3949175, %v12923_v52  ;;  %v2832_v27 = vsel %vm12137_vm9, -0.3949175, %v12923_v52  ;;  %v2894_v55 = vsel %vm12133_vm8, -0.18477343, %v12885_v57 }
 0x37f   : > { %v2896_v33 = vsel %vm12137_vm9, -0.18477343, %v12885_v57  ;;  %v2960_v13 = vsel %vm12137_vm9, 0.0, %v12924_v9  ;;  %v3022_v34 = vsel %vm12133_vm8, 0.1609302, %v12866_v11  ;;  %v3214_v30 = vsel %vm12133_vm8, 1.0, %v12964_v40 }
 0x380   : > { %v3024_v58 = vsel %vm12137_vm9, 0.1609302, %v12866_v11  ;;  %v3086_v10 = vsel %vm12133_vm8, 0.33791524, %v12867_v24  ;;  %v3088_v42 = vsel %vm12137_vm9, 0.33791524, %v12867_v24  ;;  %v3278_v20 = vsel %vm12141_vm10, %v2830_v54, %v2766_v61 }
 0x381   : > { %v3150_v56 = vsel %vm12133_vm8, 0.562617, %v12868_v53  ;;  %v3152_v63 = vsel %vm12137_vm9, 0.562617, %v12868_v53  ;;  %v3216_v1 = vsel %vm12137_vm9, 1.0, %v12964_v40  ;;  %v3280_v22 = vsel %vm12145_vm11, %v2832_v27, %v2768_v0 }
 0x382   : > { %v3342_v41 = vsel %vm12141_vm10, %v2958_v43, %v2894_v55  ;;  %v3344_v23 = vsel %vm12145_vm11, %v2960_v13, %v2896_v33  ;;  %v3406_v60 = vsel %vm12141_vm10, %v3086_v10, %v3022_v34  ;;  %v3408_v49 = vsel %vm12145_vm11, %v3088_v42, %v3024_v58 }
 0x383   : > { %v3470_v51 = vsel %vm12141_vm10, %v3214_v30, %v3150_v56  ;;  %v3472_v62 = vsel %vm12145_vm11, %v3216_v1, %v3152_v63  ;;  %v3534_v4 = vsel %vm12149_vm12, %v3342_v41, %v3278_v20  ;;  %v3536_v48 = vsel %vm12153_vm13, %v3344_v23, %v3280_v22 }
 0x384   : > { %v3598_v31 = vsel %vm12149_vm12, %v3470_v51, %v3406_v60  ;;  %v3600_v15 = vsel %vm12153_vm13, %v3472_v62, %v3408_v49  ;;  %v2223_v38 = vand.u32 1, %v12125_v18  ;;  %v2225_v26 = vand.u32 1, %v12128_v46  ;;  %v13790_v49 = vld [vmem:[#allocation58_spill] sm:$0xff] }
 0x385   : > { %v3662_v8 = vsel %vm12157_vm14, %v3598_v31, %v3534_v4  ;;  %v3664_v45 = vsel %vm12161_vm15, %v3600_v15, %v3536_v48  ;;  %v2351_v12 = vand.u32 2, %v12125_v18  ;;  %v2353_v2 = vand.u32 2, %v12128_v46 }
 0x386   : > { %v3710_v7 = vpack.c.bf16 %v3664_v45, %v3662_v8  ;;  %vm12245_vm0 = vcmp.ne.s32.totalorder %v2223_v38, 0  ;;  %vm12249_vm1 = vcmp.ne.s32.totalorder %v2225_v26, 0  ;;  %v2479_v19 = vand.u32 4, %v12125_v18  ;;  %v3728_v8 = vld [vmem:[%s4845_s12 + $0x10] sm:$0xff] }
 0x387   : > { %vm12254_vm2 = vcmp.ne.s32.totalorder %v2351_v12, 0  ;;  %vm12258_vm3 = vcmp.ne.s32.totalorder %v2353_v2, 0  ;;  %v2481_v39 = vand.u32 4, %v12128_v46  ;;  %v2607_v50 = vand.u32 8, %v12125_v18 }
 0x388   : > { %3839 = vmatpush.bf16.msrb.mxu1 %v3710_v7  ;;  %vm12264_vm4 = vcmp.ne.s32.totalorder %v2479_v19, 0  ;;  %v2609_v17 = vand.u32 8, %v12128_v46  ;;  %v2735_v32 = vsel %vm12245_vm0, -0.6961928, %v12937_v36  ;;  %v2737_v14 = vsel %vm12249_vm1, -0.6961928, %v12937_v36 }
 0x389   : > { %vm12275_vm5 = vcmp.ne.s32.totalorder %v2481_v39, 0  ;;  %vm12279_vm6 = vcmp.ne.s32.totalorder %v2607_v50, 0  ;;  %v2799_v46 = vsel %vm12245_vm0, -0.3949175, %v12923_v52  ;;  %v2801_v47 = vsel %vm12249_vm1, -0.3949175, %v12923_v52 }
 0x38a   : > { %vm12289_vm7 = vcmp.ne.s32.totalorder %v2609_v17, 0  ;;  %v2863_v16 = vsel %vm12245_vm0, -0.18477343, %v12885_v57  ;;  %v2865_v29 = vsel %vm12249_vm1, -0.18477343, %v12885_v57  ;;  %v2927_v59 = vsel %vm12245_vm0, 0.0, %v12924_v9 }
 0x38b   : > { %v2929_v6 = vsel %vm12249_vm1, 0.0, %v12924_v9  ;;  %v2991_v61 = vsel %vm12245_vm0, 0.1609302, %v12866_v11  ;;  %v2993_v0 = vsel %vm12249_vm1, 0.1609302, %v12866_v11  ;;  %v3183_v43 = vsel %vm12245_vm0, 1.0, %v12964_v40 }
 0x38c   : > { %v3055_v54 = vsel %vm12245_vm0, 0.33791524, %v12867_v24  ;;  %v3057_v27 = vsel %vm12249_vm1, 0.33791524, %v12867_v24  ;;  %v3119_v55 = vsel %vm12245_vm0, 0.562617, %v12868_v53  ;;  %v3247_v33 = vsel %vm12254_vm2, %v2799_v46, %v2735_v32 }
 0x38d   : > { %v3121_v13 = vsel %vm12249_vm1, 0.562617, %v12868_v53  ;;  %v3185_v34 = vsel %vm12249_vm1, 1.0, %v12964_v40  ;;  %v3249_v30 = vsel %vm12258_vm3, %v2801_v47, %v2737_v14  ;;  %v3311_v58 = vsel %vm12254_vm2, %v2927_v59, %v2863_v16  ;;  %v4188_v46 = vld [vmem:[%s4812_s24 + $0x8] sm:$0xf] }
 0x38e   : > { %v3313_v10 = vsel %vm12258_vm3, %v2929_v6, %v2865_v29  ;;  %v3375_v42 = vsel %vm12254_vm2, %v3055_v54, %v2991_v61  ;;  %v3377_v20 = vsel %vm12258_vm3, %v3057_v27, %v2993_v0  ;;  %v3439_v56 = vsel %vm12254_vm2, %v3183_v43, %v3119_v55  ;;  %v4207_v47 = vld [vmem:[%s4812_s24 + $0x14] sm:$0xf0]  ;;  %v4190_v0 = vld [vmem:[%s4812_s24 + $0x18] sm:$0xf0]  ;;  %s13807_s24 = sld [smem:[#allocation14_spill]] }
 0x38f   : > { %v3441_v63 = vsel %vm12258_vm3, %v3185_v34, %v3121_v13  ;;  %v3503_v1 = vsel %vm12264_vm4, %v3311_v58, %v3247_v33  ;;  %v3505_v22 = vsel %vm12275_vm5, %v3313_v10, %v3249_v30  ;;  %v3567_v41 = vsel %vm12264_vm4, %v3439_v56, %v3375_v42  ;;  %v3749_v56 = vpop.f32.mrf.mxu0 }
 0x390   : > { %v3569_v23 = vsel %vm12275_vm5, %v3441_v63, %v3377_v20  ;;  %v3631_v60 = vsel %vm12279_vm6, %v3567_v41, %v3503_v1  ;;  %v2193_v51 = vshra.s32 %v13790_v49, 4  ;;  %v2255_v62 = vand.u32 1, %v12131_v44  ;;  %v3763_v63 = vpop.f32.mrf.mxu1  ;;  %v3777_v1 = vpop.f32.mrf.mxu2  ;;  %v3726_v49 = vld [vmem:[%s4845_s12] sm:$0xff] }
 0x391   : > { %v3633_v4 = vsel %vm12289_vm7, %v3569_v23, %v3505_v22  ;;  %v2383_v48 = vand.u32 2, %v12131_v44  ;;  %v2511_v31 = vand.u32 4, %v12131_v44  ;;  %v2639_v15 = vand.u32 8, %v12131_v44  ;;  %v3791_v23 = vpop.f32.mrf.mxu3 }
 0x392   : > { %v3695_v38 = vpack.c.bf16 %v3633_v4, %v3631_v60  ;;  %v2257_v26 = vand.u32 1, %v2193_v51  ;;  %vm12362_vm8 = vcmp.ne.s32.totalorder %v2255_v62, 0  ;;  %v2385_v45 = vand.u32 2, %v2193_v51 }
 0x393   : > { %vm12366_vm9 = vcmp.ne.s32.totalorder %v2383_v48, 0  ;;  %v2513_v2 = vand.u32 4, %v2193_v51  ;;  %vm12370_vm10 = vcmp.ne.s32.totalorder %v2511_v31, 0  ;;  %v2641_v28 = vand.u32 8, %v2193_v51 }
 0x394   : > { %3853 = vmatpush.bf16.msrb.mxu2 %v3695_v38  ;;  %vm12374_vm11 = vcmp.ne.s32.totalorder %v2257_v26, 0  ;;  %vm12378_vm12 = vcmp.ne.s32.totalorder %v2385_v45, 0  ;;  %vm12382_vm13 = vcmp.ne.s32.totalorder %v2639_v15, 0  ;;  %v2767_v37 = vsel %vm12362_vm8, -0.6961928, %v12937_v36  ;;  %p4194_p8 = scmp.ne.s32.totalorder %s13807_s24, 1 }
 0x395   : > { %vm12389_vm14 = vcmp.ne.s32.totalorder %v2513_v2, 0  ;;  %vm12393_vm15 = vcmp.ne.s32.totalorder %v2641_v28, 0  ;;  %v2769_v50 = vsel %vm12374_vm11, -0.6961928, %v12937_v36  ;;  %v2831_v25 = vsel %vm12362_vm8, -0.3949175, %v12923_v52 }
 0x396   : > { %v2833_v17 = vsel %vm12374_vm11, -0.3949175, %v12923_v52  ;;  %v2895_v32 = vsel %vm12362_vm8, -0.18477343, %v12885_v57  ;;  %v2897_v14 = vsel %vm12374_vm11, -0.18477343, %v12885_v57  ;;  %v3279_v35 = vsel %vm12366_vm9, %v2831_v25, %v2767_v37 }
 0x397   : > { %v2959_v36 = vsel %vm12362_vm8, 0.0, %v12924_v9  ;;  %v2961_v52 = vsel %vm12374_vm11, 0.0, %v12924_v9  ;;  %v3023_v18 = vsel %vm12362_vm8, 0.1609302, %v12866_v11  ;;  %v3025_v57 = vsel %vm12374_vm11, 0.1609302, %v12866_v11  ;;  %v3751_v22 = vpop.f32.mrf.mxu0 }
 0x398   : > { %v3087_v16 = vsel %vm12362_vm8, 0.33791524, %v12867_v24  ;;  %v3089_v29 = vsel %vm12374_vm11, 0.33791524, %v12867_v24  ;;  %v3151_v9 = vsel %vm12362_vm8, 0.562617, %v12868_v53  ;;  %v3281_v59 = vsel %vm12378_vm12, %v2833_v17, %v2769_v50  ;;  %v3765_v41 = vpop.f32.mrf.mxu1  ;;  %v3779_v51 = vpop.f32.mrf.mxu2 }
 0x399   : > { %v3153_v11 = vsel %vm12374_vm11, 0.562617, %v12868_v53  ;;  %v3215_v6 = vsel %vm12362_vm8, 1.0, %v12964_v40  ;;  %v3217_v61 = vsel %vm12374_vm11, 1.0, %v12964_v40  ;;  %v3343_v24 = vsel %vm12366_vm9, %v2959_v36, %v2895_v32  ;;  %v3793_v15 = vpop.f32.mrf.mxu3  ;;  %v3727_v28 = vld [vmem:[%s4845_s12 + $0x8] sm:$0xff]  ;;  %v3729_v17 = vld [vmem:[%s4845_s12 + $0x18] sm:$0xff] }
 0x39a   : > { %v3345_v43 = vsel %vm12378_vm12, %v2961_v52, %v2897_v14  ;;  %v3407_v54 = vsel %vm12366_vm9, %v3087_v16, %v3023_v18  ;;  %v3409_v53 = vsel %vm12378_vm12, %v3089_v29, %v3025_v57  ;;  %v3471_v27 = vsel %vm12366_vm9, %v3215_v6, %v3151_v9  ;;  %s13808_s17 = sld [smem:[#allocation61_spill]] (!%p4194_p8) }
 0x39b   : > { %v3473_v55 = vsel %vm12378_vm12, %v3217_v61, %v3153_v11  ;;  %v3535_v40 = vsel %vm12370_vm10, %v3343_v24, %v3279_v35  ;;  %v3537_v33 = vsel %vm12389_vm14, %v3345_v43, %v3281_v59  ;;  %v3599_v13 = vsel %vm12370_vm10, %v3471_v27, %v3407_v54 }
 0x39c   : > { %v3601_v34 = vsel %vm12389_vm14, %v3473_v55, %v3409_v53  ;;  %v3663_v30 = vsel %vm12382_vm13, %v3599_v13, %v3535_v40  ;;  %v4189_v58 = vor.u32 %v4207_v47, %v4188_v46  ;;  %v4193_v10 = vor.u32 %v4205_v5, %v4190_v0 }
 0x39d   : > { %v3665_v42 = vsel %vm12393_vm15, %v3601_v34, %v3537_v33  ;;  %v3764_v60 = vadd.f32 %v3763_v63, %v3749_v56  ;;  %v3766_v26 = vadd.f32 %v3765_v41, %v3751_v22  ;;  %v3792_v12 = vadd.f32 %v3791_v23, %v3777_v1 }
 0x39e   : > { %v3711_v20 = vpack.c.bf16 %v3665_v42, %v3663_v30  ;;  %3826 = vmatmul.bf16.vlgmr.msrb.gmra.mxu0 %v4189_v58  ;;  %3840 = vmatmul.bf16.vlgmr.msrb.gmra.mxu1 %v4193_v10  ;;  %v3794_v25 = vadd.f32 %v3793_v15, %v3779_v51 }
 0x39f   : > { %3854 = vmatmul.bf16.vlgmr.msrb.gmra.mxu2 %v4189_v58  ;;  %v3796_v48 = vadd.f32 %v3764_v60, %v3726_v49  ;;  %v3798_v44 = vadd.f32 %v3766_v26, %v3728_v8  ;;  %v3797_v3 = vadd.f32 %v3792_v12, %v3727_v28 }
 0x3a0   : > { %3867 = vmatpush.bf16.msrb.mxu3 %v3711_v20  ;;  %v3799_v35 = vadd.f32 %v3794_v25, %v3729_v17 }
 0x3a3   : > { %3868 = vmatmul.bf16.vlgmr.msrb.gmra.mxu3 %v4193_v10 }
 0x41b   : > { %v3827_v62 = vpop.f32.mrf.mxu0  ;;  %v3841_v4 = vpop.f32.mrf.mxu1 }
 0x41c   : > { %v3842_v31 = vadd.f32 %v3841_v4, %v3827_v62 }
 0x41e   : > { %v3874_v38 = vadd.f32 %v3842_v31, %v3796_v48 }
 0x420   : > { %3878 = vst [vmem:[%s4845_s12] sm:$0xff] %v3874_v38 }
 0x422   : > { %v3855_v45 = vpop.f32.mrf.mxu2 }
 0x423   : > { %v3829_v2 = vpop.f32.mrf.mxu0  ;;  %v3843_v7 = vpop.f32.mrf.mxu1 }
 0x424   : > { %v3844_v21 = vadd.f32 %v3843_v7, %v3829_v2 }
 0x426   : > { %v3869_v19 = vpop.f32.mrf.mxu3  ;;  %v3876_v37 = vadd.f32 %v3844_v21, %v3798_v44 }
 0x427   : > { %v3870_v39 = vadd.f32 %v3869_v19, %v3855_v45 }
 0x428   : > { %3880 = vst [vmem:[%s4845_s12 + $0x10] sm:$0xff] %v3876_v37 }
 0x429   : > { %v3875_v50 = vadd.f32 %v3870_v39, %v3797_v3 }
 0x42a   : > { %v3857_v32 = vpop.f32.mrf.mxu2 }
 0x42b   : > { %3879 = vst [vmem:[%s4845_s12 + $0x8] sm:$0xff] %v3875_v50 }
 0x42e   : > { %v3871_v14 = vpop.f32.mrf.mxu3 }
 0x42f   : > { %v3872_v36 = vadd.f32 %v3871_v14, %v3857_v32  ;;  %3885 = sbr.rel (%p4194_p8) target bundleno = 1231 (0x4cf), region = 60 }
 0x431   : > { %v3877_v52 = vadd.f32 %v3872_v36, %v3799_v35 }
 0x433   : > { %3881 = vst [vmem:[%s4845_s12 + $0x18] sm:$0xff] %v3877_v52 }
 0x434   : > { %v3913_v18 = vld [vmem:[%s4843_s19] sm:$0xff]  ;;  %vm3926_vm0 = vcmask 1041408   ;;  %v3911_v46 = vld [vmem:[%s13808_s17 + $0x8] sm:$0xff]  ;;  %vm3922_vm1 = vcmask 31744   ;;  %v3887_v54 = vld [vmem:[%s4845_s12 + $0x8] sm:$0xff] }
 0x435   : > { %3915 = vst [vmem:[#allocation1] ss:$2 sm:$0xff] %v3913_v18  ;;  %v3910_v57 = vld [vmem:[%s13808_s17] sm:$0xff]  ;;  %v3886_v0 = vld [vmem:[%s4845_s12] sm:$0xff]  ;;  %v3888_v58 = vld [vmem:[%s4845_s12 + $0x10] sm:$0xff] }
 0x436   : > { %v3912_v11 = vpack.c.bf16 %v3911_v46, %v3910_v57  ;;  %v3890_v6 = vld [vmem:[%s412_s4] sm:$0x3] }
 0x437   : > { %v3892_v61 = vperm.slane %v3890_v6, 0  ;;  %v3893_v24 = vperm.slane %v3890_v6, 1  ;;  %v3900_v43 = vld [vmem:[%s417_s14] sm:$0x3] }
 0x438   : > { %v3902_v27 = vperm.slane %v3900_v43, 0  ;;  %v3903_v40 = vperm.slane %v3900_v43, 1 }
 0x439   : > { %v3896_v53 = vmul.f32 %v3892_v61, %v3886_v0  ;;  %v3897_v55 = vmul.f32 %v3893_v24, %v3887_v54  ;;  %v3898_v1 = vmul.f32 %v3892_v61, %v3888_v58 }
 0x43a   : > { %v3889_v10 = vld [vmem:[%s4845_s12 + $0x18] sm:$0xff] }
 0x43b   : > { %v3906_v33 = vadd.f32 %v3902_v27, %v3896_v53  ;;  %v3907_v13 = vadd.f32 %v3903_v40, %v3897_v55  ;;  %v3899_v22 = vmul.f32 %v3893_v24, %v3889_v10  ;;  %v3908_v41 = vadd.f32 %v3902_v27, %v3898_v1 }
 0x43c   : > { %v3916_v47 = vld.sshfl [vmem:[#allocation1] sm:$0xff pattern:$0x75316420]  ;;  %v3917_v5 = vld.sshfl [vmem:[#allocation1 + $0x8] sm:$0xff pattern:$0x75316420] }
 0x43d   : > { %v3920_v16 = vpack.c.bf16 %v3916_v47, %v3916_v47  ;;  %v3921_v29 = vpack.c.bf16 %v3917_v5, %v3917_v5  ;;  %v3909_v23 = vadd.f32 %v3903_v40, %v3899_v22 }
 0x43f   : > { %v3928_v9 = vsel %vm3926_vm0, %v3920_v16, 0  ;;  %v3931_v59 = vsel %vm3926_vm0, %v3921_v29, 0 }
 0x440   : > { %3940 = vmatpush.bf16.msra.mxu0 %v3928_v9  ;;  %3954 = vmatpush.bf16.msra.mxu1 %v3931_v59 }
 0x443   : > { %4195 = vmatmul.msk.bf16.vlgmr.msra.gmra.mxu0 %vm3922_vm1, %v3912_v11  ;;  %4196 = vmatmul.msk.bf16.vlgmr.msra.gmra.mxu1 %vm3922_vm1, %v3912_v11 }
 0x4c0   : > { %v3942_v34 = vpop.f32.mrf.mxu0  ;;  %v3956_v30 = vpop.f32.mrf.mxu1 }
 0x4c1   : > { %v3961_v42 = vmul.f32 2.0, %v3942_v34  ;;  %v3962_v20 = vmul.f32 2.0, %v3956_v30 }
 0x4c3   : > { %v3965_v56 = vadd.f32 %v3961_v42, %v3906_v33  ;;  %v3966_v63 = vadd.f32 %v3962_v20, %v3907_v13 }
 0x4c5   : > { %3969 = vst [vmem:[%s4845_s12] sm:$0xff] %v3965_v56 }
 0x4c6   : > { %3970 = vst [vmem:[%s4845_s12 + $0x8] sm:$0xff] %v3966_v63 }
 0x4c8   : > { %v3944_v60 = vpop.f32.mrf.mxu0  ;;  %v3958_v49 = vpop.f32.mrf.mxu1 }
 0x4c9   : > { %v3963_v51 = vmul.f32 2.0, %v3944_v60  ;;  %v3964_v62 = vmul.f32 2.0, %v3958_v49 }
 0x4cb   : > { %v3967_v4 = vadd.f32 %v3963_v51, %v3908_v41  ;;  %v3968_v48 = vadd.f32 %v3964_v62, %v3909_v23 }
 0x4cd   : > { %3971 = vst [vmem:[%s4845_s12 + $0x10] sm:$0xff] %v3967_v4 }
 0x4ce   : > { %3972 = vst [vmem:[%s4845_s12 + $0x18] sm:$0xff] %v3968_v48 }
 0x4cf PF: > { %s4208_s6 = sshll.u32 %s4553_s7, 4  ;;  %s13810_s20 = sld [smem:[#allocation63_spill]] }
 0x4d0   : > { %s3989_s23 = sshll.u32 %s4845_s12, 4  ;;  %s3974_s26 = scalar_lea.sflag [#allocation4], %s402_s29  ;;  %s3990_s23 = int_to_ptr.vmem [resolvable:$true] %s3989_s23 }
 0x4d5   : > { %s3988_s19 = scalar_lea.hbm %s13810_s20, %s4208_s6  ;;  %s4435_s7 = scalar_lea.hbm %s13810_s20, 64 }
 0x4d6   : > { %s3991_s24 = sshll.u32 %s3988_s19, 4  ;;  %s3992_s24 = int_to_ptr.hbm [resolvable:$true] %s3991_s24 }
 0x4d7   : > { %s4429_s18 = sshra.s32 %s3992_s24, 4  ;;  %s4430_s18 = int_to_ptr.hbm [resolvable:$true] %s4429_s18 }
 0x4d8   : > { %s4431_s27 = scalar_lea.hbm %s4430_s18, 32  ;;  %p4436_p10 = scmp.lt.s32.totalorder %s4430_s18, %s13810_s20 }
 0x4d9   : > { %p4432_p13 = scmp.ne.s32.totalorder %s4430_s18, %s4431_s27  ;;  %p4437_p11 = scmp.lt.s32.totalorder %s4435_s7, %s4431_s27 }
 0x4db   : > { %p4433_p6 = pnand %p4432_p13, %p4779_p5  ;;  %p4438_p1 = por %p4437_p11, %p4436_p10 }
 0x4dd   : > { %p4434_p9 = pneg %p4433_p6 }
 0x4df   : > { %p4439_p3 = pnand %p4438_p1, %p4434_p9 }
 0x4e1   : > { %4442 = shalt.err (!%p4439_p3)
}
 0x4e2   : > { %s4579_s29 = smov 256   ;;  %s4580_s12 = smov 512  }
 0x4e3   : > { %s4581_s0 = smov 16  }
 0x4e4   : > { %4213 = dma.vmem_to_hbm [thread:$0]  (%p4779_p5), %s3990_s23, 512, %s3992_s24, %s3974_s26, %s4579_s29, %s4580_s12, %s4581_s0  }
 0x4e5 PF: > { %p4227_p12 = scmp.ge.s32.totalorder %s4565_s10, 2  ;;  %s4006_s15 = sand.u32 1, %s4513_s21  }
 0x4e6   : > { %s4007_s6 = scalar_lea.sflag [#allocation4], %s4006_s15 }
 0x4e7   : > { %p4223_p0 = pnand %p4227_p12, %p4789_p4 }
 0x4e9   : > { %p4224_p2 = pneg %p4223_p0 }
 0x4eb   : > { %4508 = dma.done.wait (%p4224_p2), %s4007_s6, 512  }
 0x4ec   : > { %4510 = vsyncadd (%p4224_p2), %s4007_s6, 4294966784  ;;  %s25_s10 = sadd.s32 1, %s4565_s10   ;;  %s13812_s16 = sld [smem:[#allocation11_spill]] }
 0x4ed   : > { %p12530_p7 = scmp.ge.s32.totalorder %s25_s10, 6   ;;  %s13813_s23 = sld [smem:[#allocation18_spill]] }
 0x4ee   : > { %s13814_s14 = sld [smem:[#allocation12_spill]]  ;;  %s13820_s21 = smov %s4517_s22 }
 0x4ef   : > { %s13815_s26 = sld [smem:[#allocation19_spill]]  ;;  %s13822_s24 = smov %s4529_s25 }
 0x4f0   : > { %s13816_s19 = sld [smem:[#allocation13_spill]]  ;;  %s13824_s27 = smov %s4541_s28 }
 0x4f1   : > { %s13817_s29 = sld [smem:[#allocation16_spill]]  ;;  %s13826_s30 = smov %s4557_s8 }
 0x4f2   : > { %s13818_s11 = sld [smem:[#allocation15_spill]]  ;;  %s13821_s22 = smov %s13812_s16 }
 0x4f3   : > { %s13819_s18 = sld [smem:[#allocation17_spill]]  ;;  %s13827_s7 = smov %s4561_s9 }
 0x4f4   : > { %s13823_s25 = smov %s13814_s14 }
 0x4f5   :  { %24 = sbr.rel (!%p12530_p7) target bundleno = 18 (0x12), region = 122 }
 0x4f6   : > { %s13825_s28 = smov %s13816_s19 }
 0x4f8   : > { %s13828_s8 = smov %s13818_s11 }
 0x4f9   : > { %s13829_s9 = smov %s13819_s18 }
 0x4fa   :  { %4013 = vsyncpa [#allocation3], 1 }
 0x4fb   :  { %4015 = vsyncpa [#allocation3 + $0x1], 1 }
 0x4fc   :  { %4016 = vsyncpa [#allocation6], 1 }
 0x4fd   :  { %4018 = vsyncpa [#allocation6 + $0x1], 1 }
 0x4fe   :  { %4019 = vsyncpa [#allocation4], 1 }
 0x4ff   :  { %4021 = vsyncpa [#allocation4 + $0x1], 1 }

</bundles_post_ra>
